<compile_context>
chip_gen: v6e
topology: v6e:2x2x1
jax: 0.10.0
libtpu: 0.0.40
codegen_flags: <defaults>
</compile_context>

<pallas_src>
import jax
import jax.numpy as jnp
from jax import lax
from jax.experimental import pallas as pl
from jax.experimental.pallas import tpu as pltpu


# ---------------------------------------------------------------------------
# Fused Pallas kernel
# ---------------------------------------------------------------------------
def _bilstm_fused_kernel(
    x_ref,                                  # (T, B, D) time-major input
    wih0_ref, whh0_ref, b0_ref,             # layer 0 packed weights
    wih1_ref, whh1_ref, b1_ref,             # layer 1 packed weights
    fcw_ref, fcb_ref,                       # FC head
    out_ref,                                # (B, O)
    gx_ref, seqf_ref, seqb_ref,             # VMEM scratch
):
    T, B, D = x_ref.shape
    H = seqf_ref.shape[2]          # hidden size per direction
    H2 = 2 * H                     # packed state width
    H8 = 8 * H                     # packed gate width

    # Lane masks: within each 2H-wide gate block the first H lanes are the
    # forward direction, the last H lanes the backward direction.
    gate_lane = lax.broadcasted_iota(jnp.int32, (B, H8), 1)
    fwd_gate_mask = (gate_lane % H2) < H
    half_lane = lax.broadcasted_iota(jnp.int32, (B, H2), 1)
    fwd_half_mask = half_lane < H

    def run_layer(x_flat, wih_r, whh_r, b_r, store_seq):
        # Single hoisted input projection for BOTH directions over the whole
        # sequence (bias folded in; it is time-invariant so the per-step
        # select below still picks exactly one bias contribution per column).
        gx_ref[...] = (
            jnp.dot(x_flat, wih_r[...], preferred_element_type=jnp.float32)
            + b_r[...]
        ).reshape(T, B, H8)

        h = jnp.zeros((B, H2), jnp.float32)    # [h_fwd | h_bwd]
        c = jnp.zeros((B, H2), jnp.float32)    # [c_fwd | c_bwd]
        h_first = h

        # T is small and static -> full unroll, all indices static.
        for t in range(T):
            # fwd columns use x[t], bwd columns use x[T-1-t]  (VPU select).
            gx_t = jnp.where(fwd_gate_mask, gx_ref[t], gx_ref[T - 1 - t])
            gates = (
                jnp.dot(h, whh_r[...], preferred_element_type=jnp.float32)
                + gx_t
            )                                   # (B, 8H), gate-major [i f g o]
            i_g = jax.nn.sigmoid(gates[:, 0 * H2:1 * H2])
            f_g = jax.nn.sigmoid(gates[:, 1 * H2:2 * H2])
            g_g = jnp.tanh(gates[:, 2 * H2:3 * H2])
            o_g = jax.nn.sigmoid(gates[:, 3 * H2:4 * H2])
            c = f_g * c + i_g * g_g
            h = o_g * jnp.tanh(c)
            if store_seq:
                seqf_ref[t] = h[:, :H]          # fwd output at time t
                seqb_ref[T - 1 - t] = h[:, H:]  # bwd output belongs at T-1-t
            if t == 0:
                h_first = h                     # bwd half = output at time T-1
        return h, h_first

    # ---- layer 0 ----------------------------------------------------------
    x0 = x_ref[...].reshape(T * B, D)
    run_layer(x0, wih0_ref, whh0_ref, b0_ref, store_seq=True)

    # ---- layer 1 (input = layer-0 output, kept entirely in VMEM) ----------
    x1 = jnp.concatenate([seqf_ref[...], seqb_ref[...]], axis=-1).reshape(
        T * B, H2)
    h_last, h_first = run_layer(x1, wih1_ref, whh1_ref, b1_ref,
                                store_seq=False)

    # ---- FC head on out[:, -1, :] ------------------------------------------
    # fwd half of the last time step comes from the final recurrence step,
    # bwd half comes from the first recurrence step.
    last = jnp.where(fwd_half_mask, h_last, h_first)          # (B, 2H)
    out_ref[...] = (
        jnp.dot(last, fcw_ref[...], preferred_element_type=jnp.float32)
        + fcb_ref[...]
    ).astype(out_ref.dtype)


# ---------------------------------------------------------------------------
# Wrapper
# ---------------------------------------------------------------------------
def _vmem():
    return pl.BlockSpec(memory_space=pltpu.MemorySpace.VMEM)


@jax.jit
def bilstm_model_forward(x, packed):
    """Equivalent of BiLSTMModel.forward.  x: (B, T, input_size) -> (B, O)."""
    B, T, _ = x.shape
    x_tbd = jnp.transpose(x, (1, 0, 2))                   # (T, B, D)
    wih0, whh0, b0 = packed["l0"]
    wih1, whh1, b1 = packed["l1"]
    fc_w, fc_b = packed["fc_w"], packed["fc_b"]
    H8 = whh0.shape[1]
    H = H8 // 8
    O = fc_w.shape[1]
    return pl.pallas_call(
        _bilstm_fused_kernel,
        out_shape=jax.ShapeDtypeStruct((B, O), jnp.float32),
        in_specs=[_vmem()] * 9,
        out_specs=_vmem(),
        scratch_shapes=[
            pltpu.VMEM((T, B, H8), jnp.float32),   # gx (hoisted input proj)
            pltpu.VMEM((T, B, H), jnp.float32),    # layer-0 output, fwd half
            pltpu.VMEM((T, B, H), jnp.float32),    # layer-0 output, bwd half
        ],
    )(x_tbd, wih0, whh0, b0, wih1, whh1, b1, fc_w, fc_b)


# ---------------------------------------------------------------------------
# Parameter init (PyTorch-style uniform) and packing for the fused kernel
# ---------------------------------------------------------------------------
def init_params(key, input_size, hidden_size, num_layers, output_size):
    H = hidden_size
    bound = 1.0 / float(H) ** 0.5

    def uniform(k, shape, b=bound):
        return jax.random.uniform(k, shape, jnp.float32, -b, b)

    layers = []
    d_in = input_size
    for _ in range(num_layers):
        layer = {}
        for dname in ("fwd", "bwd"):
            key, k1, k2, k3, k4 = jax.random.split(key, 5)
            wih = uniform(k1, (d_in, 4 * H))              # (D, 4H) pre-transposed
            whh = uniform(k2, (H, 4 * H))                 # (H, 4H) pre-transposed
            b = uniform(k3, (1, 4 * H)) + uniform(k4, (1, 4 * H))   # b_ih + b_hh
            layer[dname] = (wih, whh, b)
        layers.append(layer)
        d_in = 2 * H

    key, kw, kb = jax.random.split(key, 3)
    fc_bound = 1.0 / float(2 * H) ** 0.5
    fc_w = uniform(kw, (2 * H, output_size), fc_bound)
    fc_b = uniform(kb, (1, output_size), fc_bound)
    return {"lstm": layers, "fc_w": fc_w, "fc_b": fc_b}


def pack_params(raw, hidden_size):
    """Pack per-direction weights into the merged gate-major layout.

    8H columns = [i f g o], each gate 2H wide = [fwd H | bwd H].
    A single W_ih of shape (D, 8H) carries both directions; Whh is
    block-diagonal over the [h_fwd | h_bwd] state.
    """
    H = hidden_size
    H2, H8 = 2 * H, 8 * H

    def pack_layer(layer):
        wih_f, whh_f, b_f = layer["fwd"]
        wih_b, whh_b, b_b = layer["bwd"]
        D = wih_f.shape[0]
        wih = jnp.zeros((D, H8), jnp.float32)
        whh = jnp.zeros((H2, H8), jnp.float32)
        bias = jnp.zeros((1, H8), jnp.float32)
        for g in range(4):
            src = slice(g * H, (g + 1) * H)           # gate g in 4H layout
            cf = slice(g * H2, g * H2 + H)            # fwd lanes of gate g
            cb = slice(g * H2 + H, (g + 1) * H2)      # bwd lanes of gate g
            wih = wih.at[:, cf].set(wih_f[:, src])
            wih = wih.at[:, cb].set(wih_b[:, src])
            whh = whh.at[:H, cf].set(whh_f[:, src])
            whh = whh.at[H:, cb].set(whh_b[:, src])
            bias = bias.at[:, cf].set(b_f[:, src])
            bias = bias.at[:, cb].set(b_b[:, src])
        return wih, whh, bias

    return {
        "l0": pack_layer(raw["lstm"][0]),
        "l1": pack_layer(raw["lstm"][1]),
        "fc_w": raw["fc_w"],
        "fc_b": raw["fc_b"],
    }


# ---------------------------------------------------------------------------
# Pure-JAX reference (uses the unpacked weights) for correctness checking
# ---------------------------------------------------------------------------
def _ref_lstm_dir(x_tbd, wih, whh, b):
    T, B, _ = x_tbd.shape
    H = whh.shape[0]

    def cell(carry, x_t):
        h, c = carry
        gates = x_t @ wih + h @ whh + b
        i_g = jax.nn.sigmoid(gates[:, 0 * H:1 * H])
        f_g = jax.nn.sigmoid(gates[:, 1 * H:2 * H])
        g_g = jnp.tanh(gates[:, 2 * H:3 * H])
        o_g = jax.nn.sigmoid(gates[:, 3 * H:4 * H])
        c = f_g * c + i_g * g_g
        h = o_g * jnp.tanh(c)
        return (h, c), h

    init = (jnp.zeros((B, H), jnp.float32), jnp.zeros((B, H), jnp.float32))
    _, hs = lax.scan(cell, init, x_tbd)
    return hs


def _ref_forward(x, raw):
    h = jnp.transpose(x, (1, 0, 2))
    for layer in raw["lstm"]:
        fwd = _ref_lstm_dir(h, *layer["fwd"])
        bwd = _ref_lstm_dir(h[::-1], *layer["bwd"])[::-1]
        h = jnp.concatenate([fwd, bwd], axis=-1)
    last = h[-1]
    return last @ raw["fc_w"] + raw["fc_b"]


# ---------------------------------------------------------------------------
if __name__ == "__main__":
    # Small shapes consistent with the module: hidden_size=64, num_layers=2,
    # output_size=1; batch=8 (fills the 8 sublanes), seq=8, input_size=16.
    B, T, INPUT_SIZE = 8, 8, 16
    HIDDEN_SIZE, NUM_LAYERS, OUTPUT_SIZE = 64, 2, 1

    key = jax.random.PRNGKey(0)
    key, kx, kp = jax.random.split(key, 3)
    x = jax.random.normal(kx, (B, T, INPUT_SIZE), jnp.float32)
    raw = init_params(kp, INPUT_SIZE, HIDDEN_SIZE, NUM_LAYERS, OUTPUT_SIZE)
    packed = pack_params(raw, HIDDEN_SIZE)

    out = jax.block_until_ready(bilstm_model_forward(x, packed))
    assert out.shape == (B, OUTPUT_SIZE), out.shape

    ref = jax.block_until_ready(_ref_forward(x, raw))
    assert jnp.allclose(out, ref, atol=1e-3, rtol=1e-3), (out, ref)

    print("KERNEL_OK")
</pallas_src>

<mosaic_0001>
module attributes {stable_mosaic.version = 11 : i64} {
  func.func @_bilstm_fused_kernel(%arg0: memref<8x8x16xf32, #tpu.memory_space<vmem>>, %arg1: memref<16x512xf32, #tpu.memory_space<vmem>>, %arg2: memref<128x512xf32, #tpu.memory_space<vmem>>, %arg3: memref<1x512xf32, #tpu.memory_space<vmem>>, %arg4: memref<128x512xf32, #tpu.memory_space<vmem>>, %arg5: memref<128x512xf32, #tpu.memory_space<vmem>>, %arg6: memref<1x512xf32, #tpu.memory_space<vmem>>, %arg7: memref<128x1xf32, #tpu.memory_space<vmem>>, %arg8: memref<1x1xf32, #tpu.memory_space<vmem>>, %arg9: memref<8x1xf32, #tpu.memory_space<vmem>>, %arg10: memref<8x8x512xf32, #tpu.memory_space<vmem>>, %arg11: memref<8x8x64xf32, #tpu.memory_space<vmem>>, %arg12: memref<8x8x64xf32, #tpu.memory_space<vmem>>) attributes {dimension_semantics = [], scalar_prefetch = 0 : i64, scratch_operands = 3 : i64, tpu.core_type = #tpu.core_type<tc>} {
    %0 = tpu.iota {dimensions = array<i32: 1>} : vector<8x512xi32>
    %c128_i32 = arith.constant 128 : i32
    %c0_i32 = arith.constant 0 : i32
    %1 = arith.cmpi eq, %c128_i32, %c0_i32 : i32
    %c1_i32 = arith.constant 1 : i32
    %2 = arith.select %1, %c1_i32, %c128_i32 : i32
    %3 = vector.broadcast %2 : i32 to vector<8x512xi32>
    %4 = arith.remsi %0, %3 : vector<8x512xi32>
    %c0_i32_0 = arith.constant 0 : i32
    %5 = vector.broadcast %c0_i32_0 : i32 to vector<8x512xi32>
    %6 = arith.cmpi ne, %4, %5 : vector<8x512xi32>
    %c0_i32_1 = arith.constant 0 : i32
    %7 = vector.broadcast %c0_i32_1 : i32 to vector<8x512xi32>
    %8 = arith.cmpi slt, %4, %7 : vector<8x512xi32>
    %c0_i32_2 = arith.constant 0 : i32
    %9 = arith.cmpi slt, %2, %c0_i32_2 : i32
    %10 = vector.broadcast %9 : i1 to vector<8x512xi1>
    %11 = vector.broadcast %10 : vector<8x512xi1> to vector<8x512xi1>
    %12 = arith.xori %8, %11 : vector<8x512xi1>
    %13 = arith.andi %12, %6 : vector<8x512xi1>
    %14 = vector.broadcast %2 : i32 to vector<8x512xi32>
    %15 = arith.addi %4, %14 : vector<8x512xi32>
    %16 = arith.select %13, %15, %4 : vector<8x512xi1>, vector<8x512xi32>
    %c64_i32 = arith.constant 64 : i32
    %17 = vector.broadcast %c64_i32 : i32 to vector<8x512xi32>
    %18 = arith.cmpi slt, %16, %17 : vector<8x512xi32>
    %19 = tpu.iota {dimensions = array<i32: 1>} : vector<8x128xi32>
    %c64_i32_3 = arith.constant 64 : i32
    %20 = vector.broadcast %c64_i32_3 : i32 to vector<8x128xi32>
    %21 = arith.cmpi slt, %19, %20 : vector<8x128xi32>
    %c0 = arith.constant 0 : index
    %c0_4 = arith.constant 0 : index
    %c0_5 = arith.constant 0 : index
    %22 = vector.load %arg0[%c0, %c0_4, %c0_5] : memref<8x8x16xf32, #tpu.memory_space<vmem>>, vector<8x8x16xf32>
    %23 = vector.shape_cast %22 : vector<8x8x16xf32> to vector<64x16xf32>
    %c0_6 = arith.constant 0 : index
    %c0_7 = arith.constant 0 : index
    %24 = vector.load %arg1[%c0_6, %c0_7] : memref<16x512xf32, #tpu.memory_space<vmem>>, vector<16x512xf32>
    %cst = arith.constant dense<0.000000e+00> : vector<64x512xf32>
    %25 = tpu.matmul %23, %24, %cst {dimension_numbers = #tpu.dot_dimension_numbers<[1], [0], [0], [1], [0, 0, 1, 1], [], []>} : vector<64x16xf32>, vector<16x512xf32>, vector<64x512xf32> -> vector<64x512xf32>
    %c0_8 = arith.constant 0 : index
    %c0_9 = arith.constant 0 : index
    %26 = vector.load %arg3[%c0_8, %c0_9] : memref<1x512xf32, #tpu.memory_space<vmem>>, vector<1x512xf32>
    %27 = vector.broadcast %26 : vector<1x512xf32> to vector<64x512xf32>
    %28 = arith.addf %25, %27 : vector<64x512xf32>
    %29 = vector.shape_cast %28 : vector<64x512xf32> to vector<8x8x512xf32>
    %c0_10 = arith.constant 0 : index
    %c0_11 = arith.constant 0 : index
    %c0_12 = arith.constant 0 : index
    %30 = vector.load %arg10[%c0_10, %c0_11, %c0_12] : memref<8x8x512xf32, #tpu.memory_space<vmem>>, vector<8x8x512xf32>
    tpu.vector_store %arg10[%c0_10, %c0_11, %c0_12], %29 {strides = array<i32>} : memref<8x8x512xf32, #tpu.memory_space<vmem>>, vector<8x8x512xf32>,
    %cst_13 = arith.constant 0.000000e+00 : f32
    %31 = vector.broadcast %cst_13 : f32 to vector<8x128xf32>
    %cst_14 = arith.constant 0.000000e+00 : f32
    %32 = vector.broadcast %cst_14 : f32 to vector<8x128xf32>
    %c0_15 = arith.constant 0 : index
    %c0_16 = arith.constant 0 : index
    %c0_17 = arith.constant 0 : index
    %33 = vector.load %arg10[%c0_15, %c0_16, %c0_17] : memref<8x8x512xf32, #tpu.memory_space<vmem>>, vector<1x8x512xf32>
    %34 = vector.shape_cast %33 : vector<1x8x512xf32> to vector<8x512xf32>
    %c7 = arith.constant 7 : index
    %c0_18 = arith.constant 0 : index
    %c0_19 = arith.constant 0 : index
    %35 = vector.load %arg10[%c7, %c0_18, %c0_19] : memref<8x8x512xf32, #tpu.memory_space<vmem>>, vector<1x8x512xf32>
    %36 = vector.shape_cast %35 : vector<1x8x512xf32> to vector<8x512xf32>
    %37 = arith.select %18, %34, %36 : vector<8x512xi1>, vector<8x512xf32>
    %c0_20 = arith.constant 0 : index
    %c0_21 = arith.constant 0 : index
    %38 = vector.load %arg2[%c0_20, %c0_21] : memref<128x512xf32, #tpu.memory_space<vmem>>, vector<128x512xf32>
    %cst_22 = arith.constant dense<0.000000e+00> : vector<8x512xf32>
    %39 = tpu.matmul %31, %38, %cst_22 {dimension_numbers = #tpu.dot_dimension_numbers<[1], [0], [0], [1], [0, 0, 1, 1], [], []>} : vector<8x128xf32>, vector<128x512xf32>, vector<8x512xf32> -> vector<8x512xf32>
    %40 = arith.addf %39, %37 : vector<8x512xf32>
    %41 = vector.extract_strided_slice %40 {offsets = [0, 0], sizes = [8, 128], strides = [1, 1]} : vector<8x512xf32> to vector<8x128xf32>
    %42 = arith.negf %41 : vector<8x128xf32>
    %43 = math.exp %42 : vector<8x128xf32>
    %cst_23 = arith.constant 1.000000e+00 : f32
    %44 = vector.broadcast %cst_23 : f32 to vector<8x128xf32>
    %45 = arith.addf %44, %43 : vector<8x128xf32>
    %46 = arith.divf %44, %45 : vector<8x128xf32>
    %47 = vector.extract_strided_slice %40 {offsets = [0, 128], sizes = [8, 128], strides = [1, 1]} : vector<8x512xf32> to vector<8x128xf32>
    %48 = arith.negf %47 : vector<8x128xf32>
    %49 = math.exp %48 : vector<8x128xf32>
    %cst_24 = arith.constant 1.000000e+00 : f32
    %50 = vector.broadcast %cst_24 : f32 to vector<8x128xf32>
    %51 = arith.addf %50, %49 : vector<8x128xf32>
    %52 = arith.divf %50, %51 : vector<8x128xf32>
    %53 = vector.extract_strided_slice %40 {offsets = [0, 256], sizes = [8, 128], strides = [1, 1]} : vector<8x512xf32> to vector<8x128xf32>
    %54 = math.tanh %53 : vector<8x128xf32>
    %55 = vector.extract_strided_slice %40 {offsets = [0, 384], sizes = [8, 128], strides = [1, 1]} : vector<8x512xf32> to vector<8x128xf32>
    %56 = arith.negf %55 : vector<8x128xf32>
    %57 = math.exp %56 : vector<8x128xf32>
    %cst_25 = arith.constant 1.000000e+00 : f32
    %58 = vector.broadcast %cst_25 : f32 to vector<8x128xf32>
    %59 = arith.addf %58, %57 : vector<8x128xf32>
    %60 = arith.divf %58, %59 : vector<8x128xf32>
    %61 = arith.mulf %52, %32 : vector<8x128xf32>
    %62 = arith.mulf %46, %54 : vector<8x128xf32>
    %63 = arith.addf %61, %62 : vector<8x128xf32>
    %64 = math.tanh %63 : vector<8x128xf32>
    %65 = arith.mulf %60, %64 : vector<8x128xf32>
    %66 = vector.extract_strided_slice %65 {offsets = [0, 0], sizes = [8, 64], strides = [1, 1]} : vector<8x128xf32> to vector<8x64xf32>
    %c0_26 = arith.constant 0 : index
    %c0_27 = arith.constant 0 : index
    %c0_28 = arith.constant 0 : index
    %67 = vector.load %arg11[%c0_26, %c0_27, %c0_28] : memref<8x8x64xf32, #tpu.memory_space<vmem>>, vector<1x8x64xf32>
    %68 = vector.shape_cast %67 : vector<1x8x64xf32> to vector<8x64xf32>
    %69 = vector.shape_cast %66 : vector<8x64xf32> to vector<1x8x64xf32>
    tpu.vector_store %arg11[%c0_26, %c0_27, %c0_28], %69 {strides = array<i32>} : memref<8x8x64xf32, #tpu.memory_space<vmem>>, vector<1x8x64xf32>,
    %70 = vector.extract_strided_slice %65 {offsets = [0, 64], sizes = [8, 64], strides = [1, 1]} : vector<8x128xf32> to vector<8x64xf32>
    %c7_29 = arith.constant 7 : index
    %c0_30 = arith.constant 0 : index
    %c0_31 = arith.constant 0 : index
    %71 = vector.load %arg12[%c7_29, %c0_30, %c0_31] : memref<8x8x64xf32, #tpu.memory_space<vmem>>, vector<1x8x64xf32>
    %72 = vector.shape_cast %71 : vector<1x8x64xf32> to vector<8x64xf32>
    %73 = vector.shape_cast %70 : vector<8x64xf32> to vector<1x8x64xf32>
    tpu.vector_store %arg12[%c7_29, %c0_30, %c0_31], %73 {strides = array<i32>} : memref<8x8x64xf32, #tpu.memory_space<vmem>>, vector<1x8x64xf32>,
    %c1 = arith.constant 1 : index
    %c0_32 = arith.constant 0 : index
    %c0_33 = arith.constant 0 : index
    %74 = vector.load %arg10[%c1, %c0_32, %c0_33] : memref<8x8x512xf32, #tpu.memory_space<vmem>>, vector<1x8x512xf32>
    %75 = vector.shape_cast %74 : vector<1x8x512xf32> to vector<8x512xf32>
    %c6 = arith.constant 6 : index
    %c0_34 = arith.constant 0 : index
    %c0_35 = arith.constant 0 : index
    %76 = vector.load %arg10[%c6, %c0_34, %c0_35] : memref<8x8x512xf32, #tpu.memory_space<vmem>>, vector<1x8x512xf32>
    %77 = vector.shape_cast %76 : vector<1x8x512xf32> to vector<8x512xf32>
    %78 = arith.select %18, %75, %77 : vector<8x512xi1>, vector<8x512xf32>
    %c0_36 = arith.constant 0 : index
    %c0_37 = arith.constant 0 : index
    %79 = vector.load %arg2[%c0_36, %c0_37] : memref<128x512xf32, #tpu.memory_space<vmem>>, vector<128x512xf32>
    %cst_38 = arith.constant dense<0.000000e+00> : vector<8x512xf32>
    %80 = tpu.matmul %65, %79, %cst_38 {dimension_numbers = #tpu.dot_dimension_numbers<[1], [0], [0], [1], [0, 0, 1, 1], [], []>} : vector<8x128xf32>, vector<128x512xf32>, vector<8x512xf32> -> vector<8x512xf32>
    %81 = arith.addf %80, %78 : vector<8x512xf32>
    %82 = vector.extract_strided_slice %81 {offsets = [0, 0], sizes = [8, 128], strides = [1, 1]} : vector<8x512xf32> to vector<8x128xf32>
    %83 = arith.negf %82 : vector<8x128xf32>
    %84 = math.exp %83 : vector<8x128xf32>
    %cst_39 = arith.constant 1.000000e+00 : f32
    %85 = vector.broadcast %cst_39 : f32 to vector<8x128xf32>
    %86 = arith.addf %85, %84 : vector<8x128xf32>
    %87 = arith.divf %85, %86 : vector<8x128xf32>
    %88 = vector.extract_strided_slice %81 {offsets = [0, 128], sizes = [8, 128], strides = [1, 1]} : vector<8x512xf32> to vector<8x128xf32>
    %89 = arith.negf %88 : vector<8x128xf32>
    %90 = math.exp %89 : vector<8x128xf32>
    %cst_40 = arith.constant 1.000000e+00 : f32
    %91 = vector.broadcast %cst_40 : f32 to vector<8x128xf32>
    %92 = arith.addf %91, %90 : vector<8x128xf32>
    %93 = arith.divf %91, %92 : vector<8x128xf32>
    %94 = vector.extract_strided_slice %81 {offsets = [0, 256], sizes = [8, 128], strides = [1, 1]} : vector<8x512xf32> to vector<8x128xf32>
    %95 = math.tanh %94 : vector<8x128xf32>
    %96 = vector.extract_strided_slice %81 {offsets = [0, 384], sizes = [8, 128], strides = [1, 1]} : vector<8x512xf32> to vector<8x128xf32>
    %97 = arith.negf %96 : vector<8x128xf32>
    %98 = math.exp %97 : vector<8x128xf32>
    %cst_41 = arith.constant 1.000000e+00 : f32
    %99 = vector.broadcast %cst_41 : f32 to vector<8x128xf32>
    %100 = arith.addf %99, %98 : vector<8x128xf32>
    %101 = arith.divf %99, %100 : vector<8x128xf32>
    %102 = arith.mulf %93, %63 : vector<8x128xf32>
    %103 = arith.mulf %87, %95 : vector<8x128xf32>
    %104 = arith.addf %102, %103 : vector<8x128xf32>
    %105 = math.tanh %104 : vector<8x128xf32>
    %106 = arith.mulf %101, %105 : vector<8x128xf32>
    %107 = vector.extract_strided_slice %106 {offsets = [0, 0], sizes = [8, 64], strides = [1, 1]} : vector<8x128xf32> to vector<8x64xf32>
    %c1_42 = arith.constant 1 : index
    %c0_43 = arith.constant 0 : index
    %c0_44 = arith.constant 0 : index
    %108 = vector.load %arg11[%c1_42, %c0_43, %c0_44] : memref<8x8x64xf32, #tpu.memory_space<vmem>>, vector<1x8x64xf32>
    %109 = vector.shape_cast %108 : vector<1x8x64xf32> to vector<8x64xf32>
    %110 = vector.shape_cast %107 : vector<8x64xf32> to vector<1x8x64xf32>
    tpu.vector_store %arg11[%c1_42, %c0_43, %c0_44], %110 {strides = array<i32>} : memref<8x8x64xf32, #tpu.memory_space<vmem>>, vector<1x8x64xf32>,
    %111 = vector.extract_strided_slice %106 {offsets = [0, 64], sizes = [8, 64], strides = [1, 1]} : vector<8x128xf32> to vector<8x64xf32>
    %c6_45 = arith.constant 6 : index
    %c0_46 = arith.constant 0 : index
    %c0_47 = arith.constant 0 : index
    %112 = vector.load %arg12[%c6_45, %c0_46, %c0_47] : memref<8x8x64xf32, #tpu.memory_space<vmem>>, vector<1x8x64xf32>
    %113 = vector.shape_cast %112 : vector<1x8x64xf32> to vector<8x64xf32>
    %114 = vector.shape_cast %111 : vector<8x64xf32> to vector<1x8x64xf32>
    tpu.vector_store %arg12[%c6_45, %c0_46, %c0_47], %114 {strides = array<i32>} : memref<8x8x64xf32, #tpu.memory_space<vmem>>, vector<1x8x64xf32>,
    %c2 = arith.constant 2 : index
    %c0_48 = arith.constant 0 : index
    %c0_49 = arith.constant 0 : index
    %115 = vector.load %arg10[%c2, %c0_48, %c0_49] : memref<8x8x512xf32, #tpu.memory_space<vmem>>, vector<1x8x512xf32>
    %116 = vector.shape_cast %115 : vector<1x8x512xf32> to vector<8x512xf32>
    %c5 = arith.constant 5 : index
    %c0_50 = arith.constant 0 : index
    %c0_51 = arith.constant 0 : index
    %117 = vector.load %arg10[%c5, %c0_50, %c0_51] : memref<8x8x512xf32, #tpu.memory_space<vmem>>, vector<1x8x512xf32>
    %118 = vector.shape_cast %117 : vector<1x8x512xf32> to vector<8x512xf32>
    %119 = arith.select %18, %116, %118 : vector<8x512xi1>, vector<8x512xf32>
    %c0_52 = arith.constant 0 : index
    %c0_53 = arith.constant 0 : index
    %120 = vector.load %arg2[%c0_52, %c0_53] : memref<128x512xf32, #tpu.memory_space<vmem>>, vector<128x512xf32>
    %cst_54 = arith.constant dense<0.000000e+00> : vector<8x512xf32>
    %121 = tpu.matmul %106, %120, %cst_54 {dimension_numbers = #tpu.dot_dimension_numbers<[1], [0], [0], [1], [0, 0, 1, 1], [], []>} : vector<8x128xf32>, vector<128x512xf32>, vector<8x512xf32> -> vector<8x512xf32>
    %122 = arith.addf %121, %119 : vector<8x512xf32>
    %123 = vector.extract_strided_slice %122 {offsets = [0, 0], sizes = [8, 128], strides = [1, 1]} : vector<8x512xf32> to vector<8x128xf32>
    %124 = arith.negf %123 : vector<8x128xf32>
    %125 = math.exp %124 : vector<8x128xf32>
    %cst_55 = arith.constant 1.000000e+00 : f32
    %126 = vector.broadcast %cst_55 : f32 to vector<8x128xf32>
    %127 = arith.addf %126, %125 : vector<8x128xf32>
    %128 = arith.divf %126, %127 : vector<8x128xf32>
    %129 = vector.extract_strided_slice %122 {offsets = [0, 128], sizes = [8, 128], strides = [1, 1]} : vector<8x512xf32> to vector<8x128xf32>
    %130 = arith.negf %129 : vector<8x128xf32>
    %131 = math.exp %130 : vector<8x128xf32>
    %cst_56 = arith.constant 1.000000e+00 : f32
    %132 = vector.broadcast %cst_56 : f32 to vector<8x128xf32>
    %133 = arith.addf %132, %131 : vector<8x128xf32>
    %134 = arith.divf %132, %133 : vector<8x128xf32>
    %135 = vector.extract_strided_slice %122 {offsets = [0, 256], sizes = [8, 128], strides = [1, 1]} : vector<8x512xf32> to vector<8x128xf32>
    %136 = math.tanh %135 : vector<8x128xf32>
    %137 = vector.extract_strided_slice %122 {offsets = [0, 384], sizes = [8, 128], strides = [1, 1]} : vector<8x512xf32> to vector<8x128xf32>
    %138 = arith.negf %137 : vector<8x128xf32>
    %139 = math.exp %138 : vector<8x128xf32>
    %cst_57 = arith.constant 1.000000e+00 : f32
    %140 = vector.broadcast %cst_57 : f32 to vector<8x128xf32>
    %141 = arith.addf %140, %139 : vector<8x128xf32>
    %142 = arith.divf %140, %141 : vector<8x128xf32>
    %143 = arith.mulf %134, %104 : vector<8x128xf32>
    %144 = arith.mulf %128, %136 : vector<8x128xf32>
    %145 = arith.addf %143, %144 : vector<8x128xf32>
    %146 = math.tanh %145 : vector<8x128xf32>
    %147 = arith.mulf %142, %146 : vector<8x128xf32>
    %148 = vector.extract_strided_slice %147 {offsets = [0, 0], sizes = [8, 64], strides = [1, 1]} : vector<8x128xf32> to vector<8x64xf32>
    %c2_58 = arith.constant 2 : index
    %c0_59 = arith.constant 0 : index
    %c0_60 = arith.constant 0 : index
    %149 = vector.load %arg11[%c2_58, %c0_59, %c0_60] : memref<8x8x64xf32, #tpu.memory_space<vmem>>, vector<1x8x64xf32>
    %150 = vector.shape_cast %149 : vector<1x8x64xf32> to vector<8x64xf32>
    %151 = vector.shape_cast %148 : vector<8x64xf32> to vector<1x8x64xf32>
    tpu.vector_store %arg11[%c2_58, %c0_59, %c0_60], %151 {strides = array<i32>} : memref<8x8x64xf32, #tpu.memory_space<vmem>>, vector<1x8x64xf32>,
    %152 = vector.extract_strided_slice %147 {offsets = [0, 64], sizes = [8, 64], strides = [1, 1]} : vector<8x128xf32> to vector<8x64xf32>
    %c5_61 = arith.constant 5 : index
    %c0_62 = arith.constant 0 : index
    %c0_63 = arith.constant 0 : index
    %153 = vector.load %arg12[%c5_61, %c0_62, %c0_63] : memref<8x8x64xf32, #tpu.memory_space<vmem>>, vector<1x8x64xf32>
    %154 = vector.shape_cast %153 : vector<1x8x64xf32> to vector<8x64xf32>
    %155 = vector.shape_cast %152 : vector<8x64xf32> to vector<1x8x64xf32>
    tpu.vector_store %arg12[%c5_61, %c0_62, %c0_63], %155 {strides = array<i32>} : memref<8x8x64xf32, #tpu.memory_space<vmem>>, vector<1x8x64xf32>,
    %c3 = arith.constant 3 : index
    %c0_64 = arith.constant 0 : index
    %c0_65 = arith.constant 0 : index
    %156 = vector.load %arg10[%c3, %c0_64, %c0_65] : memref<8x8x512xf32, #tpu.memory_space<vmem>>, vector<1x8x512xf32>
    %157 = vector.shape_cast %156 : vector<1x8x512xf32> to vector<8x512xf32>
    %c4 = arith.constant 4 : index
    %c0_66 = arith.constant 0 : index
    %c0_67 = arith.constant 0 : index
    %158 = vector.load %arg10[%c4, %c0_66, %c0_67] : memref<8x8x512xf32, #tpu.memory_space<vmem>>, vector<1x8x512xf32>
    %159 = vector.shape_cast %158 : vector<1x8x512xf32> to vector<8x512xf32>
    %160 = arith.select %18, %157, %159 : vector<8x512xi1>, vector<8x512xf32>
    %c0_68 = arith.constant 0 : index
    %c0_69 = arith.constant 0 : index
    %161 = vector.load %arg2[%c0_68, %c0_69] : memref<128x512xf32, #tpu.memory_space<vmem>>, vector<128x512xf32>
    %cst_70 = arith.constant dense<0.000000e+00> : vector<8x512xf32>
    %162 = tpu.matmul %147, %161, %cst_70 {dimension_numbers = #tpu.dot_dimension_numbers<[1], [0], [0], [1], [0, 0, 1, 1], [], []>} : vector<8x128xf32>, vector<128x512xf32>, vector<8x512xf32> -> vector<8x512xf32>
    %163 = arith.addf %162, %160 : vector<8x512xf32>
    %164 = vector.extract_strided_slice %163 {offsets = [0, 0], sizes = [8, 128], strides = [1, 1]} : vector<8x512xf32> to vector<8x128xf32>
    %165 = arith.negf %164 : vector<8x128xf32>
    %166 = math.exp %165 : vector<8x128xf32>
    %cst_71 = arith.constant 1.000000e+00 : f32
    %167 = vector.broadcast %cst_71 : f32 to vector<8x128xf32>
    %168 = arith.addf %167, %166 : vector<8x128xf32>
    %169 = arith.divf %167, %168 : vector<8x128xf32>
    %170 = vector.extract_strided_slice %163 {offsets = [0, 128], sizes = [8, 128], strides = [1, 1]} : vector<8x512xf32> to vector<8x128xf32>
    %171 = arith.negf %170 : vector<8x128xf32>
    %172 = math.exp %171 : vector<8x128xf32>
    %cst_72 = arith.constant 1.000000e+00 : f32
    %173 = vector.broadcast %cst_72 : f32 to vector<8x128xf32>
    %174 = arith.addf %173, %172 : vector<8x128xf32>
    %175 = arith.divf %173, %174 : vector<8x128xf32>
    %176 = vector.extract_strided_slice %163 {offsets = [0, 256], sizes = [8, 128], strides = [1, 1]} : vector<8x512xf32> to vector<8x128xf32>
    %177 = math.tanh %176 : vector<8x128xf32>
    %178 = vector.extract_strided_slice %163 {offsets = [0, 384], sizes = [8, 128], strides = [1, 1]} : vector<8x512xf32> to vector<8x128xf32>
    %179 = arith.negf %178 : vector<8x128xf32>
    %180 = math.exp %179 : vector<8x128xf32>
    %cst_73 = arith.constant 1.000000e+00 : f32
    %181 = vector.broadcast %cst_73 : f32 to vector<8x128xf32>
    %182 = arith.addf %181, %180 : vector<8x128xf32>
    %183 = arith.divf %181, %182 : vector<8x128xf32>
    %184 = arith.mulf %175, %145 : vector<8x128xf32>
    %185 = arith.mulf %169, %177 : vector<8x128xf32>
    %186 = arith.addf %184, %185 : vector<8x128xf32>
    %187 = math.tanh %186 : vector<8x128xf32>
    %188 = arith.mulf %183, %187 : vector<8x128xf32>
    %189 = vector.extract_strided_slice %188 {offsets = [0, 0], sizes = [8, 64], strides = [1, 1]} : vector<8x128xf32> to vector<8x64xf32>
    %c3_74 = arith.constant 3 : index
    %c0_75 = arith.constant 0 : index
    %c0_76 = arith.constant 0 : index
    %190 = vector.load %arg11[%c3_74, %c0_75, %c0_76] : memref<8x8x64xf32, #tpu.memory_space<vmem>>, vector<1x8x64xf32>
    %191 = vector.shape_cast %190 : vector<1x8x64xf32> to vector<8x64xf32>
    %192 = vector.shape_cast %189 : vector<8x64xf32> to vector<1x8x64xf32>
    tpu.vector_store %arg11[%c3_74, %c0_75, %c0_76], %192 {strides = array<i32>} : memref<8x8x64xf32, #tpu.memory_space<vmem>>, vector<1x8x64xf32>,
    %193 = vector.extract_strided_slice %188 {offsets = [0, 64], sizes = [8, 64], strides = [1, 1]} : vector<8x128xf32> to vector<8x64xf32>
    %c4_77 = arith.constant 4 : index
    %c0_78 = arith.constant 0 : index
    %c0_79 = arith.constant 0 : index
    %194 = vector.load %arg12[%c4_77, %c0_78, %c0_79] : memref<8x8x64xf32, #tpu.memory_space<vmem>>, vector<1x8x64xf32>
    %195 = vector.shape_cast %194 : vector<1x8x64xf32> to vector<8x64xf32>
    %196 = vector.shape_cast %193 : vector<8x64xf32> to vector<1x8x64xf32>
    tpu.vector_store %arg12[%c4_77, %c0_78, %c0_79], %196 {strides = array<i32>} : memref<8x8x64xf32, #tpu.memory_space<vmem>>, vector<1x8x64xf32>,
    %c4_80 = arith.constant 4 : index
    %c0_81 = arith.constant 0 : index
    %c0_82 = arith.constant 0 : index
    %197 = vector.load %arg10[%c4_80, %c0_81, %c0_82] : memref<8x8x512xf32, #tpu.memory_space<vmem>>, vector<1x8x512xf32>
    %198 = vector.shape_cast %197 : vector<1x8x512xf32> to vector<8x512xf32>
    %c3_83 = arith.constant 3 : index
    %c0_84 = arith.constant 0 : index
    %c0_85 = arith.constant 0 : index
    %199 = vector.load %arg10[%c3_83, %c0_84, %c0_85] : memref<8x8x512xf32, #tpu.memory_space<vmem>>, vector<1x8x512xf32>
    %200 = vector.shape_cast %199 : vector<1x8x512xf32> to vector<8x512xf32>
    %201 = arith.select %18, %198, %200 : vector<8x512xi1>, vector<8x512xf32>
    %c0_86 = arith.constant 0 : index
    %c0_87 = arith.constant 0 : index
    %202 = vector.load %arg2[%c0_86, %c0_87] : memref<128x512xf32, #tpu.memory_space<vmem>>, vector<128x512xf32>
    %cst_88 = arith.constant dense<0.000000e+00> : vector<8x512xf32>
    %203 = tpu.matmul %188, %202, %cst_88 {dimension_numbers = #tpu.dot_dimension_numbers<[1], [0], [0], [1], [0, 0, 1, 1], [], []>} : vector<8x128xf32>, vector<128x512xf32>, vector<8x512xf32> -> vector<8x512xf32>
    %204 = arith.addf %203, %201 : vector<8x512xf32>
    %205 = vector.extract_strided_slice %204 {offsets = [0, 0], sizes = [8, 128], strides = [1, 1]} : vector<8x512xf32> to vector<8x128xf32>
    %206 = arith.negf %205 : vector<8x128xf32>
    %207 = math.exp %206 : vector<8x128xf32>
    %cst_89 = arith.constant 1.000000e+00 : f32
    %208 = vector.broadcast %cst_89 : f32 to vector<8x128xf32>
    %209 = arith.addf %208, %207 : vector<8x128xf32>
    %210 = arith.divf %208, %209 : vector<8x128xf32>
    %211 = vector.extract_strided_slice %204 {offsets = [0, 128], sizes = [8, 128], strides = [1, 1]} : vector<8x512xf32> to vector<8x128xf32>
    %212 = arith.negf %211 : vector<8x128xf32>
    %213 = math.exp %212 : vector<8x128xf32>
    %cst_90 = arith.constant 1.000000e+00 : f32
    %214 = vector.broadcast %cst_90 : f32 to vector<8x128xf32>
    %215 = arith.addf %214, %213 : vector<8x128xf32>
    %216 = arith.divf %214, %215 : vector<8x128xf32>
    %217 = vector.extract_strided_slice %204 {offsets = [0, 256], sizes = [8, 128], strides = [1, 1]} : vector<8x512xf32> to vector<8x128xf32>
    %218 = math.tanh %217 : vector<8x128xf32>
    %219 = vector.extract_strided_slice %204 {offsets = [0, 384], sizes = [8, 128], strides = [1, 1]} : vector<8x512xf32> to vector<8x128xf32>
    %220 = arith.negf %219 : vector<8x128xf32>
    %221 = math.exp %220 : vector<8x128xf32>
    %cst_91 = arith.constant 1.000000e+00 : f32
    %222 = vector.broadcast %cst_91 : f32 to vector<8x128xf32>
    %223 = arith.addf %222, %221 : vector<8x128xf32>
    %224 = arith.divf %222, %223 : vector<8x128xf32>
    %225 = arith.mulf %216, %186 : vector<8x128xf32>
    %226 = arith.mulf %210, %218 : vector<8x128xf32>
    %227 = arith.addf %225, %226 : vector<8x128xf32>
    %228 = math.tanh %227 : vector<8x128xf32>
    %229 = arith.mulf %224, %228 : vector<8x128xf32>
    %230 = vector.extract_strided_slice %229 {offsets = [0, 0], sizes = [8, 64], strides = [1, 1]} : vector<8x128xf32> to vector<8x64xf32>
    %c4_92 = arith.constant 4 : index
    %c0_93 = arith.constant 0 : index
    %c0_94 = arith.constant 0 : index
    %231 = vector.load %arg11[%c4_92, %c0_93, %c0_94] : memref<8x8x64xf32, #tpu.memory_space<vmem>>, vector<1x8x64xf32>
    %232 = vector.shape_cast %231 : vector<1x8x64xf32> to vector<8x64xf32>
    %233 = vector.shape_cast %230 : vector<8x64xf32> to vector<1x8x64xf32>
    tpu.vector_store %arg11[%c4_92, %c0_93, %c0_94], %233 {strides = array<i32>} : memref<8x8x64xf32, #tpu.memory_space<vmem>>, vector<1x8x64xf32>,
    %234 = vector.extract_strided_slice %229 {offsets = [0, 64], sizes = [8, 64], strides = [1, 1]} : vector<8x128xf32> to vector<8x64xf32>
    %c3_95 = arith.constant 3 : index
    %c0_96 = arith.constant 0 : index
    %c0_97 = arith.constant 0 : index
    %235 = vector.load %arg12[%c3_95, %c0_96, %c0_97] : memref<8x8x64xf32, #tpu.memory_space<vmem>>, vector<1x8x64xf32>
    %236 = vector.shape_cast %235 : vector<1x8x64xf32> to vector<8x64xf32>
    %237 = vector.shape_cast %234 : vector<8x64xf32> to vector<1x8x64xf32>
    tpu.vector_store %arg12[%c3_95, %c0_96, %c0_97], %237 {strides = array<i32>} : memref<8x8x64xf32, #tpu.memory_space<vmem>>, vector<1x8x64xf32>,
    %c5_98 = arith.constant 5 : index
    %c0_99 = arith.constant 0 : index
    %c0_100 = arith.constant 0 : index
    %238 = vector.load %arg10[%c5_98, %c0_99, %c0_100] : memref<8x8x512xf32, #tpu.memory_space<vmem>>, vector<1x8x512xf32>
    %239 = vector.shape_cast %238 : vector<1x8x512xf32> to vector<8x512xf32>
    %c2_101 = arith.constant 2 : index
    %c0_102 = arith.constant 0 : index
    %c0_103 = arith.constant 0 : index
    %240 = vector.load %arg10[%c2_101, %c0_102, %c0_103] : memref<8x8x512xf32, #tpu.memory_space<vmem>>, vector<1x8x512xf32>
    %241 = vector.shape_cast %240 : vector<1x8x512xf32> to vector<8x512xf32>
    %242 = arith.select %18, %239, %241 : vector<8x512xi1>, vector<8x512xf32>
    %c0_104 = arith.constant 0 : index
    %c0_105 = arith.constant 0 : index
    %243 = vector.load %arg2[%c0_104, %c0_105] : memref<128x512xf32, #tpu.memory_space<vmem>>, vector<128x512xf32>
    %cst_106 = arith.constant dense<0.000000e+00> : vector<8x512xf32>
    %244 = tpu.matmul %229, %243, %cst_106 {dimension_numbers = #tpu.dot_dimension_numbers<[1], [0], [0], [1], [0, 0, 1, 1], [], []>} : vector<8x128xf32>, vector<128x512xf32>, vector<8x512xf32> -> vector<8x512xf32>
    %245 = arith.addf %244, %242 : vector<8x512xf32>
    %246 = vector.extract_strided_slice %245 {offsets = [0, 0], sizes = [8, 128], strides = [1, 1]} : vector<8x512xf32> to vector<8x128xf32>
    %247 = arith.negf %246 : vector<8x128xf32>
    %248 = math.exp %247 : vector<8x128xf32>
    %cst_107 = arith.constant 1.000000e+00 : f32
    %249 = vector.broadcast %cst_107 : f32 to vector<8x128xf32>
    %250 = arith.addf %249, %248 : vector<8x128xf32>
    %251 = arith.divf %249, %250 : vector<8x128xf32>
    %252 = vector.extract_strided_slice %245 {offsets = [0, 128], sizes = [8, 128], strides = [1, 1]} : vector<8x512xf32> to vector<8x128xf32>
    %253 = arith.negf %252 : vector<8x128xf32>
    %254 = math.exp %253 : vector<8x128xf32>
    %cst_108 = arith.constant 1.000000e+00 : f32
    %255 = vector.broadcast %cst_108 : f32 to vector<8x128xf32>
    %256 = arith.addf %255, %254 : vector<8x128xf32>
    %257 = arith.divf %255, %256 : vector<8x128xf32>
    %258 = vector.extract_strided_slice %245 {offsets = [0, 256], sizes = [8, 128], strides = [1, 1]} : vector<8x512xf32> to vector<8x128xf32>
    %259 = math.tanh %258 : vector<8x128xf32>
    %260 = vector.extract_strided_slice %245 {offsets = [0, 384], sizes = [8, 128], strides = [1, 1]} : vector<8x512xf32> to vector<8x128xf32>
    %261 = arith.negf %260 : vector<8x128xf32>
    %262 = math.exp %261 : vector<8x128xf32>
    %cst_109 = arith.constant 1.000000e+00 : f32
    %263 = vector.broadcast %cst_109 : f32 to vector<8x128xf32>
    %264 = arith.addf %263, %262 : vector<8x128xf32>
    %265 = arith.divf %263, %264 : vector<8x128xf32>
    %266 = arith.mulf %257, %227 : vector<8x128xf32>
    %267 = arith.mulf %251, %259 : vector<8x128xf32>
    %268 = arith.addf %266, %267 : vector<8x128xf32>
    %269 = math.tanh %268 : vector<8x128xf32>
    %270 = arith.mulf %265, %269 : vector<8x128xf32>
    %271 = vector.extract_strided_slice %270 {offsets = [0, 0], sizes = [8, 64], strides = [1, 1]} : vector<8x128xf32> to vector<8x64xf32>
    %c5_110 = arith.constant 5 : index
    %c0_111 = arith.constant 0 : index
    %c0_112 = arith.constant 0 : index
    %272 = vector.load %arg11[%c5_110, %c0_111, %c0_112] : memref<8x8x64xf32, #tpu.memory_space<vmem>>, vector<1x8x64xf32>
    %273 = vector.shape_cast %272 : vector<1x8x64xf32> to vector<8x64xf32>
    %274 = vector.shape_cast %271 : vector<8x64xf32> to vector<1x8x64xf32>
    tpu.vector_store %arg11[%c5_110, %c0_111, %c0_112], %274 {strides = array<i32>} : memref<8x8x64xf32, #tpu.memory_space<vmem>>, vector<1x8x64xf32>,
    %275 = vector.extract_strided_slice %270 {offsets = [0, 64], sizes = [8, 64], strides = [1, 1]} : vector<8x128xf32> to vector<8x64xf32>
    %c2_113 = arith.constant 2 : index
    %c0_114 = arith.constant 0 : index
    %c0_115 = arith.constant 0 : index
    %276 = vector.load %arg12[%c2_113, %c0_114, %c0_115] : memref<8x8x64xf32, #tpu.memory_space<vmem>>, vector<1x8x64xf32>
    %277 = vector.shape_cast %276 : vector<1x8x64xf32> to vector<8x64xf32>
    %278 = vector.shape_cast %275 : vector<8x64xf32> to vector<1x8x64xf32>
    tpu.vector_store %arg12[%c2_113, %c0_114, %c0_115], %278 {strides = array<i32>} : memref<8x8x64xf32, #tpu.memory_space<vmem>>, vector<1x8x64xf32>,
    %c6_116 = arith.constant 6 : index
    %c0_117 = arith.constant 0 : index
    %c0_118 = arith.constant 0 : index
    %279 = vector.load %arg10[%c6_116, %c0_117, %c0_118] : memref<8x8x512xf32, #tpu.memory_space<vmem>>, vector<1x8x512xf32>
    %280 = vector.shape_cast %279 : vector<1x8x512xf32> to vector<8x512xf32>
    %c1_119 = arith.constant 1 : index
    %c0_120 = arith.constant 0 : index
    %c0_121 = arith.constant 0 : index
    %281 = vector.load %arg10[%c1_119, %c0_120, %c0_121] : memref<8x8x512xf32, #tpu.memory_space<vmem>>, vector<1x8x512xf32>
    %282 = vector.shape_cast %281 : vector<1x8x512xf32> to vector<8x512xf32>
    %283 = arith.select %18, %280, %282 : vector<8x512xi1>, vector<8x512xf32>
    %c0_122 = arith.constant 0 : index
    %c0_123 = arith.constant 0 : index
    %284 = vector.load %arg2[%c0_122, %c0_123] : memref<128x512xf32, #tpu.memory_space<vmem>>, vector<128x512xf32>
    %cst_124 = arith.constant dense<0.000000e+00> : vector<8x512xf32>
    %285 = tpu.matmul %270, %284, %cst_124 {dimension_numbers = #tpu.dot_dimension_numbers<[1], [0], [0], [1], [0, 0, 1, 1], [], []>} : vector<8x128xf32>, vector<128x512xf32>, vector<8x512xf32> -> vector<8x512xf32>
    %286 = arith.addf %285, %283 : vector<8x512xf32>
    %287 = vector.extract_strided_slice %286 {offsets = [0, 0], sizes = [8, 128], strides = [1, 1]} : vector<8x512xf32> to vector<8x128xf32>
    %288 = arith.negf %287 : vector<8x128xf32>
    %289 = math.exp %288 : vector<8x128xf32>
    %cst_125 = arith.constant 1.000000e+00 : f32
    %290 = vector.broadcast %cst_125 : f32 to vector<8x128xf32>
    %291 = arith.addf %290, %289 : vector<8x128xf32>
    %292 = arith.divf %290, %291 : vector<8x128xf32>
    %293 = vector.extract_strided_slice %286 {offsets = [0, 128], sizes = [8, 128], strides = [1, 1]} : vector<8x512xf32> to vector<8x128xf32>
    %294 = arith.negf %293 : vector<8x128xf32>
    %295 = math.exp %294 : vector<8x128xf32>
    %cst_126 = arith.constant 1.000000e+00 : f32
    %296 = vector.broadcast %cst_126 : f32 to vector<8x128xf32>
    %297 = arith.addf %296, %295 : vector<8x128xf32>
    %298 = arith.divf %296, %297 : vector<8x128xf32>
    %299 = vector.extract_strided_slice %286 {offsets = [0, 256], sizes = [8, 128], strides = [1, 1]} : vector<8x512xf32> to vector<8x128xf32>
    %300 = math.tanh %299 : vector<8x128xf32>
    %301 = vector.extract_strided_slice %286 {offsets = [0, 384], sizes = [8, 128], strides = [1, 1]} : vector<8x512xf32> to vector<8x128xf32>
    %302 = arith.negf %301 : vector<8x128xf32>
    %303 = math.exp %302 : vector<8x128xf32>
    %cst_127 = arith.constant 1.000000e+00 : f32
    %304 = vector.broadcast %cst_127 : f32 to vector<8x128xf32>
    %305 = arith.addf %304, %303 : vector<8x128xf32>
    %306 = arith.divf %304, %305 : vector<8x128xf32>
    %307 = arith.mulf %298, %268 : vector<8x128xf32>
    %308 = arith.mulf %292, %300 : vector<8x128xf32>
    %309 = arith.addf %307, %308 : vector<8x128xf32>
    %310 = math.tanh %309 : vector<8x128xf32>
    %311 = arith.mulf %306, %310 : vector<8x128xf32>
    %312 = vector.extract_strided_slice %311 {offsets = [0, 0], sizes = [8, 64], strides = [1, 1]} : vector<8x128xf32> to vector<8x64xf32>
    %c6_128 = arith.constant 6 : index
    %c0_129 = arith.constant 0 : index
    %c0_130 = arith.constant 0 : index
    %313 = vector.load %arg11[%c6_128, %c0_129, %c0_130] : memref<8x8x64xf32, #tpu.memory_space<vmem>>, vector<1x8x64xf32>
    %314 = vector.shape_cast %313 : vector<1x8x64xf32> to vector<8x64xf32>
    %315 = vector.shape_cast %312 : vector<8x64xf32> to vector<1x8x64xf32>
    tpu.vector_store %arg11[%c6_128, %c0_129, %c0_130], %315 {strides = array<i32>} : memref<8x8x64xf32, #tpu.memory_space<vmem>>, vector<1x8x64xf32>,
    %316 = vector.extract_strided_slice %311 {offsets = [0, 64], sizes = [8, 64], strides = [1, 1]} : vector<8x128xf32> to vector<8x64xf32>
    %c1_131 = arith.constant 1 : index
    %c0_132 = arith.constant 0 : index
    %c0_133 = arith.constant 0 : index
    %317 = vector.load %arg12[%c1_131, %c0_132, %c0_133] : memref<8x8x64xf32, #tpu.memory_space<vmem>>, vector<1x8x64xf32>
    %318 = vector.shape_cast %317 : vector<1x8x64xf32> to vector<8x64xf32>
    %319 = vector.shape_cast %316 : vector<8x64xf32> to vector<1x8x64xf32>
    tpu.vector_store %arg12[%c1_131, %c0_132, %c0_133], %319 {strides = array<i32>} : memref<8x8x64xf32, #tpu.memory_space<vmem>>, vector<1x8x64xf32>,
    %c7_134 = arith.constant 7 : index
    %c0_135 = arith.constant 0 : index
    %c0_136 = arith.constant 0 : index
    %320 = vector.load %arg10[%c7_134, %c0_135, %c0_136] : memref<8x8x512xf32, #tpu.memory_space<vmem>>, vector<1x8x512xf32>
    %321 = vector.shape_cast %320 : vector<1x8x512xf32> to vector<8x512xf32>
    %c0_137 = arith.constant 0 : index
    %c0_138 = arith.constant 0 : index
    %c0_139 = arith.constant 0 : index
    %322 = vector.load %arg10[%c0_137, %c0_138, %c0_139] : memref<8x8x512xf32, #tpu.memory_space<vmem>>, vector<1x8x512xf32>
    %323 = vector.shape_cast %322 : vector<1x8x512xf32> to vector<8x512xf32>
    %324 = arith.select %18, %321, %323 : vector<8x512xi1>, vector<8x512xf32>
    %c0_140 = arith.constant 0 : index
    %c0_141 = arith.constant 0 : index
    %325 = vector.load %arg2[%c0_140, %c0_141] : memref<128x512xf32, #tpu.memory_space<vmem>>, vector<128x512xf32>
    %cst_142 = arith.constant dense<0.000000e+00> : vector<8x512xf32>
    %326 = tpu.matmul %311, %325, %cst_142 {dimension_numbers = #tpu.dot_dimension_numbers<[1], [0], [0], [1], [0, 0, 1, 1], [], []>} : vector<8x128xf32>, vector<128x512xf32>, vector<8x512xf32> -> vector<8x512xf32>
    %327 = arith.addf %326, %324 : vector<8x512xf32>
    %328 = vector.extract_strided_slice %327 {offsets = [0, 0], sizes = [8, 128], strides = [1, 1]} : vector<8x512xf32> to vector<8x128xf32>
    %329 = arith.negf %328 : vector<8x128xf32>
    %330 = math.exp %329 : vector<8x128xf32>
    %cst_143 = arith.constant 1.000000e+00 : f32
    %331 = vector.broadcast %cst_143 : f32 to vector<8x128xf32>
    %332 = arith.addf %331, %330 : vector<8x128xf32>
    %333 = arith.divf %331, %332 : vector<8x128xf32>
    %334 = vector.extract_strided_slice %327 {offsets = [0, 128], sizes = [8, 128], strides = [1, 1]} : vector<8x512xf32> to vector<8x128xf32>
    %335 = arith.negf %334 : vector<8x128xf32>
    %336 = math.exp %335 : vector<8x128xf32>
    %cst_144 = arith.constant 1.000000e+00 : f32
    %337 = vector.broadcast %cst_144 : f32 to vector<8x128xf32>
    %338 = arith.addf %337, %336 : vector<8x128xf32>
    %339 = arith.divf %337, %338 : vector<8x128xf32>
    %340 = vector.extract_strided_slice %327 {offsets = [0, 256], sizes = [8, 128], strides = [1, 1]} : vector<8x512xf32> to vector<8x128xf32>
    %341 = math.tanh %340 : vector<8x128xf32>
    %342 = vector.extract_strided_slice %327 {offsets = [0, 384], sizes = [8, 128], strides = [1, 1]} : vector<8x512xf32> to vector<8x128xf32>
    %343 = arith.negf %342 : vector<8x128xf32>
    %344 = math.exp %343 : vector<8x128xf32>
    %cst_145 = arith.constant 1.000000e+00 : f32
    %345 = vector.broadcast %cst_145 : f32 to vector<8x128xf32>
    %346 = arith.addf %345, %344 : vector<8x128xf32>
    %347 = arith.divf %345, %346 : vector<8x128xf32>
    %348 = arith.mulf %339, %309 : vector<8x128xf32>
    %349 = arith.mulf %333, %341 : vector<8x128xf32>
    %350 = arith.addf %348, %349 : vector<8x128xf32>
    %351 = math.tanh %350 : vector<8x128xf32>
    %352 = arith.mulf %347, %351 : vector<8x128xf32>
    %353 = vector.extract_strided_slice %352 {offsets = [0, 0], sizes = [8, 64], strides = [1, 1]} : vector<8x128xf32> to vector<8x64xf32>
    %c7_146 = arith.constant 7 : index
    %c0_147 = arith.constant 0 : index
    %c0_148 = arith.constant 0 : index
    %354 = vector.load %arg11[%c7_146, %c0_147, %c0_148] : memref<8x8x64xf32, #tpu.memory_space<vmem>>, vector<1x8x64xf32>
    %355 = vector.shape_cast %354 : vector<1x8x64xf32> to vector<8x64xf32>
    %356 = vector.shape_cast %353 : vector<8x64xf32> to vector<1x8x64xf32>
    tpu.vector_store %arg11[%c7_146, %c0_147, %c0_148], %356 {strides = array<i32>} : memref<8x8x64xf32, #tpu.memory_space<vmem>>, vector<1x8x64xf32>,
    %357 = vector.extract_strided_slice %352 {offsets = [0, 64], sizes = [8, 64], strides = [1, 1]} : vector<8x128xf32> to vector<8x64xf32>
    %c0_149 = arith.constant 0 : index
    %c0_150 = arith.constant 0 : index
    %c0_151 = arith.constant 0 : index
    %358 = vector.load %arg12[%c0_149, %c0_150, %c0_151] : memref<8x8x64xf32, #tpu.memory_space<vmem>>, vector<1x8x64xf32>
    %359 = vector.shape_cast %358 : vector<1x8x64xf32> to vector<8x64xf32>
    %360 = vector.shape_cast %357 : vector<8x64xf32> to vector<1x8x64xf32>
    tpu.vector_store %arg12[%c0_149, %c0_150, %c0_151], %360 {strides = array<i32>} : memref<8x8x64xf32, #tpu.memory_space<vmem>>, vector<1x8x64xf32>,
    %c0_152 = arith.constant 0 : index
    %c0_153 = arith.constant 0 : index
    %c0_154 = arith.constant 0 : index
    %361 = vector.load %arg11[%c0_152, %c0_153, %c0_154] : memref<8x8x64xf32, #tpu.memory_space<vmem>>, vector<8x8x64xf32>
    %c0_155 = arith.constant 0 : index
    %c0_156 = arith.constant 0 : index
    %c0_157 = arith.constant 0 : index
    %362 = vector.load %arg12[%c0_155, %c0_156, %c0_157] : memref<8x8x64xf32, #tpu.memory_space<vmem>>, vector<8x8x64xf32>
    %363 = tpu.concatenate %361, %362 in 2 : vector<8x8x64xf32>, vector<8x8x64xf32> -> vector<8x8x128xf32>
    %364 = vector.shape_cast %363 : vector<8x8x128xf32> to vector<64x128xf32>
    %c0_158 = arith.constant 0 : index
    %c0_159 = arith.constant 0 : index
    %365 = vector.load %arg4[%c0_158, %c0_159] : memref<128x512xf32, #tpu.memory_space<vmem>>, vector<128x512xf32>
    %cst_160 = arith.constant dense<0.000000e+00> : vector<64x512xf32>
    %366 = tpu.matmul %364, %365, %cst_160 {dimension_numbers = #tpu.dot_dimension_numbers<[1], [0], [0], [1], [0, 0, 1, 1], [], []>} : vector<64x128xf32>, vector<128x512xf32>, vector<64x512xf32> -> vector<64x512xf32>
    %c0_161 = arith.constant 0 : index
    %c0_162 = arith.constant 0 : index
    %367 = vector.load %arg6[%c0_161, %c0_162] : memref<1x512xf32, #tpu.memory_space<vmem>>, vector<1x512xf32>
    %368 = vector.broadcast %367 : vector<1x512xf32> to vector<64x512xf32>
    %369 = arith.addf %366, %368 : vector<64x512xf32>
    %370 = vector.shape_cast %369 : vector<64x512xf32> to vector<8x8x512xf32>
    %c0_163 = arith.constant 0 : index
    %c0_164 = arith.constant 0 : index
    %c0_165 = arith.constant 0 : index
    %371 = vector.load %arg10[%c0_163, %c0_164, %c0_165] : memref<8x8x512xf32, #tpu.memory_space<vmem>>, vector<8x8x512xf32>
    tpu.vector_store %arg10[%c0_163, %c0_164, %c0_165], %370 {strides = array<i32>} : memref<8x8x512xf32, #tpu.memory_space<vmem>>, vector<8x8x512xf32>,
    %cst_166 = arith.constant 0.000000e+00 : f32
    %372 = vector.broadcast %cst_166 : f32 to vector<8x128xf32>
    %cst_167 = arith.constant 0.000000e+00 : f32
    %373 = vector.broadcast %cst_167 : f32 to vector<8x128xf32>
    %c0_168 = arith.constant 0 : index
    %c0_169 = arith.constant 0 : index
    %c0_170 = arith.constant 0 : index
    %374 = vector.load %arg10[%c0_168, %c0_169, %c0_170] : memref<8x8x512xf32, #tpu.memory_space<vmem>>, vector<1x8x512xf32>
    %375 = vector.shape_cast %374 : vector<1x8x512xf32> to vector<8x512xf32>
    %c7_171 = arith.constant 7 : index
    %c0_172 = arith.constant 0 : index
    %c0_173 = arith.constant 0 : index
    %376 = vector.load %arg10[%c7_171, %c0_172, %c0_173] : memref<8x8x512xf32, #tpu.memory_space<vmem>>, vector<1x8x512xf32>
    %377 = vector.shape_cast %376 : vector<1x8x512xf32> to vector<8x512xf32>
    %378 = arith.select %18, %375, %377 : vector<8x512xi1>, vector<8x512xf32>
    %c0_174 = arith.constant 0 : index
    %c0_175 = arith.constant 0 : index
    %379 = vector.load %arg5[%c0_174, %c0_175] : memref<128x512xf32, #tpu.memory_space<vmem>>, vector<128x512xf32>
    %cst_176 = arith.constant dense<0.000000e+00> : vector<8x512xf32>
    %380 = tpu.matmul %372, %379, %cst_176 {dimension_numbers = #tpu.dot_dimension_numbers<[1], [0], [0], [1], [0, 0, 1, 1], [], []>} : vector<8x128xf32>, vector<128x512xf32>, vector<8x512xf32> -> vector<8x512xf32>
    %381 = arith.addf %380, %378 : vector<8x512xf32>
    %382 = vector.extract_strided_slice %381 {offsets = [0, 0], sizes = [8, 128], strides = [1, 1]} : vector<8x512xf32> to vector<8x128xf32>
    %383 = arith.negf %382 : vector<8x128xf32>
    %384 = math.exp %383 : vector<8x128xf32>
    %cst_177 = arith.constant 1.000000e+00 : f32
    %385 = vector.broadcast %cst_177 : f32 to vector<8x128xf32>
    %386 = arith.addf %385, %384 : vector<8x128xf32>
    %387 = arith.divf %385, %386 : vector<8x128xf32>
    %388 = vector.extract_strided_slice %381 {offsets = [0, 128], sizes = [8, 128], strides = [1, 1]} : vector<8x512xf32> to vector<8x128xf32>
    %389 = arith.negf %388 : vector<8x128xf32>
    %390 = math.exp %389 : vector<8x128xf32>
    %cst_178 = arith.constant 1.000000e+00 : f32
    %391 = vector.broadcast %cst_178 : f32 to vector<8x128xf32>
    %392 = arith.addf %391, %390 : vector<8x128xf32>
    %393 = arith.divf %391, %392 : vector<8x128xf32>
    %394 = vector.extract_strided_slice %381 {offsets = [0, 256], sizes = [8, 128], strides = [1, 1]} : vector<8x512xf32> to vector<8x128xf32>
    %395 = math.tanh %394 : vector<8x128xf32>
    %396 = vector.extract_strided_slice %381 {offsets = [0, 384], sizes = [8, 128], strides = [1, 1]} : vector<8x512xf32> to vector<8x128xf32>
    %397 = arith.negf %396 : vector<8x128xf32>
    %398 = math.exp %397 : vector<8x128xf32>
    %cst_179 = arith.constant 1.000000e+00 : f32
    %399 = vector.broadcast %cst_179 : f32 to vector<8x128xf32>
    %400 = arith.addf %399, %398 : vector<8x128xf32>
    %401 = arith.divf %399, %400 : vector<8x128xf32>
    %402 = arith.mulf %393, %373 : vector<8x128xf32>
    %403 = arith.mulf %387, %395 : vector<8x128xf32>
    %404 = arith.addf %402, %403 : vector<8x128xf32>
    %405 = math.tanh %404 : vector<8x128xf32>
    %406 = arith.mulf %401, %405 : vector<8x128xf32>
    %c1_180 = arith.constant 1 : index
    %c0_181 = arith.constant 0 : index
    %c0_182 = arith.constant 0 : index
    %407 = vector.load %arg10[%c1_180, %c0_181, %c0_182] : memref<8x8x512xf32, #tpu.memory_space<vmem>>, vector<1x8x512xf32>
    %408 = vector.shape_cast %407 : vector<1x8x512xf32> to vector<8x512xf32>
    %c6_183 = arith.constant 6 : index
    %c0_184 = arith.constant 0 : index
    %c0_185 = arith.constant 0 : index
    %409 = vector.load %arg10[%c6_183, %c0_184, %c0_185] : memref<8x8x512xf32, #tpu.memory_space<vmem>>, vector<1x8x512xf32>
    %410 = vector.shape_cast %409 : vector<1x8x512xf32> to vector<8x512xf32>
    %411 = arith.select %18, %408, %410 : vector<8x512xi1>, vector<8x512xf32>
    %c0_186 = arith.constant 0 : index
    %c0_187 = arith.constant 0 : index
    %412 = vector.load %arg5[%c0_186, %c0_187] : memref<128x512xf32, #tpu.memory_space<vmem>>, vector<128x512xf32>
    %cst_188 = arith.constant dense<0.000000e+00> : vector<8x512xf32>
    %413 = tpu.matmul %406, %412, %cst_188 {dimension_numbers = #tpu.dot_dimension_numbers<[1], [0], [0], [1], [0, 0, 1, 1], [], []>} : vector<8x128xf32>, vector<128x512xf32>, vector<8x512xf32> -> vector<8x512xf32>
    %414 = arith.addf %413, %411 : vector<8x512xf32>
    %415 = vector.extract_strided_slice %414 {offsets = [0, 0], sizes = [8, 128], strides = [1, 1]} : vector<8x512xf32> to vector<8x128xf32>
    %416 = arith.negf %415 : vector<8x128xf32>
    %417 = math.exp %416 : vector<8x128xf32>
    %cst_189 = arith.constant 1.000000e+00 : f32
    %418 = vector.broadcast %cst_189 : f32 to vector<8x128xf32>
    %419 = arith.addf %418, %417 : vector<8x128xf32>
    %420 = arith.divf %418, %419 : vector<8x128xf32>
    %421 = vector.extract_strided_slice %414 {offsets = [0, 128], sizes = [8, 128], strides = [1, 1]} : vector<8x512xf32> to vector<8x128xf32>
    %422 = arith.negf %421 : vector<8x128xf32>
    %423 = math.exp %422 : vector<8x128xf32>
    %cst_190 = arith.constant 1.000000e+00 : f32
    %424 = vector.broadcast %cst_190 : f32 to vector<8x128xf32>
    %425 = arith.addf %424, %423 : vector<8x128xf32>
    %426 = arith.divf %424, %425 : vector<8x128xf32>
    %427 = vector.extract_strided_slice %414 {offsets = [0, 256], sizes = [8, 128], strides = [1, 1]} : vector<8x512xf32> to vector<8x128xf32>
    %428 = math.tanh %427 : vector<8x128xf32>
    %429 = vector.extract_strided_slice %414 {offsets = [0, 384], sizes = [8, 128], strides = [1, 1]} : vector<8x512xf32> to vector<8x128xf32>
    %430 = arith.negf %429 : vector<8x128xf32>
    %431 = math.exp %430 : vector<8x128xf32>
    %cst_191 = arith.constant 1.000000e+00 : f32
    %432 = vector.broadcast %cst_191 : f32 to vector<8x128xf32>
    %433 = arith.addf %432, %431 : vector<8x128xf32>
    %434 = arith.divf %432, %433 : vector<8x128xf32>
    %435 = arith.mulf %426, %404 : vector<8x128xf32>
    %436 = arith.mulf %420, %428 : vector<8x128xf32>
    %437 = arith.addf %435, %436 : vector<8x128xf32>
    %438 = math.tanh %437 : vector<8x128xf32>
    %439 = arith.mulf %434, %438 : vector<8x128xf32>
    %c2_192 = arith.constant 2 : index
    %c0_193 = arith.constant 0 : index
    %c0_194 = arith.constant 0 : index
    %440 = vector.load %arg10[%c2_192, %c0_193, %c0_194] : memref<8x8x512xf32, #tpu.memory_space<vmem>>, vector<1x8x512xf32>
    %441 = vector.shape_cast %440 : vector<1x8x512xf32> to vector<8x512xf32>
    %c5_195 = arith.constant 5 : index
    %c0_196 = arith.constant 0 : index
    %c0_197 = arith.constant 0 : index
    %442 = vector.load %arg10[%c5_195, %c0_196, %c0_197] : memref<8x8x512xf32, #tpu.memory_space<vmem>>, vector<1x8x512xf32>
    %443 = vector.shape_cast %442 : vector<1x8x512xf32> to vector<8x512xf32>
    %444 = arith.select %18, %441, %443 : vector<8x512xi1>, vector<8x512xf32>
    %c0_198 = arith.constant 0 : index
    %c0_199 = arith.constant 0 : index
    %445 = vector.load %arg5[%c0_198, %c0_199] : memref<128x512xf32, #tpu.memory_space<vmem>>, vector<128x512xf32>
    %cst_200 = arith.constant dense<0.000000e+00> : vector<8x512xf32>
    %446 = tpu.matmul %439, %445, %cst_200 {dimension_numbers = #tpu.dot_dimension_numbers<[1], [0], [0], [1], [0, 0, 1, 1], [], []>} : vector<8x128xf32>, vector<128x512xf32>, vector<8x512xf32> -> vector<8x512xf32>
    %447 = arith.addf %446, %444 : vector<8x512xf32>
    %448 = vector.extract_strided_slice %447 {offsets = [0, 0], sizes = [8, 128], strides = [1, 1]} : vector<8x512xf32> to vector<8x128xf32>
    %449 = arith.negf %448 : vector<8x128xf32>
    %450 = math.exp %449 : vector<8x128xf32>
    %cst_201 = arith.constant 1.000000e+00 : f32
    %451 = vector.broadcast %cst_201 : f32 to vector<8x128xf32>
    %452 = arith.addf %451, %450 : vector<8x128xf32>
    %453 = arith.divf %451, %452 : vector<8x128xf32>
    %454 = vector.extract_strided_slice %447 {offsets = [0, 128], sizes = [8, 128], strides = [1, 1]} : vector<8x512xf32> to vector<8x128xf32>
    %455 = arith.negf %454 : vector<8x128xf32>
    %456 = math.exp %455 : vector<8x128xf32>
    %cst_202 = arith.constant 1.000000e+00 : f32
    %457 = vector.broadcast %cst_202 : f32 to vector<8x128xf32>
    %458 = arith.addf %457, %456 : vector<8x128xf32>
    %459 = arith.divf %457, %458 : vector<8x128xf32>
    %460 = vector.extract_strided_slice %447 {offsets = [0, 256], sizes = [8, 128], strides = [1, 1]} : vector<8x512xf32> to vector<8x128xf32>
    %461 = math.tanh %460 : vector<8x128xf32>
    %462 = vector.extract_strided_slice %447 {offsets = [0, 384], sizes = [8, 128], strides = [1, 1]} : vector<8x512xf32> to vector<8x128xf32>
    %463 = arith.negf %462 : vector<8x128xf32>
    %464 = math.exp %463 : vector<8x128xf32>
    %cst_203 = arith.constant 1.000000e+00 : f32
    %465 = vector.broadcast %cst_203 : f32 to vector<8x128xf32>
    %466 = arith.addf %465, %464 : vector<8x128xf32>
    %467 = arith.divf %465, %466 : vector<8x128xf32>
    %468 = arith.mulf %459, %437 : vector<8x128xf32>
    %469 = arith.mulf %453, %461 : vector<8x128xf32>
    %470 = arith.addf %468, %469 : vector<8x128xf32>
    %471 = math.tanh %470 : vector<8x128xf32>
    %472 = arith.mulf %467, %471 : vector<8x128xf32>
    %c3_204 = arith.constant 3 : index
    %c0_205 = arith.constant 0 : index
    %c0_206 = arith.constant 0 : index
    %473 = vector.load %arg10[%c3_204, %c0_205, %c0_206] : memref<8x8x512xf32, #tpu.memory_space<vmem>>, vector<1x8x512xf32>
    %474 = vector.shape_cast %473 : vector<1x8x512xf32> to vector<8x512xf32>
    %c4_207 = arith.constant 4 : index
    %c0_208 = arith.constant 0 : index
    %c0_209 = arith.constant 0 : index
    %475 = vector.load %arg10[%c4_207, %c0_208, %c0_209] : memref<8x8x512xf32, #tpu.memory_space<vmem>>, vector<1x8x512xf32>
    %476 = vector.shape_cast %475 : vector<1x8x512xf32> to vector<8x512xf32>
    %477 = arith.select %18, %474, %476 : vector<8x512xi1>, vector<8x512xf32>
    %c0_210 = arith.constant 0 : index
    %c0_211 = arith.constant 0 : index
    %478 = vector.load %arg5[%c0_210, %c0_211] : memref<128x512xf32, #tpu.memory_space<vmem>>, vector<128x512xf32>
    %cst_212 = arith.constant dense<0.000000e+00> : vector<8x512xf32>
    %479 = tpu.matmul %472, %478, %cst_212 {dimension_numbers = #tpu.dot_dimension_numbers<[1], [0], [0], [1], [0, 0, 1, 1], [], []>} : vector<8x128xf32>, vector<128x512xf32>, vector<8x512xf32> -> vector<8x512xf32>
    %480 = arith.addf %479, %477 : vector<8x512xf32>
    %481 = vector.extract_strided_slice %480 {offsets = [0, 0], sizes = [8, 128], strides = [1, 1]} : vector<8x512xf32> to vector<8x128xf32>
    %482 = arith.negf %481 : vector<8x128xf32>
    %483 = math.exp %482 : vector<8x128xf32>
    %cst_213 = arith.constant 1.000000e+00 : f32
    %484 = vector.broadcast %cst_213 : f32 to vector<8x128xf32>
    %485 = arith.addf %484, %483 : vector<8x128xf32>
    %486 = arith.divf %484, %485 : vector<8x128xf32>
    %487 = vector.extract_strided_slice %480 {offsets = [0, 128], sizes = [8, 128], strides = [1, 1]} : vector<8x512xf32> to vector<8x128xf32>
    %488 = arith.negf %487 : vector<8x128xf32>
    %489 = math.exp %488 : vector<8x128xf32>
    %cst_214 = arith.constant 1.000000e+00 : f32
    %490 = vector.broadcast %cst_214 : f32 to vector<8x128xf32>
    %491 = arith.addf %490, %489 : vector<8x128xf32>
    %492 = arith.divf %490, %491 : vector<8x128xf32>
    %493 = vector.extract_strided_slice %480 {offsets = [0, 256], sizes = [8, 128], strides = [1, 1]} : vector<8x512xf32> to vector<8x128xf32>
    %494 = math.tanh %493 : vector<8x128xf32>
    %495 = vector.extract_strided_slice %480 {offsets = [0, 384], sizes = [8, 128], strides = [1, 1]} : vector<8x512xf32> to vector<8x128xf32>
    %496 = arith.negf %495 : vector<8x128xf32>
    %497 = math.exp %496 : vector<8x128xf32>
    %cst_215 = arith.constant 1.000000e+00 : f32
    %498 = vector.broadcast %cst_215 : f32 to vector<8x128xf32>
    %499 = arith.addf %498, %497 : vector<8x128xf32>
    %500 = arith.divf %498, %499 : vector<8x128xf32>
    %501 = arith.mulf %492, %470 : vector<8x128xf32>
    %502 = arith.mulf %486, %494 : vector<8x128xf32>
    %503 = arith.addf %501, %502 : vector<8x128xf32>
    %504 = math.tanh %503 : vector<8x128xf32>
    %505 = arith.mulf %500, %504 : vector<8x128xf32>
    %c4_216 = arith.constant 4 : index
    %c0_217 = arith.constant 0 : index
    %c0_218 = arith.constant 0 : index
    %506 = vector.load %arg10[%c4_216, %c0_217, %c0_218] : memref<8x8x512xf32, #tpu.memory_space<vmem>>, vector<1x8x512xf32>
    %507 = vector.shape_cast %506 : vector<1x8x512xf32> to vector<8x512xf32>
    %c3_219 = arith.constant 3 : index
    %c0_220 = arith.constant 0 : index
    %c0_221 = arith.constant 0 : index
    %508 = vector.load %arg10[%c3_219, %c0_220, %c0_221] : memref<8x8x512xf32, #tpu.memory_space<vmem>>, vector<1x8x512xf32>
    %509 = vector.shape_cast %508 : vector<1x8x512xf32> to vector<8x512xf32>
    %510 = arith.select %18, %507, %509 : vector<8x512xi1>, vector<8x512xf32>
    %c0_222 = arith.constant 0 : index
    %c0_223 = arith.constant 0 : index
    %511 = vector.load %arg5[%c0_222, %c0_223] : memref<128x512xf32, #tpu.memory_space<vmem>>, vector<128x512xf32>
    %cst_224 = arith.constant dense<0.000000e+00> : vector<8x512xf32>
    %512 = tpu.matmul %505, %511, %cst_224 {dimension_numbers = #tpu.dot_dimension_numbers<[1], [0], [0], [1], [0, 0, 1, 1], [], []>} : vector<8x128xf32>, vector<128x512xf32>, vector<8x512xf32> -> vector<8x512xf32>
    %513 = arith.addf %512, %510 : vector<8x512xf32>
    %514 = vector.extract_strided_slice %513 {offsets = [0, 0], sizes = [8, 128], strides = [1, 1]} : vector<8x512xf32> to vector<8x128xf32>
    %515 = arith.negf %514 : vector<8x128xf32>
    %516 = math.exp %515 : vector<8x128xf32>
    %cst_225 = arith.constant 1.000000e+00 : f32
    %517 = vector.broadcast %cst_225 : f32 to vector<8x128xf32>
    %518 = arith.addf %517, %516 : vector<8x128xf32>
    %519 = arith.divf %517, %518 : vector<8x128xf32>
    %520 = vector.extract_strided_slice %513 {offsets = [0, 128], sizes = [8, 128], strides = [1, 1]} : vector<8x512xf32> to vector<8x128xf32>
    %521 = arith.negf %520 : vector<8x128xf32>
    %522 = math.exp %521 : vector<8x128xf32>
    %cst_226 = arith.constant 1.000000e+00 : f32
    %523 = vector.broadcast %cst_226 : f32 to vector<8x128xf32>
    %524 = arith.addf %523, %522 : vector<8x128xf32>
    %525 = arith.divf %523, %524 : vector<8x128xf32>
    %526 = vector.extract_strided_slice %513 {offsets = [0, 256], sizes = [8, 128], strides = [1, 1]} : vector<8x512xf32> to vector<8x128xf32>
    %527 = math.tanh %526 : vector<8x128xf32>
    %528 = vector.extract_strided_slice %513 {offsets = [0, 384], sizes = [8, 128], strides = [1, 1]} : vector<8x512xf32> to vector<8x128xf32>
    %529 = arith.negf %528 : vector<8x128xf32>
    %530 = math.exp %529 : vector<8x128xf32>
    %cst_227 = arith.constant 1.000000e+00 : f32
    %531 = vector.broadcast %cst_227 : f32 to vector<8x128xf32>
    %532 = arith.addf %531, %530 : vector<8x128xf32>
    %533 = arith.divf %531, %532 : vector<8x128xf32>
    %534 = arith.mulf %525, %503 : vector<8x128xf32>
    %535 = arith.mulf %519, %527 : vector<8x128xf32>
    %536 = arith.addf %534, %535 : vector<8x128xf32>
    %537 = math.tanh %536 : vector<8x128xf32>
    %538 = arith.mulf %533, %537 : vector<8x128xf32>
    %c5_228 = arith.constant 5 : index
    %c0_229 = arith.constant 0 : index
    %c0_230 = arith.constant 0 : index
    %539 = vector.load %arg10[%c5_228, %c0_229, %c0_230] : memref<8x8x512xf32, #tpu.memory_space<vmem>>, vector<1x8x512xf32>
    %540 = vector.shape_cast %539 : vector<1x8x512xf32> to vector<8x512xf32>
    %c2_231 = arith.constant 2 : index
    %c0_232 = arith.constant 0 : index
    %c0_233 = arith.constant 0 : index
    %541 = vector.load %arg10[%c2_231, %c0_232, %c0_233] : memref<8x8x512xf32, #tpu.memory_space<vmem>>, vector<1x8x512xf32>
    %542 = vector.shape_cast %541 : vector<1x8x512xf32> to vector<8x512xf32>
    %543 = arith.select %18, %540, %542 : vector<8x512xi1>, vector<8x512xf32>
    %c0_234 = arith.constant 0 : index
    %c0_235 = arith.constant 0 : index
    %544 = vector.load %arg5[%c0_234, %c0_235] : memref<128x512xf32, #tpu.memory_space<vmem>>, vector<128x512xf32>
    %cst_236 = arith.constant dense<0.000000e+00> : vector<8x512xf32>
    %545 = tpu.matmul %538, %544, %cst_236 {dimension_numbers = #tpu.dot_dimension_numbers<[1], [0], [0], [1], [0, 0, 1, 1], [], []>} : vector<8x128xf32>, vector<128x512xf32>, vector<8x512xf32> -> vector<8x512xf32>
    %546 = arith.addf %545, %543 : vector<8x512xf32>
    %547 = vector.extract_strided_slice %546 {offsets = [0, 0], sizes = [8, 128], strides = [1, 1]} : vector<8x512xf32> to vector<8x128xf32>
    %548 = arith.negf %547 : vector<8x128xf32>
    %549 = math.exp %548 : vector<8x128xf32>
    %cst_237 = arith.constant 1.000000e+00 : f32
    %550 = vector.broadcast %cst_237 : f32 to vector<8x128xf32>
    %551 = arith.addf %550, %549 : vector<8x128xf32>
    %552 = arith.divf %550, %551 : vector<8x128xf32>
    %553 = vector.extract_strided_slice %546 {offsets = [0, 128], sizes = [8, 128], strides = [1, 1]} : vector<8x512xf32> to vector<8x128xf32>
    %554 = arith.negf %553 : vector<8x128xf32>
    %555 = math.exp %554 : vector<8x128xf32>
    %cst_238 = arith.constant 1.000000e+00 : f32
    %556 = vector.broadcast %cst_238 : f32 to vector<8x128xf32>
    %557 = arith.addf %556, %555 : vector<8x128xf32>
    %558 = arith.divf %556, %557 : vector<8x128xf32>
    %559 = vector.extract_strided_slice %546 {offsets = [0, 256], sizes = [8, 128], strides = [1, 1]} : vector<8x512xf32> to vector<8x128xf32>
    %560 = math.tanh %559 : vector<8x128xf32>
    %561 = vector.extract_strided_slice %546 {offsets = [0, 384], sizes = [8, 128], strides = [1, 1]} : vector<8x512xf32> to vector<8x128xf32>
    %562 = arith.negf %561 : vector<8x128xf32>
    %563 = math.exp %562 : vector<8x128xf32>
    %cst_239 = arith.constant 1.000000e+00 : f32
    %564 = vector.broadcast %cst_239 : f32 to vector<8x128xf32>
    %565 = arith.addf %564, %563 : vector<8x128xf32>
    %566 = arith.divf %564, %565 : vector<8x128xf32>
    %567 = arith.mulf %558, %536 : vector<8x128xf32>
    %568 = arith.mulf %552, %560 : vector<8x128xf32>
    %569 = arith.addf %567, %568 : vector<8x128xf32>
    %570 = math.tanh %569 : vector<8x128xf32>
    %571 = arith.mulf %566, %570 : vector<8x128xf32>
    %c6_240 = arith.constant 6 : index
    %c0_241 = arith.constant 0 : index
    %c0_242 = arith.constant 0 : index
    %572 = vector.load %arg10[%c6_240, %c0_241, %c0_242] : memref<8x8x512xf32, #tpu.memory_space<vmem>>, vector<1x8x512xf32>
    %573 = vector.shape_cast %572 : vector<1x8x512xf32> to vector<8x512xf32>
    %c1_243 = arith.constant 1 : index
    %c0_244 = arith.constant 0 : index
    %c0_245 = arith.constant 0 : index
    %574 = vector.load %arg10[%c1_243, %c0_244, %c0_245] : memref<8x8x512xf32, #tpu.memory_space<vmem>>, vector<1x8x512xf32>
    %575 = vector.shape_cast %574 : vector<1x8x512xf32> to vector<8x512xf32>
    %576 = arith.select %18, %573, %575 : vector<8x512xi1>, vector<8x512xf32>
    %c0_246 = arith.constant 0 : index
    %c0_247 = arith.constant 0 : index
    %577 = vector.load %arg5[%c0_246, %c0_247] : memref<128x512xf32, #tpu.memory_space<vmem>>, vector<128x512xf32>
    %cst_248 = arith.constant dense<0.000000e+00> : vector<8x512xf32>
    %578 = tpu.matmul %571, %577, %cst_248 {dimension_numbers = #tpu.dot_dimension_numbers<[1], [0], [0], [1], [0, 0, 1, 1], [], []>} : vector<8x128xf32>, vector<128x512xf32>, vector<8x512xf32> -> vector<8x512xf32>
    %579 = arith.addf %578, %576 : vector<8x512xf32>
    %580 = vector.extract_strided_slice %579 {offsets = [0, 0], sizes = [8, 128], strides = [1, 1]} : vector<8x512xf32> to vector<8x128xf32>
    %581 = arith.negf %580 : vector<8x128xf32>
    %582 = math.exp %581 : vector<8x128xf32>
    %cst_249 = arith.constant 1.000000e+00 : f32
    %583 = vector.broadcast %cst_249 : f32 to vector<8x128xf32>
    %584 = arith.addf %583, %582 : vector<8x128xf32>
    %585 = arith.divf %583, %584 : vector<8x128xf32>
    %586 = vector.extract_strided_slice %579 {offsets = [0, 128], sizes = [8, 128], strides = [1, 1]} : vector<8x512xf32> to vector<8x128xf32>
    %587 = arith.negf %586 : vector<8x128xf32>
    %588 = math.exp %587 : vector<8x128xf32>
    %cst_250 = arith.constant 1.000000e+00 : f32
    %589 = vector.broadcast %cst_250 : f32 to vector<8x128xf32>
    %590 = arith.addf %589, %588 : vector<8x128xf32>
    %591 = arith.divf %589, %590 : vector<8x128xf32>
    %592 = vector.extract_strided_slice %579 {offsets = [0, 256], sizes = [8, 128], strides = [1, 1]} : vector<8x512xf32> to vector<8x128xf32>
    %593 = math.tanh %592 : vector<8x128xf32>
    %594 = vector.extract_strided_slice %579 {offsets = [0, 384], sizes = [8, 128], strides = [1, 1]} : vector<8x512xf32> to vector<8x128xf32>
    %595 = arith.negf %594 : vector<8x128xf32>
    %596 = math.exp %595 : vector<8x128xf32>
    %cst_251 = arith.constant 1.000000e+00 : f32
    %597 = vector.broadcast %cst_251 : f32 to vector<8x128xf32>
    %598 = arith.addf %597, %596 : vector<8x128xf32>
    %599 = arith.divf %597, %598 : vector<8x128xf32>
    %600 = arith.mulf %591, %569 : vector<8x128xf32>
    %601 = arith.mulf %585, %593 : vector<8x128xf32>
    %602 = arith.addf %600, %601 : vector<8x128xf32>
    %603 = math.tanh %602 : vector<8x128xf32>
    %604 = arith.mulf %599, %603 : vector<8x128xf32>
    %c7_252 = arith.constant 7 : index
    %c0_253 = arith.constant 0 : index
    %c0_254 = arith.constant 0 : index
    %605 = vector.load %arg10[%c7_252, %c0_253, %c0_254] : memref<8x8x512xf32, #tpu.memory_space<vmem>>, vector<1x8x512xf32>
    %606 = vector.shape_cast %605 : vector<1x8x512xf32> to vector<8x512xf32>
    %c0_255 = arith.constant 0 : index
    %c0_256 = arith.constant 0 : index
    %c0_257 = arith.constant 0 : index
    %607 = vector.load %arg10[%c0_255, %c0_256, %c0_257] : memref<8x8x512xf32, #tpu.memory_space<vmem>>, vector<1x8x512xf32>
    %608 = vector.shape_cast %607 : vector<1x8x512xf32> to vector<8x512xf32>
    %609 = arith.select %18, %606, %608 : vector<8x512xi1>, vector<8x512xf32>
    %c0_258 = arith.constant 0 : index
    %c0_259 = arith.constant 0 : index
    %610 = vector.load %arg5[%c0_258, %c0_259] : memref<128x512xf32, #tpu.memory_space<vmem>>, vector<128x512xf32>
    %cst_260 = arith.constant dense<0.000000e+00> : vector<8x512xf32>
    %611 = tpu.matmul %604, %610, %cst_260 {dimension_numbers = #tpu.dot_dimension_numbers<[1], [0], [0], [1], [0, 0, 1, 1], [], []>} : vector<8x128xf32>, vector<128x512xf32>, vector<8x512xf32> -> vector<8x512xf32>
    %612 = arith.addf %611, %609 : vector<8x512xf32>
    %613 = vector.extract_strided_slice %612 {offsets = [0, 0], sizes = [8, 128], strides = [1, 1]} : vector<8x512xf32> to vector<8x128xf32>
    %614 = arith.negf %613 : vector<8x128xf32>
    %615 = math.exp %614 : vector<8x128xf32>
    %cst_261 = arith.constant 1.000000e+00 : f32
    %616 = vector.broadcast %cst_261 : f32 to vector<8x128xf32>
    %617 = arith.addf %616, %615 : vector<8x128xf32>
    %618 = arith.divf %616, %617 : vector<8x128xf32>
    %619 = vector.extract_strided_slice %612 {offsets = [0, 128], sizes = [8, 128], strides = [1, 1]} : vector<8x512xf32> to vector<8x128xf32>
    %620 = arith.negf %619 : vector<8x128xf32>
    %621 = math.exp %620 : vector<8x128xf32>
    %cst_262 = arith.constant 1.000000e+00 : f32
    %622 = vector.broadcast %cst_262 : f32 to vector<8x128xf32>
    %623 = arith.addf %622, %621 : vector<8x128xf32>
    %624 = arith.divf %622, %623 : vector<8x128xf32>
    %625 = vector.extract_strided_slice %612 {offsets = [0, 256], sizes = [8, 128], strides = [1, 1]} : vector<8x512xf32> to vector<8x128xf32>
    %626 = math.tanh %625 : vector<8x128xf32>
    %627 = vector.extract_strided_slice %612 {offsets = [0, 384], sizes = [8, 128], strides = [1, 1]} : vector<8x512xf32> to vector<8x128xf32>
    %628 = arith.negf %627 : vector<8x128xf32>
    %629 = math.exp %628 : vector<8x128xf32>
    %cst_263 = arith.constant 1.000000e+00 : f32
    %630 = vector.broadcast %cst_263 : f32 to vector<8x128xf32>
    %631 = arith.addf %630, %629 : vector<8x128xf32>
    %632 = arith.divf %630, %631 : vector<8x128xf32>
    %633 = arith.mulf %624, %602 : vector<8x128xf32>
    %634 = arith.mulf %618, %626 : vector<8x128xf32>
    %635 = arith.addf %633, %634 : vector<8x128xf32>
    %636 = math.tanh %635 : vector<8x128xf32>
    %637 = arith.mulf %632, %636 : vector<8x128xf32>
    %638 = arith.select %21, %637, %406 : vector<8x128xi1>, vector<8x128xf32>
    %c0_264 = arith.constant 0 : index
    %c0_265 = arith.constant 0 : index
    %639 = vector.load %arg7[%c0_264, %c0_265] : memref<128x1xf32, #tpu.memory_space<vmem>>, vector<128x1xf32>
    %cst_266 = arith.constant dense<0.000000e+00> : vector<8x1xf32>
    %640 = tpu.matmul %638, %639, %cst_266 {dimension_numbers = #tpu.dot_dimension_numbers<[1], [0], [0], [1], [0, 0, 1, 1], [], []>} : vector<8x128xf32>, vector<128x1xf32>, vector<8x1xf32> -> vector<8x1xf32>
    %c0_267 = arith.constant 0 : index
    %c0_268 = arith.constant 0 : index
    %641 = vector.load %arg8[%c0_267, %c0_268] : memref<1x1xf32, #tpu.memory_space<vmem>>, vector<1x1xf32>
    %642 = vector.broadcast %641 : vector<1x1xf32> to vector<8x1xf32>
    %643 = arith.addf %640, %642 : vector<8x1xf32>
    %c0_269 = arith.constant 0 : index
    %c0_270 = arith.constant 0 : index
    %644 = vector.load %arg9[%c0_269, %c0_270] : memref<8x1xf32, #tpu.memory_space<vmem>>, vector<8x1xf32>
    tpu.vector_store %arg9[%c0_269, %c0_270], %643 {strides = array<i32>} : memref<8x1xf32, #tpu.memory_space<vmem>>, vector<8x1xf32>,
    return
  }
}

</mosaic_0001>

<bundles_post_ra>
// kernel: bilstm_model_forward.1
= control target key start
LH: loop header
LB: loop body
LE: loop exit
PB: predicated region body
PF: predicated region fallthrough
CT: control target
= control target key end

     0   :  { %s7528_s0 = inlined_call_operand.vmem [shape: f32[8,8,16], index: 0, kind: input, shape index: {}]   ;;  %s7529_s1 = inlined_call_operand.vmem [shape: f32[16,512], index: 1, kind: input, shape index: {}]   ;;  %s7530_s2 = inlined_call_operand.hbm [shape: f32[128,512], index: 2, kind: input, shape index: {}]   ;;  %s7531_s3 = inlined_call_operand.vmem [shape: f32[1,512], index: 3, kind: input, shape index: {}]   ;;  %s7532_s4 = inlined_call_operand.hbm [shape: f32[128,512], index: 4, kind: input, shape index: {}]   ;;  %s7533_s5 = inlined_call_operand.hbm [shape: f32[128,512], index: 5, kind: input, shape index: {}]   ;;  %s7534_s6 = inlined_call_operand.vmem [shape: f32[1,512], index: 6, kind: input, shape index: {}]   ;;  %s7535_s7 = inlined_call_operand.vmem [shape: f32[128,1], index: 7, kind: input, shape index: {}]   ;;  %s7536_s8 = inlined_call_operand.<no memory space> [shape: f32[1,1], index: 8, kind: input, shape index: {}]   ;;  %s7537_s9 = inlined_call_operand.vmem [shape: f32[8,1], index: 9, kind: output, shape index: {}]  }
   0x1   :  { %v14_v0 = vstv %s7536_s8 }
   0x2   :  { %15 = vst [vmem:[#allocation5] sm:$0x1] %v14_v0 }
   0x3   :  { %16 = vsyncpa [#allocation7], 0 }
   0x4   :  { %17 = vsyncpa [#allocation9], 0  ;;  %s4927_s11 = smov [#allocation8]   ;;  %s4928_s13 = smov [#allocation6]  }
   0x5   :  { %s41_s12 = sshll.u32 %s4927_s11, 4  ;;  %s27_s14 = sshll.u32 %s4928_s13, 4  ;;  %s42_s12 = int_to_ptr.vmem [resolvable:$true] %s41_s12  ;;  %s28_s14 = int_to_ptr.vmem [resolvable:$true] %s27_s14 }
   0x6   :  { %s4871_s15 = scalar_lea.vmem %s42_s12, 8192  ;;  %p4876_p1 = scmp.lt.s32.totalorder %s42_s12, %s42_s12 }
   0x7   :  { %p4872_p0 = scmp.ne.s32.totalorder %s42_s12, %s4871_s15  ;;  %p4877_p2 = scmp.lt.s32.totalorder %s4871_s15, %s4871_s15 }
   0x9   :  { %p4878_p3 = por %p4877_p2, %p4876_p1 }
   0xb   :  { %p4879_p4 = pnand %p4878_p3, %p4872_p0 }
   0xd   :  { %4882 = shalt.err (!%p4879_p4)
}
   0xe   :  { %s4929_s16 = smov 512   ;;  %s4930_s17 = smov 32  }
   0xf   :  { %47 = dma.hbm_to_vmem [thread:$0]  %s7532_s4, 8192, %s42_s12, [#allocation9], %s4929_s16, %s4929_s16, %s4930_s17  }
  0x10   :  { %s4891_s19 = scalar_lea.vmem %s28_s14, 8192  ;;  %p4896_p6 = scmp.lt.s32.totalorder %s28_s14, %s28_s14 }
  0x11   :  { %p4892_p5 = scmp.ne.s32.totalorder %s28_s14, %s4891_s19  ;;  %p4897_p7 = scmp.lt.s32.totalorder %s4891_s19, %s4891_s19 }
  0x13   :  { %p4898_p8 = por %p4897_p7, %p4896_p6 }
  0x15   :  { %p4899_p9 = pnand %p4898_p8, %p4892_p5 }
  0x17   :  { %4902 = shalt.err (!%p4899_p9)
}
  0x18   :  { %33 = dma.hbm_to_vmem [thread:$0]  %s7530_s2, 8192, %s28_s14, [#allocation7], %s4929_s16, %s4929_s16, %s4930_s17  }
  0x19   :  { %s4931_s22 = smov [#allocation10]  }
  0x1a   :  { %s53_s23 = sshll.u32 %s4931_s22, 4  ;;  %s54_s23 = int_to_ptr.vmem [resolvable:$true] %s53_s23 }
  0x1b   :  { %s4911_s24 = scalar_lea.vmem %s54_s23, 8192  ;;  %p4916_p11 = scmp.lt.s32.totalorder %s54_s23, %s54_s23 }
  0x1c   :  { %p4912_p10 = scmp.ne.s32.totalorder %s54_s23, %s4911_s24  ;;  %p4917_p12 = scmp.lt.s32.totalorder %s4911_s24, %s4911_s24 }
  0x1e   :  { %p4918_p13 = por %p4917_p12, %p4916_p11 }
  0x20   :  { %p4919_p0 = pnand %p4918_p13, %p4912_p10 }
  0x22   :  { %4922 = shalt.err (!%p4919_p0)
}
  0x23   :  { %59 = dma.hbm_to_vmem [thread:$0]  %s7533_s5, 8192, %s54_s23, [#allocation9], %s4929_s16, %s4929_s16, %s4930_s17  }
  0x24   :  { %4923 = dma.done.wait [#allocation7], 8192  }
  0x25   :  { %4924 = vsyncadd [#allocation7], 4294959104 }
  0x26   :  { %4925 = dma.done.wait [#allocation9], 16384  }
  0x27   :  { %4926 = vsyncadd [#allocation9], 4294950912  ;;  %v7538_v1 = vmov 0.0   ;;  %v146_v2 = vld [vmem:[%s7529_s1 + $0x28] sm:$0xff]  ;;  %v148_v3 = vld [vmem:[%s7529_s1 + $0x38] sm:$0xff]  ;;  %vm171_vm0 = vcmask 130048  }
  0x28   :  { %260 = vmatprep.mubr.f32.mxu0 %v7538_v1  ;;  %373 = vmatprep.mubr.f32.mxu1 %v7538_v1  ;;  %v145_v4 = vld [vmem:[%s7529_s1 + $0x20] sm:$0xff]  ;;  %v147_v5 = vld [vmem:[%s7529_s1 + $0x30] sm:$0xff]  ;;  %v142_v6 = vld [vmem:[%s7529_s1 + $0x8] sm:$0xff]  ;;  %vm697_vm5 = vcmask 523264   ;;  %vm4934_vm6 = vmmov 0   ;;  %vm4410_vm7 = vcmask 7168  }
  0x29   :  { %224 = vmatprep.subr.mxu0 %v146_v2  ;;  %337 = vmatprep.subr.mxu1 %v148_v3  ;;  %v144_v7 = vld [vmem:[%s7529_s1 + $0x18] sm:$0xff]  ;;  %v141_v8 = vld [vmem:[%s7529_s1] sm:$0xff]  ;;  %v143_v9 = vld [vmem:[%s7529_s1 + $0x10] sm:$0xff] }
  0x2a   :  { %225 = vmatpush1.msra.mxu0 %v145_v4  ;;  %338 = vmatpush1.msra.mxu1 %v147_v5  ;;  %v133_v10 = vld [vmem:[%s7528_s0] sm:$0xff]  ;;  %v5026_v11 = vld [vmem:[#allocation6 + $0x1e8] sm:$0xff]  ;;  %v5032_v14 = vld [vmem:[#allocation6 + $0x1f0] sm:$0xff] }
  0x2b   :  { %226 = vmatprep.subr.mxu0 %v142_v6  ;;  %339 = vmatprep.subr.mxu1 %v144_v7  ;;  %v5028_v12 = vld [vmem:[#allocation6 + $0x1f8] sm:$0xff]  ;;  %v5030_v13 = vld [vmem:[#allocation6 + $0x1e0] sm:$0xff]  ;;  %v5036_v15 = vld [vmem:[#allocation6 + $0x1c8] sm:$0xff] }
  0x2c   :  { %227 = vmatpush1.msra.mxu0 %v141_v8  ;;  %340 = vmatpush1.msra.mxu1 %v143_v9  ;;  %v5038_v16 = vld [vmem:[#allocation6 + $0x1d8] sm:$0xff]  ;;  %v5044_v17 = vld [vmem:[#allocation6 + $0x1c0] sm:$0xff]  ;;  %v5046_v18 = vld [vmem:[#allocation6 + $0x1d0] sm:$0xff] }
  0x2d   :  { %4418 = vmatmul.mubr.msk.f32.vlgmr.msra.gmra.mxu0 %vm171_vm0, %v133_v10  ;;  %4426 = vmatmul.mubr.msk.f32.vlgmr.msra.gmra.mxu1 %vm171_vm0, %v133_v10  ;;  %v134_v19 = vld [vmem:[%s7528_s0 + $0x8] sm:$0xff]  ;;  %v5057_v21 = vld [vmem:[#allocation6 + $0x1b8] sm:$0xff]  ;;  %v5063_v23 = vld [vmem:[#allocation6 + $0x1b0] sm:$0xff] }
  0x2e   :  { %531 = vmatprep.subr.mxu0 %v5026_v11  ;;  %602 = vmatprep.subr.mxu1 %v5028_v12  ;;  %v5055_v20 = vld [vmem:[#allocation6 + $0x1a8] sm:$0xff]  ;;  %v5061_v22 = vld [vmem:[#allocation6 + $0x1a0] sm:$0xff]  ;;  %v5069_v25 = vld [vmem:[#allocation6 + $0x198] sm:$0xff] }
  0x2f   :  { %532 = vmatpush1.msra.mxu0 %v5030_v13  ;;  %603 = vmatpush1.msra.mxu1 %v5032_v14  ;;  %v5067_v24 = vld [vmem:[#allocation6 + $0x188] sm:$0xff]  ;;  %v5075_v26 = vld [vmem:[#allocation6 + $0x180] sm:$0xff]  ;;  %v5077_v27 = vld [vmem:[#allocation6 + $0x190] sm:$0xff] }
  0x30   :  { %533 = vmatprep.subr.mxu0 %v5036_v15  ;;  %604 = vmatprep.subr.mxu1 %v5038_v16  ;;  %v135_v28 = vld [vmem:[%s7528_s0 + $0x10] sm:$0xff]  ;;  %v5088_v30 = vld [vmem:[#allocation6 + $0x178] sm:$0xff]  ;;  %v5092_v31 = vld [vmem:[#allocation6 + $0x160] sm:$0xff] }
  0x31   :  { %266 = vmatprep.mubr.f32.mxu0 %v7538_v1  ;;  %379 = vmatprep.mubr.f32.mxu1 %v7538_v1  ;;  %v5086_v29 = vld [vmem:[#allocation6 + $0x168] sm:$0xff]  ;;  %v5094_v32 = vld [vmem:[#allocation6 + $0x170] sm:$0xff]  ;;  %v5100_v34 = vld [vmem:[#allocation6 + $0x158] sm:$0xff] }
  0x32   :  { %534 = vmatpush1.msra.mxu0 %v5044_v17  ;;  %605 = vmatpush1.msra.mxu1 %v5046_v18  ;;  %v5098_v33 = vld [vmem:[#allocation6 + $0x148] sm:$0xff]  ;;  %v5106_v35 = vld [vmem:[#allocation6 + $0x140] sm:$0xff]  ;;  %v5108_v36 = vld [vmem:[#allocation6 + $0x150] sm:$0xff] }
  0x33   :  { %4419 = vmatmul.mubr.msk.f32.gmra.mxu0 %vm171_vm0, %v134_v19  ;;  %4427 = vmatmul.mubr.msk.f32.gmra.mxu1 %vm171_vm0, %v134_v19  ;;  %v136_v37 = vld [vmem:[%s7528_s0 + $0x18] sm:$0xff]  ;;  %v5117_v38 = vld [vmem:[#allocation6 + $0x128] sm:$0xff]  ;;  %v5123_v40 = vld [vmem:[#allocation6 + $0x120] sm:$0xff] }
  0x34   :  { %535 = vmatprep.subr.mxu0 %v5055_v20  ;;  %606 = vmatprep.subr.mxu1 %v5057_v21  ;;  %v5119_v39 = vld [vmem:[#allocation6 + $0x138] sm:$0xff]  ;;  %v5125_v41 = vld [vmem:[#allocation6 + $0x130] sm:$0xff]  ;;  %v5129_v42 = vld [vmem:[#allocation6 + $0x108] sm:$0xff] }
  0x35   :  { %536 = vmatpush1.msra.mxu0 %v5061_v22  ;;  %607 = vmatpush1.msra.mxu1 %v5063_v23  ;;  %v5131_v43 = vld [vmem:[#allocation6 + $0x118] sm:$0xff]  ;;  %v5137_v44 = vld [vmem:[#allocation6 + $0x100] sm:$0xff]  ;;  %v5139_v45 = vld [vmem:[#allocation6 + $0x110] sm:$0xff] }
  0x36   :  { %537 = vmatprep.subr.mxu0 %v5067_v24  ;;  %608 = vmatprep.subr.mxu1 %v5069_v25  ;;  %v137_v46 = vld [vmem:[%s7528_s0 + $0x20] sm:$0xff]  ;;  %v5148_v47 = vld [vmem:[#allocation6 + $0xe8] sm:$0xff]  ;;  %v5156_v50 = vld [vmem:[#allocation6 + $0xf0] sm:$0xff] }
  0x37   :  { %272 = vmatprep.mubr.f32.mxu0 %v7538_v1  ;;  %385 = vmatprep.mubr.f32.mxu1 %v7538_v1  ;;  %7836 = vst [vmem:[#allocation13_spill] sm:$0xff] %v5148_v47  ;;  %v5150_v48 = vld [vmem:[#allocation6 + $0xf8] sm:$0xff]  ;;  %v5154_v49 = vld [vmem:[#allocation6 + $0xe0] sm:$0xff]  ;;  %7839 = vst [vmem:[#allocation16_spill] sm:$0xff] %v5156_v50 }
  0x38   :  { %538 = vmatpush1.msra.mxu0 %v5075_v26  ;;  %609 = vmatpush1.msra.mxu1 %v5077_v27  ;;  %7837 = vst [vmem:[#allocation14_spill] sm:$0xff] %v5150_v48  ;;  %7838 = vst [vmem:[#allocation15_spill] sm:$0xff] %v5154_v49  ;;  %v5160_v51 = vld [vmem:[#allocation6 + $0xc8] sm:$0xff]  ;;  %v5162_v52 = vld [vmem:[#allocation6 + $0xd8] sm:$0xff] }
  0x39   :  { %4420 = vmatmul.mubr.msk.f32.gmra.mxu0 %vm171_vm0, %v135_v28  ;;  %4428 = vmatmul.mubr.msk.f32.gmra.mxu1 %vm171_vm0, %v135_v28  ;;  %7840 = vst [vmem:[#allocation17_spill] sm:$0xff] %v5160_v51  ;;  %7841 = vst [vmem:[#allocation18_spill] sm:$0xff] %v5162_v52  ;;  %v5168_v53 = vld [vmem:[#allocation6 + $0xc0] sm:$0xff]  ;;  %v5170_v54 = vld [vmem:[#allocation6 + $0xd0] sm:$0xff] }
  0x3a   :  { %539 = vmatprep.subr.mxu0 %v5086_v29  ;;  %610 = vmatprep.subr.mxu1 %v5088_v30  ;;  %7842 = vst [vmem:[#allocation19_spill] sm:$0xff] %v5168_v53  ;;  %7843 = vst [vmem:[#allocation20_spill] sm:$0xff] %v5170_v54  ;;  %v138_v55 = vld [vmem:[%s7528_s0 + $0x28] sm:$0xff]  ;;  %v5181_v57 = vld [vmem:[#allocation6 + $0xb8] sm:$0xff] }
  0x3b   :  { %540 = vmatpush1.msra.mxu0 %v5092_v31  ;;  %611 = vmatpush1.msra.mxu1 %v5094_v32  ;;  %v5179_v56 = vld [vmem:[#allocation6 + $0xa8] sm:$0xff]  ;;  %7845 = vst [vmem:[#allocation22_spill] sm:$0xff] %v5181_v57  ;;  %v5185_v58 = vld [vmem:[#allocation6 + $0xa0] sm:$0xff]  ;;  %v5187_v59 = vld [vmem:[#allocation6 + $0xb0] sm:$0xff] }
  0x3c   :  { %541 = vmatprep.subr.mxu0 %v5098_v33  ;;  %612 = vmatprep.subr.mxu1 %v5100_v34  ;;  %7844 = vst [vmem:[#allocation21_spill] sm:$0xff] %v5179_v56  ;;  %7846 = vst [vmem:[#allocation23_spill] sm:$0xff] %v5185_v58  ;;  %v5191_v60 = vld [vmem:[#allocation6 + $0x88] sm:$0xff]  ;;  %v5193_v61 = vld [vmem:[#allocation6 + $0x98] sm:$0xff] }
  0x3d   :  { %278 = vmatprep.mubr.f32.mxu0 %v7538_v1  ;;  %391 = vmatprep.mubr.f32.mxu1 %v7538_v1  ;;  %7847 = vst [vmem:[#allocation24_spill] sm:$0xff] %v5187_v59  ;;  %7848 = vst [vmem:[#allocation25_spill] sm:$0xff] %v5191_v60  ;;  %v5199_v62 = vld [vmem:[#allocation6 + $0x80] sm:$0xff]  ;;  %v5201_v63 = vld [vmem:[#allocation6 + $0x90] sm:$0xff] }
  0x3e   :  { %542 = vmatpush1.msra.mxu0 %v5106_v35  ;;  %613 = vmatpush1.msra.mxu1 %v5108_v36  ;;  %7849 = vst [vmem:[#allocation26_spill] sm:$0xff] %v5193_v61  ;;  %7850 = vst [vmem:[#allocation27_spill] sm:$0xff] %v5199_v62  ;;  %v139_v0 = vld [vmem:[%s7528_s0 + $0x30] sm:$0xff]  ;;  %v5212_v3 = vld [vmem:[#allocation6 + $0x78] sm:$0xff] }
  0x3f   :  { %4421 = vmatmul.mubr.msk.f32.gmra.mxu0 %vm171_vm0, %v136_v37  ;;  %4429 = vmatmul.mubr.msk.f32.gmra.mxu1 %vm171_vm0, %v136_v37  ;;  %7851 = vst [vmem:[#allocation28_spill] sm:$0xff] %v5201_v63  ;;  %v5210_v2 = vld [vmem:[#allocation6 + $0x68] sm:$0xff]  ;;  %7853 = vst [vmem:[#allocation30_spill] sm:$0xff] %v5212_v3  ;;  %v5216_v4 = vld [vmem:[#allocation6 + $0x60] sm:$0xff] }
  0x40   :  { %543 = vmatprep.subr.mxu0 %v5117_v38  ;;  %614 = vmatprep.subr.mxu1 %v5119_v39  ;;  %7852 = vst [vmem:[#allocation29_spill] sm:$0xff] %v5210_v2  ;;  %7854 = vst [vmem:[#allocation31_spill] sm:$0xff] %v5216_v4  ;;  %v5218_v5 = vld [vmem:[#allocation6 + $0x70] sm:$0xff]  ;;  %v5222_v6 = vld [vmem:[#allocation6 + $0x48] sm:$0xff] }
  0x41   :  { %544 = vmatpush1.msra.mxu0 %v5123_v40  ;;  %615 = vmatpush1.msra.mxu1 %v5125_v41  ;;  %7855 = vst [vmem:[#allocation32_spill] sm:$0xff] %v5218_v5  ;;  %7856 = vst [vmem:[#allocation33_spill] sm:$0xff] %v5222_v6  ;;  %v5224_v7 = vld [vmem:[#allocation6 + $0x58] sm:$0xff]  ;;  %v5230_v8 = vld [vmem:[#allocation6 + $0x40] sm:$0xff] }
  0x42   :  { %545 = vmatprep.subr.mxu0 %v5129_v42  ;;  %616 = vmatprep.subr.mxu1 %v5131_v43  ;;  %7857 = vst [vmem:[#allocation34_spill] sm:$0xff] %v5224_v7  ;;  %7858 = vst [vmem:[#allocation35_spill] sm:$0xff] %v5230_v8  ;;  %v5232_v9 = vld [vmem:[#allocation6 + $0x50] sm:$0xff]  ;;  %v5241_v19 = vld [vmem:[#allocation6 + $0x28] sm:$0xff] }
  0x43   :  { %284 = vmatprep.mubr.f32.mxu0 %v7538_v1  ;;  %397 = vmatprep.mubr.f32.mxu1 %v7538_v1  ;;  %7859 = vst [vmem:[#allocation36_spill] sm:$0xff] %v5232_v9  ;;  %v140_v10 = vld [vmem:[%s7528_s0 + $0x38] sm:$0xff]  ;;  %7860 = vst [vmem:[#allocation37_spill] sm:$0xff] %v5241_v19  ;;  %v5247_v37 = vld [vmem:[#allocation6 + $0x20] sm:$0xff] }
  0x44   :  { %546 = vmatpush1.msra.mxu0 %v5137_v44  ;;  %617 = vmatpush1.msra.mxu1 %v5139_v45  ;;  %v5243_v28 = vld [vmem:[#allocation6 + $0x38] sm:$0xff]  ;;  %7862 = vst [vmem:[#allocation39_spill] sm:$0xff] %v5247_v37 }
  0x45   :  { %4422 = vmatmul.mubr.msk.f32.gmra.mxu0 %vm171_vm0, %v137_v46  ;;  %4430 = vmatmul.mubr.msk.f32.gmra.mxu1 %vm171_vm0, %v137_v46  ;;  %7861 = vst [vmem:[#allocation38_spill] sm:$0xff] %v5243_v28  ;;  %v5249_v46 = vld [vmem:[#allocation6 + $0x30] sm:$0xff] }
  0x46   :  { %547 = vmatprep.subr.mxu0 %v5148_v47  ;;  %618 = vmatprep.subr.mxu1 %v5150_v48  ;;  %7863 = vst [vmem:[#allocation40_spill] sm:$0xff] %v5249_v46 }
  0x47   :  { %548 = vmatpush1.msra.mxu0 %v5154_v49  ;;  %619 = vmatpush1.msra.mxu1 %v5156_v50 }
  0x48   :  { %549 = vmatprep.subr.mxu0 %v5160_v51  ;;  %620 = vmatprep.subr.mxu1 %v5162_v52 }
  0x49   :  { %290 = vmatprep.mubr.f32.mxu0 %v7538_v1  ;;  %403 = vmatprep.mubr.f32.mxu1 %v7538_v1 }
  0x4a   :  { %550 = vmatpush1.msra.mxu0 %v5168_v53  ;;  %621 = vmatpush1.msra.mxu1 %v5170_v54 }
  0x4b   :  { %4423 = vmatmul.mubr.msk.f32.gmra.mxu0 %vm171_vm0, %v138_v55  ;;  %4431 = vmatmul.mubr.msk.f32.gmra.mxu1 %vm171_vm0, %v138_v55  ;;  %v5253_v55 = vld [vmem:[#allocation6 + $0x8] sm:$0xff] }
  0x4c   :  { %551 = vmatprep.subr.mxu0 %v5179_v56  ;;  %622 = vmatprep.subr.mxu1 %v5181_v57  ;;  %7864 = vst [vmem:[#allocation41_spill] sm:$0xff] %v5253_v55 }
  0x4d   :  { %552 = vmatpush1.msra.mxu0 %v5185_v58  ;;  %623 = vmatpush1.msra.mxu1 %v5187_v59 }
  0x4e   :  { %553 = vmatprep.subr.mxu0 %v5191_v60  ;;  %624 = vmatprep.subr.mxu1 %v5193_v61 }
  0x4f   :  { %296 = vmatprep.mubr.f32.mxu0 %v7538_v1  ;;  %409 = vmatprep.mubr.f32.mxu1 %v7538_v1 }
  0x50   :  { %554 = vmatpush1.msra.mxu0 %v5199_v62  ;;  %625 = vmatpush1.msra.mxu1 %v5201_v63 }
  0x51   :  { %4424 = vmatmul.mubr.msk.f32.gmra.mxu0 %vm171_vm0, %v139_v0  ;;  %4432 = vmatmul.mubr.msk.f32.gmra.mxu1 %vm171_vm0, %v139_v0  ;;  %v5255_v0 = vld [vmem:[#allocation6 + $0x18] sm:$0xff] }
  0x52   :  { %555 = vmatprep.subr.mxu0 %v5210_v2  ;;  %626 = vmatprep.subr.mxu1 %v5212_v3  ;;  %7865 = vst [vmem:[#allocation42_spill] sm:$0xff] %v5255_v0 }
  0x53   :  { %556 = vmatpush1.msra.mxu0 %v5216_v4  ;;  %627 = vmatpush1.msra.mxu1 %v5218_v5 }
  0x54   :  { %557 = vmatprep.subr.mxu0 %v5222_v6  ;;  %628 = vmatprep.subr.mxu1 %v5224_v7 }
  0x55   :  { %302 = vmatprep.mubr.f32.mxu0 %v7538_v1  ;;  %415 = vmatprep.mubr.f32.mxu1 %v7538_v1  ;;  %v5259_v1 = vld [vmem:[#allocation6] sm:$0xff] }
  0x56   :  { %558 = vmatpush1.msra.mxu0 %v5230_v8  ;;  %629 = vmatpush1.msra.mxu1 %v5232_v9  ;;  %7866 = vst [vmem:[#allocation43_spill] sm:$0xff] %v5259_v1  ;;  %v5263_v9 = vld [vmem:[#allocation6 + $0x10] sm:$0xff] }
  0x57   :  { %4425 = vmatmul.mubr.msk.f32.gmra.mxu0 %vm171_vm0, %v140_v10  ;;  %4433 = vmatmul.mubr.msk.f32.gmra.mxu1 %vm171_vm0, %v140_v10  ;;  %7867 = vst [vmem:[#allocation44_spill] sm:$0xff] %v5263_v9  ;;  %v7868_v10 = vmov 0.0  }
  0x58   :  { %559 = vmatprep.subr.mxu0 %v5241_v19  ;;  %630 = vmatprep.subr.mxu1 %v5243_v28 }
  0x59   :  { %560 = vmatpush1.msra.mxu0 %v5247_v37  ;;  %631 = vmatpush1.msra.mxu1 %v5249_v46 }
  0x5a   :  { %561 = vmatprep.subr.mxu0 %v5253_v55  ;;  %632 = vmatprep.subr.mxu1 %v5255_v0 }
  0x5b   :  { %562 = vmatpush1.msra.mxu0 %v5259_v1  ;;  %595 = vmatprep.mubr.f32.mxu0 %v7868_v10 }
  0x5c   :  { %633 = vmatpush1.msra.mxu1 %v5263_v9  ;;  %666 = vmatprep.mubr.f32.mxu1 %v7868_v10 }
  0x5d   :  { %596 = vmatmul.mubr.f32.vlgmr.msra.gmra.mxu0 %v7868_v10  ;;  %667 = vmatmul.mubr.f32.vlgmr.msra.gmra.mxu1 %v7868_v10 }
  0x5e   :  { %783 = vmatprep.subr.mxu0 %v5026_v11  ;;  %854 = vmatprep.subr.mxu1 %v5028_v12 }
  0x5f   :  { %784 = vmatpush1.msra.mxu0 %v5030_v13  ;;  %855 = vmatpush1.msra.mxu1 %v5032_v14 }
  0x60   :  { %785 = vmatprep.subr.mxu0 %v5036_v15  ;;  %856 = vmatprep.subr.mxu1 %v5038_v16 }
  0x61   :  { %786 = vmatpush1.msra.mxu0 %v5044_v17  ;;  %857 = vmatpush1.msra.mxu1 %v5046_v18 }
  0x62   :  { %787 = vmatprep.subr.mxu0 %v5055_v20  ;;  %858 = vmatprep.subr.mxu1 %v5057_v21 }
  0x63   :  { %788 = vmatpush1.msra.mxu0 %v5061_v22  ;;  %859 = vmatpush1.msra.mxu1 %v5063_v23 }
  0x64   :  { %789 = vmatprep.subr.mxu0 %v5067_v24  ;;  %860 = vmatprep.subr.mxu1 %v5069_v25 }
  0x65   :  { %790 = vmatpush1.msra.mxu0 %v5075_v26  ;;  %861 = vmatpush1.msra.mxu1 %v5077_v27 }
  0x66   :  { %791 = vmatprep.subr.mxu0 %v5086_v29  ;;  %862 = vmatprep.subr.mxu1 %v5088_v30 }
  0x67   :  { %792 = vmatpush1.msra.mxu0 %v5092_v31  ;;  %863 = vmatpush1.msra.mxu1 %v5094_v32 }
  0x68   :  { %793 = vmatprep.subr.mxu0 %v5098_v33  ;;  %864 = vmatprep.subr.mxu1 %v5100_v34 }
  0x69   :  { %794 = vmatpush1.msra.mxu0 %v5106_v35  ;;  %865 = vmatpush1.msra.mxu1 %v5108_v36 }
  0x6a   :  { %795 = vmatprep.subr.mxu0 %v5117_v38  ;;  %866 = vmatprep.subr.mxu1 %v5119_v39 }
  0x6b   :  { %796 = vmatpush1.msra.mxu0 %v5123_v40  ;;  %867 = vmatpush1.msra.mxu1 %v5125_v41 }
  0x6c   :  { %797 = vmatprep.subr.mxu0 %v5129_v42  ;;  %868 = vmatprep.subr.mxu1 %v5131_v43 }
  0x6d   :  { %798 = vmatpush1.msra.mxu0 %v5137_v44  ;;  %869 = vmatpush1.msra.mxu1 %v5139_v45 }
  0x6e   :  { %799 = vmatprep.subr.mxu0 %v5148_v47  ;;  %870 = vmatprep.subr.mxu1 %v5150_v48  ;;  %v7882_v47 = vmov 0 }
  0x6f   :  { %800 = vmatpush1.msra.mxu0 %v5154_v49  ;;  %871 = vmatpush1.msra.mxu1 %v5156_v50 }
  0x70   :  { %801 = vmatprep.subr.mxu0 %v5160_v51  ;;  %872 = vmatprep.subr.mxu1 %v5162_v52 }
  0x71   :  { %802 = vmatpush1.msra.mxu0 %v5168_v53  ;;  %873 = vmatpush1.msra.mxu1 %v5170_v54 }
  0x72   :  { %803 = vmatprep.subr.mxu0 %v5179_v56  ;;  %874 = vmatprep.subr.mxu1 %v5181_v57 }
  0x73   :  { %804 = vmatpush1.msra.mxu0 %v5185_v58  ;;  %875 = vmatpush1.msra.mxu1 %v5187_v59 }
  0x74   :  { %805 = vmatprep.subr.mxu0 %v5191_v60  ;;  %876 = vmatprep.subr.mxu1 %v5193_v61  ;;  %v7869_v60 = vld [vmem:[#allocation36_spill] sm:$0xff] }
  0x75   :  { %806 = vmatpush1.msra.mxu0 %v5199_v62  ;;  %877 = vmatpush1.msra.mxu1 %v5201_v63 }
  0x76   :  { %807 = vmatprep.subr.mxu0 %v5210_v2  ;;  %878 = vmatprep.subr.mxu1 %v5212_v3 }
  0x77   :  { %808 = vmatpush1.msra.mxu0 %v5216_v4  ;;  %879 = vmatpush1.msra.mxu1 %v5218_v5 }
  0x78   :  { %809 = vmatprep.subr.mxu0 %v5222_v6  ;;  %880 = vmatprep.subr.mxu1 %v5224_v7 }
  0x79   :  { %810 = vmatpush1.msra.mxu0 %v5230_v8  ;;  %881 = vmatpush1.msra.mxu1 %v7869_v60 }
  0x7a   :  { %811 = vmatprep.subr.mxu0 %v5241_v19  ;;  %882 = vmatprep.subr.mxu1 %v5243_v28  ;;  %v75_v28 = vlaneseq }
  0x7b   :  { %812 = vmatpush1.msra.mxu0 %v5247_v37  ;;  %883 = vmatpush1.msra.mxu1 %v5249_v46 }
  0x7c   :  { %813 = vmatprep.subr.mxu0 %v5253_v55  ;;  %884 = vmatprep.subr.mxu1 %v5255_v0  ;;  %v5341_v37 = vshrl.u32 %v75_v28, 7 }
  0x7d   :  { %814 = vmatpush1.msra.mxu0 %v5259_v1  ;;  %847 = vmatprep.mubr.f32.mxu0 %v7868_v10 }
  0x7e   :  { %885 = vmatpush1.msra.mxu1 %v5263_v9  ;;  %918 = vmatprep.mubr.f32.mxu1 %v7868_v10  ;;  %7870 = vst [vmem:[#allocation45_spill] sm:$0xff] %v5341_v37  ;;  %v7558_v0 = vsub.s32 0, %v5341_v37  ;;  %v7561_v1 = vsub.s32 2, %v5341_v37  ;;  %v149_v9 = vld [vmem:[%s7531_s3] sm:$0xf]  ;;  %v7567_v19 = vsub.s32 3, %v5341_v37 }
  0x7f   :  { %1035 = vmatprep.subr.mxu0 %v5026_v11  ;;  %1106 = vmatprep.subr.mxu1 %v5028_v12  ;;  %v7563_v12 = vsub.s32 1, %v5341_v37  ;;  %s4933_s3 = smov 64  }
  0x80   :  { %v5360_v60 = vrot.slane %v149_v9, %v7558_v0  ;;  %v5364_v8 = vrot.slane %v149_v9, %v7561_v1  ;;  %v5372_v4 = vrot.slane %v149_v9, %v7567_v19 }
  0x81   :  { %v5368_v5 = vrot.slane %v149_v9, %v7563_v12 }
  0xed   :  { %v5343_v46 = vpop.f32.mrf.mxu0  ;;  %v5345_v55 = vpop.f32.mrf.mxu1 }
  0xef   :  { %v5352_v10 = vpop.f32.mrf.mxu0  ;;  %v5354_v11 = vpop.f32.mrf.mxu1 }
  0xf3   :  { %v268_v7 = vpop.f32.mrf.mxu0  ;;  %v381_v6 = vpop.f32.mrf.mxu1 }
  0xf4   :  { %v5375_v3 = vadd.f32 %v268_v7, %v5360_v60  ;;  %v5378_v0 = vadd.f32 %v381_v6, %v5364_v8  ;;  %v5390_v7 = vand.u32 127, %v75_v28 }
  0xf5   :  { %v270_v2 = vpop.f32.mrf.mxu0  ;;  %v383_v63 = vpop.f32.mrf.mxu1 }
  0xf6   :  { %7871 = vst [vmem:[#allocation46_spill] sm:$0xff] %v5378_v0  ;;  %v5381_v1 = vadd.f32 %v270_v2, %v5368_v5  ;;  %v5384_v62 = vadd.f32 %v383_v63, %v5372_v4  ;;  %7875 = vst [vmem:[#allocation50_spill] sm:$0xff] %v5390_v7  ;;  %v77_v63 = vadd.s32 128, %v5390_v7  ;;  %v78_v58 = vadd.s32 256, %v5390_v7 }
  0xf7   :  { %v79_v28 = vadd.s32 384, %v5390_v7  ;;  %vm128_vm1 = vcmp.lt.s32.totalorder %v5390_v7, 64 }
  0xf8   :  { %7872 = vst [vmem:[#allocation47_spill] sm:$0xff] %v5381_v1  ;;  %7873 = vst [vmem:[#allocation48_spill] sm:$0xff] %v5384_v62  ;;  %v91_v52 = vand.u32 127, %v77_v63  ;;  %v98_v51 = vand.u32 127, %v78_v58 }
  0xf9   :  { %v274_v12 = vpop.f32.mrf.mxu0  ;;  %v387_v61 = vpop.f32.mrf.mxu1  ;;  %v105_v50 = vand.u32 127, %v79_v28 }
  0xfa   :  { %v275_v37 = vadd.f32 %v274_v12, %v5360_v60  ;;  %v5388_v9 = vadd.f32 %v387_v61, %v5364_v8  ;;  %vm5416_vm2 = vcmp.lt.s32.totalorder %v91_v52, 64  ;;  %vm5420_vm3 = vcmp.lt.s32.totalorder %v98_v51, 64 }
  0xfb   :  { %v276_v19 = vpop.f32.mrf.mxu0  ;;  %v389_v6 = vpop.f32.mrf.mxu1  ;;  %v7883_v47 = vsel %vm5416_vm2, 4294967295, %v7882_v47  ;;  %vm5438_vm4 = vcmp.lt.s32.totalorder %v105_v50, 64  ;;  %v7891_v52 = vmov 0 }
  0xfc   :  { %7874 = vst [vmem:[#allocation49_spill] sm:$0xff] %v5388_v9  ;;  %v5393_v59 = vadd.f32 %v276_v19, %v5368_v5  ;;  %v5396_v2 = vadd.f32 %v389_v6, %v5372_v4  ;;  %7884 = vst [vmem:[#allocation57_spill] sm:$0xff] %v7883_v47  ;;  %v7892_v52 = vsel %vm5438_vm4, 4294967295, %v7891_v52  ;;  %v5564_v9 = vadd.f32 %v5352_v10, %v5368_v5 }
  0xfd   :  { %7893 = vst [vmem:[#allocation62_spill] sm:$0xff] %v7892_v52 }
  0xfe   :  { %7876 = vst [vmem:[#allocation51_spill] sm:$0xff] %v5393_v59  ;;  %7877 = vst [vmem:[#allocation52_spill] sm:$0xff] %v5396_v2 }
  0xff   :  { %v280_v57 = vpop.f32.mrf.mxu0  ;;  %v393_v56 = vpop.f32.mrf.mxu1  ;;  %7905 = vst [vmem:[#allocation74_spill] sm:$0xff] %v5564_v9 }
 0x100   :  { %v281_v12 = vadd.f32 %v280_v57, %v5360_v60  ;;  %v5402_v61 = vadd.f32 %v393_v56, %v5364_v8 }
 0x101   :  { %v282_v54 = vpop.f32.mrf.mxu0  ;;  %v395_v53 = vpop.f32.mrf.mxu1 }
 0x102   :  { %7878 = vst [vmem:[#allocation53_spill] sm:$0xff] %v5402_v61  ;;  %v5406_v19 = vadd.f32 %v282_v54, %v5368_v5  ;;  %v5409_v6 = vadd.f32 %v395_v53, %v5372_v4  ;;  %v7885_v54 = vmov 0 }
 0x103   :  { %v7886_v54 = vsel %vm5420_vm3, 4294967295, %v7885_v54 }
 0x104   :  { %7879 = vst [vmem:[#allocation54_spill] sm:$0xff] %v5406_v19  ;;  %7880 = vst [vmem:[#allocation55_spill] sm:$0xff] %v5409_v6  ;;  %v5560_v19 = vadd.f32 %v5345_v55, %v5364_v8 }
 0x105   :  { %v286_v49 = vpop.f32.mrf.mxu0  ;;  %v399_v57 = vpop.f32.mrf.mxu1  ;;  %7887 = vst [vmem:[#allocation58_spill] sm:$0xff] %v7886_v54 }
 0x106   :  { %v287_v56 = vadd.f32 %v286_v49, %v5360_v60  ;;  %v5414_v48 = vadd.f32 %v399_v57, %v5364_v8  ;;  %7904 = vst [vmem:[#allocation73_spill] sm:$0xff] %v5560_v19 }
 0x107   :  { %v288_v53 = vpop.f32.mrf.mxu0  ;;  %v401_v58 = vpop.f32.mrf.mxu1 }
 0x108   :  { %7881 = vst [vmem:[#allocation56_spill] sm:$0xff] %v5414_v48  ;;  %v5425_v63 = vadd.f32 %v288_v53, %v5368_v5  ;;  %v5428_v28 = vadd.f32 %v401_v58, %v5372_v4  ;;  %v5432_v49 = vsel %vm128_vm1, %v281_v12, %v287_v56  ;;  %v5444_v57 = vsel %vm128_vm1, %v287_v56, %v281_v12 }
 0x109   :  { %7890 = vst [vmem:[#allocation61_spill] sm:$0xff] %v5432_v49  ;;  %7894 = vst [vmem:[#allocation63_spill] sm:$0xff] %v5444_v57 }
 0x10a   :  { %7888 = vst [vmem:[#allocation59_spill] sm:$0xff] %v5425_v63  ;;  %7889 = vst [vmem:[#allocation60_spill] sm:$0xff] %v5428_v28 }
 0x10b   :  { %v292_v53 = vpop.f32.mrf.mxu0  ;;  %v405_v51 = vpop.f32.mrf.mxu1 }
 0x10c   :  { %v293_v57 = vadd.f32 %v292_v53, %v5360_v60  ;;  %v5468_v58 = vadd.f32 %v405_v51, %v5364_v8 }
 0x10d   :  { %v294_v48 = vpop.f32.mrf.mxu0  ;;  %v407_v61 = vpop.f32.mrf.mxu1 }
 0x10e   :  { %7895 = vst [vmem:[#allocation64_spill] sm:$0xff] %v5468_v58  ;;  %v5471_v50 = vadd.f32 %v294_v48, %v5368_v5  ;;  %v5474_v49 = vadd.f32 %v407_v61, %v5372_v4  ;;  %v5478_v12 = vsel %vm128_vm1, %v275_v37, %v293_v57  ;;  %v5486_v51 = vsel %vm128_vm1, %v293_v57, %v275_v37 }
 0x10f   :  { %7898 = vst [vmem:[#allocation67_spill] sm:$0xff] %v5486_v51  ;;  %v263_v57 = vadd.f32 %v5343_v46, %v5360_v60 }
 0x110   :  { %7896 = vst [vmem:[#allocation65_spill] sm:$0xff] %v5471_v50  ;;  %7897 = vst [vmem:[#allocation66_spill] sm:$0xff] %v5474_v49 }
 0x111   :  { %v298_v48 = vpop.f32.mrf.mxu0  ;;  %v411_v53 = vpop.f32.mrf.mxu1 }
 0x112   :  { %v299_v51 = vadd.f32 %v298_v48, %v5360_v60  ;;  %v5510_v61 = vadd.f32 %v411_v53, %v5364_v8 }
 0x113   :  { %v300_v28 = vpop.f32.mrf.mxu0  ;;  %v413_v6 = vpop.f32.mrf.mxu1 }
 0x114   :  { %7899 = vst [vmem:[#allocation68_spill] sm:$0xff] %v5510_v61  ;;  %v5513_v56 = vadd.f32 %v300_v28, %v5368_v5  ;;  %v5516_v63 = vadd.f32 %v413_v6, %v5372_v4  ;;  %v5521_v37 = vsel %vm128_vm1, %v5375_v3, %v299_v51  ;;  %v5530_v53 = vsel %vm128_vm1, %v299_v51, %v5375_v3 }
 0x115   :  { %7902 = vst [vmem:[#allocation71_spill] sm:$0xff] %v5530_v53  ;;  %v5568_v51 = vadd.f32 %v5354_v11, %v5372_v4 }
 0x116   :  { %7900 = vst [vmem:[#allocation69_spill] sm:$0xff] %v5513_v56  ;;  %7901 = vst [vmem:[#allocation70_spill] sm:$0xff] %v5516_v63 }
 0x117   :  { %v304_v6 = vpop.f32.mrf.mxu0  ;;  %v417_v48 = vpop.f32.mrf.mxu1  ;;  %7906 = vst [vmem:[#allocation75_spill] sm:$0xff] %v5568_v51 }
 0x118   :  { %v305_v53 = vadd.f32 %v304_v6, %v5360_v60  ;;  %v5554_v28 = vadd.f32 %v417_v48, %v5364_v8 }
 0x119   :  { %v306_v3 = vpop.f32.mrf.mxu0  ;;  %v419_v58 = vpop.f32.mrf.mxu1 }
 0x11a   :  { %7903 = vst [vmem:[#allocation72_spill] sm:$0xff] %v5554_v28  ;;  %v5571_v48 = vadd.f32 %v306_v3, %v5368_v5  ;;  %v5574_v6 = vadd.f32 %v419_v58, %v5372_v4  ;;  %v463_v60 = vsel %vm128_vm1, %v263_v57, %v305_v53  ;;  %v5580_v8 = vsel %vm128_vm1, %v305_v53, %v263_v57 }
 0x11b   :  { %7909 = vst [vmem:[#allocation78_spill] sm:$0xff] %v5580_v8 }
 0x11c   :  { %7907 = vst [vmem:[#allocation76_spill] sm:$0xff] %v5571_v48  ;;  %7908 = vst [vmem:[#allocation77_spill] sm:$0xff] %v5574_v6  ;;  %v464_v10 = vsel %vm5416_vm2, %v5564_v9, %v5571_v48  ;;  %v466_v5 = vsel %vm5438_vm4, %v5568_v51, %v5574_v6  ;;  %v465_v9 = vsel %vm5420_vm3, %v5560_v19, %v5554_v28  ;;  %v5837_v19 = vld [vmem:[#allocation6 + $0x98] sm:$0xff]  ;;  %v5841_v28 = vld [vmem:[#allocation6 + $0x80] sm:$0xff] }
 0x11d   :  { %v597_v55 = vpop.f32.mrf.mxu0  ;;  %v668_v3 = vpop.f32.mrf.mxu1 }
 0x11e   :  { %v598_v11 = vadd.f32 %v597_v55, %v463_v60 }
 0x11f   :  { %v599_v58 = vpop.f32.mrf.mxu0  ;;  %v670_v4 = vpop.f32.mrf.mxu1 }
 0x120   :  { %v4434_v57 = vmul.f32 -1.442695, %v598_v11  ;;  %v600_v53 = vadd.f32 %v599_v58, %v464_v10  ;;  %v671_v7 = vadd.f32 %v670_v4, %v466_v5  ;;  %v669_v11 = vadd.f32 %v668_v3, %v465_v9 }
 0x122   :  { %4543 = vpow2.f32 %v4434_v57  ;;  %v4435_v46 = vmul.f32 -1.442695, %v600_v53  ;;  %v4436_v60 = vmul.f32 -1.442695, %v671_v7 }
 0x124   :  { %4545 = vpow2.f32 %v4435_v46 }
 0x125   :  { %4547 = vpow2.f32 %v4436_v60 }
 0x12f   :  { %v4544_v55 = vpop.eup %4543 }
 0x130   :  { %v676_v10 = vadd.f32 1.0, %v4544_v55 }
 0x131   :  { %v4546_v58 = vpop.eup %4545 }
 0x132   :  { %4549 = vrcp.f32 %v676_v10  ;;  %v682_v46 = vadd.f32 1.0, %v4546_v58  ;;  %v4548_v57 = vpop.eup %4547  ;;  %v7944_v58 = vsel %vm5416_vm2, %v5381_v1, %v5513_v56  ;;  %v5855_v1 = vld [vmem:[#allocation6 + $0x70] sm:$0xff]  ;;  %v5859_v56 = vld [vmem:[#allocation6 + $0x48] sm:$0xff] }
 0x133   :  { %4551 = vtanh.f32 %v669_v11  ;;  %v689_v5 = vadd.f32 1.0, %v4548_v57 }
 0x134   :  { %4553 = vrcp.f32 %v682_v46 }
 0x135   :  { %4555 = vrcp.f32 %v689_v5 }
 0x13f   :  { %v4550_v53 = vpop.eup %4549 }
 0x140   :  { %v4552_v51 = vpop.eup %4551 }
 0x141   :  { %v4554_v6 = vpop.eup %4553  ;;  %v693_v48 = vmul.f32 %v4552_v51, %v4550_v53  ;;  %v7941_v51 = vld [vmem:[#allocation43_spill] sm:$0xff] }
 0x142   :  { %v692_v4 = vmul.f32 0.0, %v4554_v6  ;;  %v4556_v9 = vpop.eup %4555  ;;  %v7943_v6 = vld [vmem:[#allocation44_spill] sm:$0xff] }
 0x144   :  { %v5606_v8 = vadd.f32 %v693_v48, %v692_v4  ;;  %v7942_v48 = vmov 0.0   ;;  %v7945_v4 = vsel %vm5438_vm4, %v5384_v62, %v5516_v63  ;;  %v5849_v62 = vld [vmem:[#allocation6 + $0x78] sm:$0xff]  ;;  %v5853_v63 = vld [vmem:[#allocation6 + $0x60] sm:$0xff] }
 0x146   :  { %4557 = vtanh.f32 %v5606_v8 }
 0x153   :  { %v4558_v7 = vpop.eup %4557 }
 0x154   :  { %v5609_v3 = vmul.f32 %v4558_v7, %v4556_v9 }
 0x156   :  { %7910 = vst [vmem:[#allocation79_spill] sm:$0xff] %v5609_v3  ;;  %698 = vst.msk [vmem:[#allocation3] sm:$0xff] %vm697_vm5, %v5609_v3  ;;  %848 = vmatmul.mubr.f32.vlgmr.msra.gmra.mxu0 %v5609_v3  ;;  %919 = vmatmul.mubr.f32.vlgmr.msra.gmra.mxu1 %v5609_v3  ;;  %v5861_v3 = vld [vmem:[#allocation6 + $0x58] sm:$0xff] }
 0x157   :  { %1036 = vmatpush1.msra.mxu0 %v5030_v13  ;;  %1107 = vmatpush1.msra.mxu1 %v5032_v14  ;;  %v7911_v13 = vld [vmem:[#allocation13_spill] sm:$0xff]  ;;  %v7912_v14 = vld [vmem:[#allocation14_spill] sm:$0xff] }
 0x158   :  { %1037 = vmatprep.subr.mxu0 %v5036_v15  ;;  %1108 = vmatprep.subr.mxu1 %v5038_v16  ;;  %v7913_v15 = vld [vmem:[#allocation15_spill] sm:$0xff]  ;;  %v7914_v16 = vld [vmem:[#allocation16_spill] sm:$0xff] }
 0x159   :  { %1038 = vmatpush1.msra.mxu0 %v5044_v17  ;;  %1109 = vmatpush1.msra.mxu1 %v5046_v18  ;;  %v7915_v17 = vld [vmem:[#allocation17_spill] sm:$0xff]  ;;  %v7916_v18 = vld [vmem:[#allocation18_spill] sm:$0xff] }
 0x15a   :  { %1039 = vmatprep.subr.mxu0 %v5055_v20  ;;  %1110 = vmatprep.subr.mxu1 %v5057_v21  ;;  %v7917_v20 = vld [vmem:[#allocation19_spill] sm:$0xff]  ;;  %v7918_v21 = vld [vmem:[#allocation20_spill] sm:$0xff]  ;;  %7951 = vst [vmem:[#allocation17_spill] sm:$0xff] %v5837_v19  ;;  %7952 = vst [vmem:[#allocation18_spill] sm:$0xff] %v5841_v28 }
 0x15b   :  { %1040 = vmatpush1.msra.mxu0 %v5061_v22  ;;  %1111 = vmatpush1.msra.mxu1 %v5063_v23  ;;  %v7919_v22 = vld [vmem:[#allocation21_spill] sm:$0xff]  ;;  %v7920_v23 = vld [vmem:[#allocation22_spill] sm:$0xff] }
 0x15c   :  { %1041 = vmatprep.subr.mxu0 %v5067_v24  ;;  %1112 = vmatprep.subr.mxu1 %v5069_v25  ;;  %v7921_v24 = vld [vmem:[#allocation23_spill] sm:$0xff]  ;;  %v7922_v25 = vld [vmem:[#allocation24_spill] sm:$0xff]  ;;  %7955 = vst [vmem:[#allocation21_spill] sm:$0xff] %v5849_v62  ;;  %7956 = vst [vmem:[#allocation22_spill] sm:$0xff] %v5853_v63 }
 0x15d   :  { %1042 = vmatpush1.msra.mxu0 %v5075_v26  ;;  %1113 = vmatpush1.msra.mxu1 %v5077_v27  ;;  %v7923_v26 = vld [vmem:[#allocation25_spill] sm:$0xff]  ;;  %v7924_v27 = vld [vmem:[#allocation26_spill] sm:$0xff]  ;;  %7957 = vst [vmem:[#allocation23_spill] sm:$0xff] %v5855_v1  ;;  %7958 = vst [vmem:[#allocation24_spill] sm:$0xff] %v5859_v56 }
 0x15e   :  { %1043 = vmatprep.subr.mxu0 %v5086_v29  ;;  %1114 = vmatprep.subr.mxu1 %v5088_v30  ;;  %v7925_v29 = vld [vmem:[#allocation27_spill] sm:$0xff]  ;;  %v7926_v30 = vld [vmem:[#allocation28_spill] sm:$0xff]  ;;  %7959 = vst [vmem:[#allocation25_spill] sm:$0xff] %v5861_v3 }
 0x15f   :  { %1044 = vmatpush1.msra.mxu0 %v5092_v31  ;;  %1115 = vmatpush1.msra.mxu1 %v5094_v32  ;;  %v7927_v31 = vld [vmem:[#allocation29_spill] sm:$0xff]  ;;  %v7928_v32 = vld [vmem:[#allocation30_spill] sm:$0xff] }
 0x160   :  { %1045 = vmatprep.subr.mxu0 %v5098_v33  ;;  %1116 = vmatprep.subr.mxu1 %v5100_v34  ;;  %v7929_v33 = vld [vmem:[#allocation31_spill] sm:$0xff]  ;;  %v7930_v34 = vld [vmem:[#allocation32_spill] sm:$0xff] }
 0x161   :  { %1046 = vmatpush1.msra.mxu0 %v5106_v35  ;;  %1117 = vmatpush1.msra.mxu1 %v5108_v36  ;;  %v7931_v35 = vld [vmem:[#allocation33_spill] sm:$0xff]  ;;  %v7932_v36 = vld [vmem:[#allocation34_spill] sm:$0xff] }
 0x162   :  { %1047 = vmatprep.subr.mxu0 %v5117_v38  ;;  %1118 = vmatprep.subr.mxu1 %v5119_v39  ;;  %v7933_v38 = vld [vmem:[#allocation35_spill] sm:$0xff]  ;;  %v7934_v39 = vld [vmem:[#allocation36_spill] sm:$0xff] }
 0x163   :  { %1048 = vmatpush1.msra.mxu0 %v5123_v40  ;;  %1119 = vmatpush1.msra.mxu1 %v5125_v41  ;;  %v7935_v40 = vld [vmem:[#allocation37_spill] sm:$0xff]  ;;  %v7936_v41 = vld [vmem:[#allocation38_spill] sm:$0xff] }
 0x164   :  { %1049 = vmatprep.subr.mxu0 %v5129_v42  ;;  %1120 = vmatprep.subr.mxu1 %v5131_v43  ;;  %v7937_v42 = vld [vmem:[#allocation39_spill] sm:$0xff]  ;;  %v7938_v43 = vld [vmem:[#allocation40_spill] sm:$0xff] }
 0x165   :  { %1050 = vmatpush1.msra.mxu0 %v5137_v44  ;;  %1121 = vmatpush1.msra.mxu1 %v5139_v45  ;;  %v7939_v44 = vld [vmem:[#allocation41_spill] sm:$0xff]  ;;  %v7940_v45 = vld [vmem:[#allocation42_spill] sm:$0xff] }
 0x166   :  { %1051 = vmatprep.subr.mxu0 %v7911_v13  ;;  %1122 = vmatprep.subr.mxu1 %v7912_v14 }
 0x167   :  { %1052 = vmatpush1.msra.mxu0 %v7913_v15  ;;  %1123 = vmatpush1.msra.mxu1 %v7914_v16 }
 0x168   :  { %1053 = vmatprep.subr.mxu0 %v7915_v17  ;;  %1124 = vmatprep.subr.mxu1 %v7916_v18 }
 0x169   :  { %1054 = vmatpush1.msra.mxu0 %v7917_v20  ;;  %1125 = vmatpush1.msra.mxu1 %v7918_v21 }
 0x16a   :  { %1055 = vmatprep.subr.mxu0 %v7919_v22  ;;  %1126 = vmatprep.subr.mxu1 %v7920_v23 }
 0x16b   :  { %1056 = vmatpush1.msra.mxu0 %v7921_v24  ;;  %1127 = vmatpush1.msra.mxu1 %v7922_v25 }
 0x16c   :  { %1057 = vmatprep.subr.mxu0 %v7923_v26  ;;  %1128 = vmatprep.subr.mxu1 %v7924_v27 }
 0x16d   :  { %1058 = vmatpush1.msra.mxu0 %v7925_v29  ;;  %1129 = vmatpush1.msra.mxu1 %v7926_v30 }
 0x16e   :  { %1059 = vmatprep.subr.mxu0 %v7927_v31  ;;  %1130 = vmatprep.subr.mxu1 %v7928_v32  ;;  %v5709_v31 = vld [vmem:[#allocation6 + $0x1f8] sm:$0xff]  ;;  %v5713_v32 = vld [vmem:[#allocation6 + $0x1e0] sm:$0xff] }
 0x16f   :  { %1060 = vmatpush1.msra.mxu0 %v7929_v33  ;;  %1131 = vmatpush1.msra.mxu1 %v7930_v34  ;;  %7949 = vst [vmem:[#allocation15_spill] sm:$0xff] %v5709_v31  ;;  %v5715_v33 = vld [vmem:[#allocation6 + $0x1f0] sm:$0xff]  ;;  %v5719_v34 = vld [vmem:[#allocation6 + $0x1c8] sm:$0xff] }
 0x170   :  { %1061 = vmatprep.subr.mxu0 %v7931_v35  ;;  %1132 = vmatprep.subr.mxu1 %v7932_v36  ;;  %v5721_v35 = vld [vmem:[#allocation6 + $0x1d8] sm:$0xff]  ;;  %v5725_v36 = vld [vmem:[#allocation6 + $0x1c0] sm:$0xff] }
 0x171   :  { %1062 = vmatpush1.msra.mxu0 %v7933_v38  ;;  %1133 = vmatpush1.msra.mxu1 %v7934_v39  ;;  %v5727_v38 = vld [vmem:[#allocation6 + $0x1d0] sm:$0xff]  ;;  %v5731_v39 = vld [vmem:[#allocation6 + $0x1a8] sm:$0xff] }
 0x172   :  { %1063 = vmatprep.subr.mxu0 %v7935_v40  ;;  %1134 = vmatprep.subr.mxu1 %v7936_v41  ;;  %v5733_v40 = vld [vmem:[#allocation6 + $0x1b8] sm:$0xff]  ;;  %v5737_v41 = vld [vmem:[#allocation6 + $0x1a0] sm:$0xff] }
 0x173   :  { %1064 = vmatpush1.msra.mxu0 %v7937_v42  ;;  %1135 = vmatpush1.msra.mxu1 %v7938_v43  ;;  %v5739_v42 = vld [vmem:[#allocation6 + $0x1b0] sm:$0xff]  ;;  %v5743_v43 = vld [vmem:[#allocation6 + $0x188] sm:$0xff] }
 0x174   :  { %1065 = vmatprep.subr.mxu0 %v7939_v44  ;;  %1136 = vmatprep.subr.mxu1 %v7940_v45  ;;  %v5745_v44 = vld [vmem:[#allocation6 + $0x198] sm:$0xff]  ;;  %v5749_v45 = vld [vmem:[#allocation6 + $0x180] sm:$0xff] }
 0x175   :  { %1066 = vmatpush1.msra.mxu0 %v7941_v51  ;;  %1099 = vmatprep.mubr.f32.mxu0 %v7942_v48  ;;  %v5751_v51 = vld [vmem:[#allocation6 + $0x190] sm:$0xff] }
 0x176   :  { %1137 = vmatpush1.msra.mxu1 %v7943_v6  ;;  %1170 = vmatprep.mubr.f32.mxu1 %v7942_v48  ;;  %v5755_v6 = vld [vmem:[#allocation6 + $0x168] sm:$0xff] }
 0x177   :  { %1358 = vmatprep.subr.mxu1 %v5709_v31 }
 0x216   :  { %v849_v60 = vpop.f32.mrf.mxu0  ;;  %v920_v57 = vpop.f32.mrf.mxu1 }
 0x217   :  { %v850_v55 = vadd.f32 %v849_v60, %v5521_v37  ;;  %v7946_v37 = vsel %vm5420_vm3, %v5378_v0, %v5510_v61  ;;  %v5757_v60 = vld [vmem:[#allocation6 + $0x178] sm:$0xff]  ;;  %v5843_v0 = vld [vmem:[#allocation6 + $0x90] sm:$0xff]  ;;  %v5847_v61 = vld [vmem:[#allocation6 + $0x68] sm:$0xff] }
 0x218   :  { %v851_v11 = vpop.f32.mrf.mxu0  ;;  %v922_v5 = vpop.f32.mrf.mxu1  ;;  %v921_v7 = vadd.f32 %v920_v57, %v7946_v37  ;;  %v5775_v57 = vld [vmem:[#allocation6 + $0x150] sm:$0xff]  ;;  %v5791_v37 = vld [vmem:[#allocation6 + $0x108] sm:$0xff]  ;;  %7953 = vst [vmem:[#allocation19_spill] sm:$0xff] %v5843_v0  ;;  %7954 = vst [vmem:[#allocation20_spill] sm:$0xff] %v5847_v61 }
 0x219   :  { %v4437_v10 = vmul.f32 -1.442695, %v850_v55  ;;  %v852_v46 = vadd.f32 %v851_v11, %v7944_v58  ;;  %v923_v9 = vadd.f32 %v922_v5, %v7945_v4  ;;  %v5761_v55 = vld [vmem:[#allocation6 + $0x160] sm:$0xff]  ;;  %v5763_v11 = vld [vmem:[#allocation6 + $0x170] sm:$0xff]  ;;  %v5769_v58 = vld [vmem:[#allocation6 + $0x158] sm:$0xff] }
 0x21a   :  { %v5781_v5 = vld [vmem:[#allocation6 + $0x138] sm:$0xff]  ;;  %v5785_v4 = vld [vmem:[#allocation6 + $0x120] sm:$0xff] }
 0x21b   :  { %4559 = vpow2.f32 %v4437_v10  ;;  %v4438_v53 = vmul.f32 -1.442695, %v852_v46  ;;  %v4439_v13 = vmul.f32 -1.442695, %v923_v9  ;;  %v5767_v10 = vld [vmem:[#allocation6 + $0x148] sm:$0xff]  ;;  %v5773_v46 = vld [vmem:[#allocation6 + $0x140] sm:$0xff] }
 0x21c   :  { %v5787_v9 = vld [vmem:[#allocation6 + $0x130] sm:$0xff] }
 0x21d   :  { %4561 = vpow2.f32 %v4438_v53  ;;  %v5779_v53 = vld [vmem:[#allocation6 + $0x128] sm:$0xff] }
 0x21e   :  { %4563 = vtanh.f32 %v921_v7  ;;  %v5793_v7 = vld [vmem:[#allocation6 + $0x118] sm:$0xff] }
 0x21f   :  { %4565 = vpow2.f32 %v4439_v13  ;;  %v5795_v13 = vld [vmem:[#allocation6 + $0x100] sm:$0xff] }
 0x228   :  { %v4560_v14 = vpop.eup %4559 }
 0x229   :  { %v928_v15 = vadd.f32 1.0, %v4560_v14  ;;  %v5799_v14 = vld [vmem:[#allocation6 + $0x110] sm:$0xff] }
 0x22a   :  { %v4562_v16 = vpop.eup %4561 }
 0x22b   :  { %4567 = vrcp.f32 %v928_v15  ;;  %v934_v17 = vadd.f32 1.0, %v4562_v16  ;;  %v4564_v18 = vpop.eup %4563  ;;  %v5801_v15 = vld [vmem:[#allocation6 + $0xe8] sm:$0xff]  ;;  %v5803_v16 = vld [vmem:[#allocation6 + $0xf8] sm:$0xff] }
 0x22c   :  { %v4566_v20 = vpop.eup %4565 }
 0x22d   :  { %4569 = vrcp.f32 %v934_v17  ;;  %v941_v24 = vadd.f32 1.0, %v4566_v20  ;;  %v5807_v17 = vld [vmem:[#allocation6 + $0xe0] sm:$0xff]  ;;  %v5811_v20 = vld [vmem:[#allocation6 + $0xc8] sm:$0xff] }
 0x22f   :  { %4571 = vrcp.f32 %v941_v24  ;;  %v5823_v24 = vld [vmem:[#allocation6 + $0xa8] sm:$0xff] }
 0x238   :  { %v4568_v21 = vpop.eup %4567 }
 0x239   :  { %v945_v22 = vmul.f32 %v4568_v21, %v4564_v18  ;;  %v5809_v18 = vld [vmem:[#allocation6 + $0xf0] sm:$0xff]  ;;  %v5815_v21 = vld [vmem:[#allocation6 + $0xd8] sm:$0xff] }
 0x23a   :  { %v4570_v23 = vpop.eup %4569 }
 0x23b   :  { %v944_v25 = vmul.f32 %v4570_v23, %v5606_v8  ;;  %v5707_v8 = vld [vmem:[#allocation6 + $0x1e8] sm:$0xff]  ;;  %v5819_v23 = vld [vmem:[#allocation6 + $0xd0] sm:$0xff] }
 0x23c   :  { %v4572_v27 = vpop.eup %4571  ;;  %7948 = vst [vmem:[#allocation14_spill] sm:$0xff] %v5707_v8  ;;  %1287 = vmatprep.subr.mxu0 %v5707_v8 }
 0x23d   :  { %v5696_v26 = vadd.f32 %v945_v22, %v944_v25  ;;  %v5817_v22 = vld [vmem:[#allocation6 + $0xc0] sm:$0xff]  ;;  %v5825_v25 = vld [vmem:[#allocation6 + $0xb8] sm:$0xff] }
 0x23f   :  { %4573 = vtanh.f32 %v5696_v26 }
 0x24c   :  { %v4574_v29 = vpop.eup %4573 }
 0x24d   :  { %v5699_v30 = vmul.f32 %v4574_v29, %v4572_v27  ;;  %v5829_v27 = vld [vmem:[#allocation6 + $0xa0] sm:$0xff]  ;;  %v5831_v29 = vld [vmem:[#allocation6 + $0xb0] sm:$0xff] }
 0x24f   :  { %7947 = vst [vmem:[#allocation13_spill] sm:$0xff] %v5699_v30  ;;  %950 = vst.msk [vmem:[#allocation3 + $0x8] sm:$0xff] %vm697_vm5, %v5699_v30  ;;  %1100 = vmatmul.mubr.f32.vlgmr.msra.gmra.mxu0 %v5699_v30  ;;  %1171 = vmatmul.mubr.f32.vlgmr.msra.gmra.mxu1 %v5699_v30  ;;  %v5835_v30 = vld [vmem:[#allocation6 + $0x88] sm:$0xff] }
 0x250   :  { %1351 = vmatprep.mubr.f32.mxu0 %v7942_v48  ;;  %1422 = vmatprep.mubr.f32.mxu1 %v7942_v48  ;;  %7950 = vst [vmem:[#allocation16_spill] sm:$0xff] %v5835_v30  ;;  %v5865_v48 = vld [vmem:[#allocation6 + $0x40] sm:$0xff] }
 0x251   :  { %1288 = vmatpush1.msra.mxu0 %v5713_v32  ;;  %1359 = vmatpush1.msra.mxu1 %v5715_v33  ;;  %7960 = vst [vmem:[#allocation26_spill] sm:$0xff] %v5865_v48 }
 0x252   :  { %1289 = vmatprep.subr.mxu0 %v5719_v34  ;;  %1360 = vmatprep.subr.mxu1 %v5721_v35 }
 0x253   :  { %1290 = vmatpush1.msra.mxu0 %v5725_v36  ;;  %1361 = vmatpush1.msra.mxu1 %v5727_v38 }
 0x254   :  { %1291 = vmatprep.subr.mxu0 %v5731_v39  ;;  %1362 = vmatprep.subr.mxu1 %v5733_v40 }
 0x255   :  { %1292 = vmatpush1.msra.mxu0 %v5737_v41  ;;  %1363 = vmatpush1.msra.mxu1 %v5739_v42 }
 0x256   :  { %1293 = vmatprep.subr.mxu0 %v5743_v43  ;;  %1364 = vmatprep.subr.mxu1 %v5745_v44 }
 0x257   :  { %1294 = vmatpush1.msra.mxu0 %v5749_v45  ;;  %1365 = vmatpush1.msra.mxu1 %v5751_v51 }
 0x258   :  { %1295 = vmatprep.subr.mxu0 %v5755_v6  ;;  %1366 = vmatprep.subr.mxu1 %v5757_v60 }
 0x259   :  { %1296 = vmatpush1.msra.mxu0 %v5761_v55  ;;  %1367 = vmatpush1.msra.mxu1 %v5763_v11 }
 0x25a   :  { %1297 = vmatprep.subr.mxu0 %v5767_v10  ;;  %1368 = vmatprep.subr.mxu1 %v5769_v58 }
 0x25b   :  { %1298 = vmatpush1.msra.mxu0 %v5773_v46  ;;  %1369 = vmatpush1.msra.mxu1 %v5775_v57 }
 0x25c   :  { %1299 = vmatprep.subr.mxu0 %v5779_v53  ;;  %1370 = vmatprep.subr.mxu1 %v5781_v5 }
 0x25d   :  { %1300 = vmatpush1.msra.mxu0 %v5785_v4  ;;  %1371 = vmatpush1.msra.mxu1 %v5787_v9 }
 0x25e   :  { %1301 = vmatprep.subr.mxu0 %v5791_v37  ;;  %1372 = vmatprep.subr.mxu1 %v5793_v7 }
 0x25f   :  { %1302 = vmatpush1.msra.mxu0 %v5795_v13  ;;  %1373 = vmatpush1.msra.mxu1 %v5799_v14 }
 0x260   :  { %1303 = vmatprep.subr.mxu0 %v5801_v15  ;;  %1374 = vmatprep.subr.mxu1 %v5803_v16 }
 0x261   :  { %1304 = vmatpush1.msra.mxu0 %v5807_v17  ;;  %1375 = vmatpush1.msra.mxu1 %v5809_v18 }
 0x262   :  { %1305 = vmatprep.subr.mxu0 %v5811_v20  ;;  %1376 = vmatprep.subr.mxu1 %v5815_v21 }
 0x263   :  { %1306 = vmatpush1.msra.mxu0 %v5817_v22  ;;  %1377 = vmatpush1.msra.mxu1 %v5819_v23 }
 0x264   :  { %1307 = vmatprep.subr.mxu0 %v5823_v24  ;;  %1378 = vmatprep.subr.mxu1 %v5825_v25 }
 0x265   :  { %1308 = vmatpush1.msra.mxu0 %v5829_v27  ;;  %1379 = vmatpush1.msra.mxu1 %v5831_v29 }
 0x266   :  { %1309 = vmatprep.subr.mxu0 %v5835_v30  ;;  %1380 = vmatprep.subr.mxu1 %v5837_v19  ;;  %v5867_v30 = vld [vmem:[#allocation6 + $0x50] sm:$0xff]  ;;  %v5871_v19 = vld [vmem:[#allocation6 + $0x28] sm:$0xff] }
 0x267   :  { %1310 = vmatpush1.msra.mxu0 %v5841_v28  ;;  %1381 = vmatpush1.msra.mxu1 %v5843_v0  ;;  %7961 = vst [vmem:[#allocation27_spill] sm:$0xff] %v5867_v30  ;;  %7962 = vst [vmem:[#allocation28_spill] sm:$0xff] %v5871_v19  ;;  %v5873_v28 = vld [vmem:[#allocation6 + $0x38] sm:$0xff]  ;;  %v5877_v0 = vld [vmem:[#allocation6 + $0x20] sm:$0xff] }
 0x268   :  { %1311 = vmatprep.subr.mxu0 %v5847_v61  ;;  %1382 = vmatprep.subr.mxu1 %v5849_v62  ;;  %7963 = vst [vmem:[#allocation29_spill] sm:$0xff] %v5873_v28  ;;  %7964 = vst [vmem:[#allocation30_spill] sm:$0xff] %v5877_v0  ;;  %v5879_v61 = vld [vmem:[#allocation6 + $0x30] sm:$0xff]  ;;  %v5883_v62 = vld [vmem:[#allocation6 + $0x8] sm:$0xff] }
 0x269   :  { %1312 = vmatpush1.msra.mxu0 %v5853_v63  ;;  %1383 = vmatpush1.msra.mxu1 %v5855_v1  ;;  %7965 = vst [vmem:[#allocation31_spill] sm:$0xff] %v5879_v61  ;;  %7966 = vst [vmem:[#allocation32_spill] sm:$0xff] %v5883_v62  ;;  %v5885_v63 = vld [vmem:[#allocation6 + $0x18] sm:$0xff]  ;;  %v5889_v1 = vld [vmem:[#allocation6] sm:$0xff] }
 0x26a   :  { %1313 = vmatprep.subr.mxu0 %v5859_v56  ;;  %1384 = vmatprep.subr.mxu1 %v5861_v3  ;;  %7967 = vst [vmem:[#allocation33_spill] sm:$0xff] %v5885_v63  ;;  %7968 = vst [vmem:[#allocation34_spill] sm:$0xff] %v5889_v1  ;;  %v5891_v56 = vld [vmem:[#allocation6 + $0x10] sm:$0xff] }
 0x26b   :  { %1314 = vmatpush1.msra.mxu0 %v5865_v48  ;;  %1385 = vmatpush1.msra.mxu1 %v5867_v30  ;;  %7969 = vst [vmem:[#allocation35_spill] sm:$0xff] %v5891_v56 }
 0x26c   :  { %1315 = vmatprep.subr.mxu0 %v5871_v19  ;;  %1386 = vmatprep.subr.mxu1 %v5873_v28 }
 0x26d   :  { %1316 = vmatpush1.msra.mxu0 %v5877_v0  ;;  %1387 = vmatpush1.msra.mxu1 %v5879_v61 }
 0x26e   :  { %1317 = vmatprep.subr.mxu0 %v5883_v62  ;;  %1388 = vmatprep.subr.mxu1 %v5885_v63  ;;  %v7970_v62 = vsel %vm5416_vm2, %v5393_v59, %v5471_v50 }
 0x26f   :  { %1318 = vmatpush1.msra.mxu0 %v5889_v1  ;;  %1389 = vmatpush1.msra.mxu1 %v5891_v56 }
 0x270   :  { %1537 = vmatprep.subr.mxu0 %v5707_v8  ;;  %1608 = vmatprep.subr.mxu1 %v5709_v31  ;;  %v7971_v31 = vsel %vm5438_vm4, %v5396_v2, %v5474_v49 }
 0x30f   :  { %v1101_v28 = vpop.f32.mrf.mxu0  ;;  %v1172_v63 = vpop.f32.mrf.mxu1 }
 0x310   :  { %v1102_v19 = vadd.f32 %v1101_v28, %v5478_v12  ;;  %v7973_v12 = vld [vmem:[#allocation64_spill] sm:$0xff] }
 0x311   :  { %v1103_v30 = vpop.f32.mrf.mxu0  ;;  %v1174_v56 = vpop.f32.mrf.mxu1 }
 0x312   :  { %v4440_v48 = vmul.f32 -1.442695, %v1102_v19  ;;  %v1104_v61 = vadd.f32 %v1103_v30, %v7970_v62  ;;  %v1175_v8 = vadd.f32 %v1174_v56, %v7971_v31  ;;  %v7972_v19 = vld [vmem:[#allocation49_spill] sm:$0xff] }
 0x313   :  { %v7974_v28 = vsel %vm5420_vm3, %v7972_v19, %v7973_v12  ;;  %v7993_v19 = vld [vmem:[#allocation34_spill] sm:$0xff]  ;;  %v7994_v12 = vmov 0.0  }
 0x314   :  { %4575 = vpow2.f32 %v4440_v48  ;;  %v4441_v1 = vmul.f32 -1.442695, %v1104_v61  ;;  %v1173_v47 = vadd.f32 %v1172_v63, %v7974_v28  ;;  %v4442_v0 = vmul.f32 -1.442695, %v1175_v8  ;;  %v7981_v8 = vld [vmem:[#allocation21_spill] sm:$0xff]  ;;  %v7982_v28 = vld [vmem:[#allocation22_spill] sm:$0xff] }
 0x316   :  { %4577 = vpow2.f32 %v4441_v1 }
 0x317   :  { %4579 = vtanh.f32 %v1173_v47 }
 0x318   :  { %4581 = vpow2.f32 %v4442_v0  ;;  %v7976_v0 = vld [vmem:[#allocation16_spill] sm:$0xff] }
 0x321   :  { %v4576_v59 = vpop.eup %4575 }
 0x322   :  { %v1180_v62 = vadd.f32 1.0, %v4576_v59 }
 0x323   :  { %v4578_v48 = vpop.eup %4577 }
 0x324   :  { %4583 = vrcp.f32 %v1180_v62  ;;  %v1186_v1 = vadd.f32 1.0, %v4578_v48  ;;  %v4580_v61 = vpop.eup %4579  ;;  %v7983_v62 = vld [vmem:[#allocation23_spill] sm:$0xff]  ;;  %v7984_v48 = vld [vmem:[#allocation24_spill] sm:$0xff] }
 0x325   :  { %v4582_v30 = vpop.eup %4581 }
 0x326   :  { %4585 = vrcp.f32 %v1186_v1  ;;  %v1193_v31 = vadd.f32 1.0, %v4582_v30  ;;  %v7985_v1 = vld [vmem:[#allocation26_spill] sm:$0xff]  ;;  %v7987_v30 = vld [vmem:[#allocation28_spill] sm:$0xff] }
 0x328   :  { %4587 = vrcp.f32 %v1193_v31  ;;  %v7989_v31 = vld [vmem:[#allocation30_spill] sm:$0xff] }
 0x331   :  { %v4584_v50 = vpop.eup %4583 }
 0x332   :  { %v1197_v2 = vmul.f32 %v4584_v50, %v4580_v61  ;;  %v7979_v50 = vld [vmem:[#allocation19_spill] sm:$0xff] }
 0x333   :  { %v4586_v56 = vpop.eup %4585  ;;  %v7986_v61 = vld [vmem:[#allocation27_spill] sm:$0xff] }
 0x334   :  { %v1196_v49 = vmul.f32 %v4586_v56, %v5696_v26  ;;  %v7980_v26 = vld [vmem:[#allocation20_spill] sm:$0xff]  ;;  %v7988_v56 = vld [vmem:[#allocation29_spill] sm:$0xff] }
 0x335   :  { %v4588_v59 = vpop.eup %4587 }
 0x336   :  { %v5918_v54 = vadd.f32 %v1197_v2, %v1196_v49  ;;  %v7977_v2 = vld [vmem:[#allocation17_spill] sm:$0xff]  ;;  %v7978_v49 = vld [vmem:[#allocation18_spill] sm:$0xff] }
 0x338   :  { %4589 = vtanh.f32 %v5918_v54 }
 0x345   :  { %v4590_v47 = vpop.eup %4589 }
 0x346   :  { %v5921_v63 = vmul.f32 %v4590_v47, %v4588_v59  ;;  %v7990_v59 = vld [vmem:[#allocation31_spill] sm:$0xff]  ;;  %v7991_v47 = vld [vmem:[#allocation32_spill] sm:$0xff] }
 0x348   :  { %7975 = vst [vmem:[#allocation36_spill] sm:$0xff] %v5921_v63  ;;  %1202 = vst.msk [vmem:[#allocation3 + $0x10] sm:$0xff] %vm697_vm5, %v5921_v63  ;;  %1352 = vmatmul.mubr.f32.vlgmr.msra.gmra.mxu0 %v5921_v63  ;;  %1423 = vmatmul.mubr.f32.vlgmr.msra.gmra.mxu1 %v5921_v63  ;;  %v7992_v63 = vld [vmem:[#allocation33_spill] sm:$0xff] }
 0x349   :  { %1538 = vmatpush1.msra.mxu0 %v5713_v32  ;;  %1609 = vmatpush1.msra.mxu1 %v5715_v33 }
 0x34a   :  { %1539 = vmatprep.subr.mxu0 %v5719_v34  ;;  %1610 = vmatprep.subr.mxu1 %v5721_v35 }
 0x34b   :  { %1540 = vmatpush1.msra.mxu0 %v5725_v36  ;;  %1611 = vmatpush1.msra.mxu1 %v5727_v38 }
 0x34c   :  { %1541 = vmatprep.subr.mxu0 %v5731_v39  ;;  %1612 = vmatprep.subr.mxu1 %v5733_v40 }
 0x34d   :  { %1542 = vmatpush1.msra.mxu0 %v5737_v41  ;;  %1613 = vmatpush1.msra.mxu1 %v5739_v42 }
 0x34e   :  { %1543 = vmatprep.subr.mxu0 %v5743_v43  ;;  %1614 = vmatprep.subr.mxu1 %v5745_v44 }
 0x34f   :  { %1544 = vmatpush1.msra.mxu0 %v5749_v45  ;;  %1615 = vmatpush1.msra.mxu1 %v5751_v51 }
 0x350   :  { %1545 = vmatprep.subr.mxu0 %v5755_v6  ;;  %1616 = vmatprep.subr.mxu1 %v5757_v60 }
 0x351   :  { %1546 = vmatpush1.msra.mxu0 %v5761_v55  ;;  %1617 = vmatpush1.msra.mxu1 %v5763_v11 }
 0x352   :  { %1547 = vmatprep.subr.mxu0 %v5767_v10  ;;  %1618 = vmatprep.subr.mxu1 %v5769_v58 }
 0x353   :  { %1548 = vmatpush1.msra.mxu0 %v5773_v46  ;;  %1619 = vmatpush1.msra.mxu1 %v5775_v57 }
 0x354   :  { %1549 = vmatprep.subr.mxu0 %v5779_v53  ;;  %1620 = vmatprep.subr.mxu1 %v5781_v5 }
 0x355   :  { %1550 = vmatpush1.msra.mxu0 %v5785_v4  ;;  %1621 = vmatpush1.msra.mxu1 %v5787_v9 }
 0x356   :  { %1551 = vmatprep.subr.mxu0 %v5791_v37  ;;  %1622 = vmatprep.subr.mxu1 %v5793_v7 }
 0x357   :  { %1552 = vmatpush1.msra.mxu0 %v5795_v13  ;;  %1623 = vmatpush1.msra.mxu1 %v5799_v14 }
 0x358   :  { %1553 = vmatprep.subr.mxu0 %v5801_v15  ;;  %1624 = vmatprep.subr.mxu1 %v5803_v16 }
 0x359   :  { %1554 = vmatpush1.msra.mxu0 %v5807_v17  ;;  %1625 = vmatpush1.msra.mxu1 %v5809_v18 }
 0x35a   :  { %1555 = vmatprep.subr.mxu0 %v5811_v20  ;;  %1626 = vmatprep.subr.mxu1 %v5815_v21 }
 0x35b   :  { %1556 = vmatpush1.msra.mxu0 %v5817_v22  ;;  %1627 = vmatpush1.msra.mxu1 %v5819_v23 }
 0x35c   :  { %1557 = vmatprep.subr.mxu0 %v5823_v24  ;;  %1628 = vmatprep.subr.mxu1 %v5825_v25 }
 0x35d   :  { %1558 = vmatpush1.msra.mxu0 %v5829_v27  ;;  %1629 = vmatpush1.msra.mxu1 %v5831_v29 }
 0x35e   :  { %1559 = vmatprep.subr.mxu0 %v7976_v0  ;;  %1630 = vmatprep.subr.mxu1 %v7977_v2 }
 0x35f   :  { %1560 = vmatpush1.msra.mxu0 %v7978_v49  ;;  %1631 = vmatpush1.msra.mxu1 %v7979_v50 }
 0x360   :  { %1561 = vmatprep.subr.mxu0 %v7980_v26  ;;  %1632 = vmatprep.subr.mxu1 %v7981_v8 }
 0x361   :  { %1562 = vmatpush1.msra.mxu0 %v7982_v28  ;;  %1633 = vmatpush1.msra.mxu1 %v7983_v62  ;;  %v8001_v62 = vld [vmem:[#allocation59_spill] sm:$0xff] }
 0x362   :  { %1563 = vmatprep.subr.mxu0 %v7984_v48  ;;  %1634 = vmatprep.subr.mxu1 %v5861_v3  ;;  %v7995_v3 = vld [vmem:[#allocation35_spill] sm:$0xff] }
 0x363   :  { %1564 = vmatpush1.msra.mxu0 %v7985_v1  ;;  %1635 = vmatpush1.msra.mxu1 %v7986_v61  ;;  %v7996_v61 = vld [vmem:[#allocation14_spill] sm:$0xff] }
 0x364   :  { %1565 = vmatprep.subr.mxu0 %v7987_v30  ;;  %1636 = vmatprep.subr.mxu1 %v7988_v56  ;;  %v7997_v30 = vld [vmem:[#allocation15_spill] sm:$0xff] }
 0x365   :  { %1566 = vmatpush1.msra.mxu0 %v7989_v31  ;;  %1637 = vmatpush1.msra.mxu1 %v7990_v59  ;;  %v7998_v31 = vld [vmem:[#allocation61_spill] sm:$0xff] }
 0x366   :  { %1567 = vmatprep.subr.mxu0 %v7991_v47  ;;  %1638 = vmatprep.subr.mxu1 %v7992_v63  ;;  %v8000_v63 = vld [vmem:[#allocation54_spill] sm:$0xff] }
 0x367   :  { %1568 = vmatpush1.msra.mxu0 %v7993_v19  ;;  %1601 = vmatprep.mubr.f32.mxu0 %v7994_v12  ;;  %v8002_v19 = vsel %vm5416_vm2, %v8000_v63, %v8001_v62 }
 0x368   :  { %1639 = vmatpush1.msra.mxu1 %v7995_v3  ;;  %1672 = vmatprep.mubr.f32.mxu1 %v7994_v12 }
 0x369   :  { %1787 = vmatprep.subr.mxu0 %v7996_v61  ;;  %1858 = vmatprep.subr.mxu1 %v7997_v30  ;;  %v8003_v61 = vld [vmem:[#allocation55_spill] sm:$0xff]  ;;  %v8004_v30 = vld [vmem:[#allocation60_spill] sm:$0xff] }
 0x36a   :  { %v8005_v26 = vsel %vm5438_vm4, %v8003_v61, %v8004_v30 }
 0x408   :  { %v1353_v56 = vpop.f32.mrf.mxu0  ;;  %v1424_v8 = vpop.f32.mrf.mxu1 }
 0x409   :  { %v1354_v1 = vadd.f32 %v1353_v56, %v7998_v31  ;;  %v8008_v31 = vld [vmem:[#allocation56_spill] sm:$0xff] }
 0x40a   :  { %v1355_v59 = vpop.f32.mrf.mxu0  ;;  %v1426_v12 = vpop.f32.mrf.mxu1 }
 0x40b   :  { %v4443_v48 = vmul.f32 -1.442695, %v1354_v1  ;;  %v1356_v28 = vadd.f32 %v1355_v59, %v8002_v19  ;;  %v1427_v50 = vadd.f32 %v1426_v12, %v8005_v26  ;;  %v8007_v1 = vld [vmem:[#allocation53_spill] sm:$0xff] }
 0x40c   :  { %v8009_v47 = vsel %vm5420_vm3, %v8007_v1, %v8008_v31 }
 0x40d   :  { %4591 = vpow2.f32 %v4443_v48  ;;  %v4444_v3 = vmul.f32 -1.442695, %v1356_v28  ;;  %v1425_v49 = vadd.f32 %v1424_v8, %v8009_v47  ;;  %v4445_v2 = vmul.f32 -1.442695, %v1427_v50  ;;  %v8014_v8 = vld [vmem:[#allocation20_spill] sm:$0xff]  ;;  %v8016_v47 = vld [vmem:[#allocation22_spill] sm:$0xff] }
 0x40f   :  { %4593 = vpow2.f32 %v4444_v3 }
 0x410   :  { %4595 = vtanh.f32 %v1425_v49 }
 0x411   :  { %4597 = vpow2.f32 %v4445_v2  ;;  %v8013_v2 = vld [vmem:[#allocation19_spill] sm:$0xff] }
 0x41a   :  { %v4592_v63 = vpop.eup %4591 }
 0x41b   :  { %v1432_v19 = vadd.f32 1.0, %v4592_v63 }
 0x41c   :  { %v4594_v48 = vpop.eup %4593 }
 0x41d   :  { %4599 = vrcp.f32 %v1432_v19  ;;  %v1438_v3 = vadd.f32 1.0, %v4594_v48  ;;  %v4596_v28 = vpop.eup %4595  ;;  %v8018_v19 = vld [vmem:[#allocation24_spill] sm:$0xff]  ;;  %v8019_v48 = vld [vmem:[#allocation25_spill] sm:$0xff] }
 0x41e   :  { %v4598_v59 = vpop.eup %4597 }
 0x41f   :  { %4601 = vrcp.f32 %v1438_v3  ;;  %v1445_v26 = vadd.f32 1.0, %v4598_v59  ;;  %v8020_v3 = vld [vmem:[#allocation26_spill] sm:$0xff]  ;;  %v8022_v59 = vld [vmem:[#allocation28_spill] sm:$0xff] }
 0x421   :  { %4603 = vrcp.f32 %v1445_v26  ;;  %v8024_v26 = vld [vmem:[#allocation30_spill] sm:$0xff] }
 0x42a   :  { %v4600_v52 = vpop.eup %4599 }
 0x42b   :  { %v1449_v61 = vmul.f32 %v4600_v52, %v4596_v28  ;;  %v8012_v52 = vld [vmem:[#allocation18_spill] sm:$0xff]  ;;  %v8021_v28 = vld [vmem:[#allocation27_spill] sm:$0xff] }
 0x42c   :  { %v4602_v12 = vpop.eup %4601 }
 0x42d   :  { %v1448_v56 = vmul.f32 %v4602_v12, %v5918_v54  ;;  %v8011_v54 = vld [vmem:[#allocation17_spill] sm:$0xff] }
 0x42e   :  { %v4604_v63 = vpop.eup %4603  ;;  %v8023_v12 = vld [vmem:[#allocation29_spill] sm:$0xff] }
 0x42f   :  { %v6010_v30 = vadd.f32 %v1449_v61, %v1448_v56  ;;  %v8015_v61 = vld [vmem:[#allocation21_spill] sm:$0xff]  ;;  %v8017_v56 = vld [vmem:[#allocation23_spill] sm:$0xff] }
 0x431   :  { %4605 = vtanh.f32 %v6010_v30 }
 0x43e   :  { %v4606_v49 = vpop.eup %4605 }
 0x43f   :  { %v6013_v50 = vmul.f32 %v4606_v49, %v4604_v63  ;;  %v8025_v63 = vld [vmem:[#allocation31_spill] sm:$0xff]  ;;  %v8026_v49 = vld [vmem:[#allocation32_spill] sm:$0xff] }
 0x441   :  { %8010 = vst [vmem:[#allocation37_spill] sm:$0xff] %v6013_v50  ;;  %1454 = vst.msk [vmem:[#allocation3 + $0x18] sm:$0xff] %vm697_vm5, %v6013_v50  ;;  %1602 = vmatmul.mubr.f32.vlgmr.msra.gmra.mxu0 %v6013_v50  ;;  %1673 = vmatmul.mubr.f32.vlgmr.msra.gmra.mxu1 %v6013_v50  ;;  %v8027_v50 = vld [vmem:[#allocation33_spill] sm:$0xff] }
 0x442   :  { %1788 = vmatpush1.msra.mxu0 %v5713_v32  ;;  %1859 = vmatpush1.msra.mxu1 %v5715_v33 }
 0x443   :  { %1789 = vmatprep.subr.mxu0 %v5719_v34  ;;  %1860 = vmatprep.subr.mxu1 %v5721_v35 }
 0x444   :  { %1790 = vmatpush1.msra.mxu0 %v5725_v36  ;;  %1861 = vmatpush1.msra.mxu1 %v5727_v38 }
 0x445   :  { %1791 = vmatprep.subr.mxu0 %v5731_v39  ;;  %1862 = vmatprep.subr.mxu1 %v5733_v40 }
 0x446   :  { %1792 = vmatpush1.msra.mxu0 %v5737_v41  ;;  %1863 = vmatpush1.msra.mxu1 %v5739_v42 }
 0x447   :  { %1793 = vmatprep.subr.mxu0 %v5743_v43  ;;  %1864 = vmatprep.subr.mxu1 %v5745_v44 }
 0x448   :  { %1794 = vmatpush1.msra.mxu0 %v5749_v45  ;;  %1865 = vmatpush1.msra.mxu1 %v5751_v51 }
 0x449   :  { %1795 = vmatprep.subr.mxu0 %v5755_v6  ;;  %1866 = vmatprep.subr.mxu1 %v5757_v60 }
 0x44a   :  { %1796 = vmatpush1.msra.mxu0 %v5761_v55  ;;  %1867 = vmatpush1.msra.mxu1 %v5763_v11 }
 0x44b   :  { %1797 = vmatprep.subr.mxu0 %v5767_v10  ;;  %1868 = vmatprep.subr.mxu1 %v5769_v58 }
 0x44c   :  { %1798 = vmatpush1.msra.mxu0 %v5773_v46  ;;  %1869 = vmatpush1.msra.mxu1 %v5775_v57 }
 0x44d   :  { %1799 = vmatprep.subr.mxu0 %v5779_v53  ;;  %1870 = vmatprep.subr.mxu1 %v5781_v5 }
 0x44e   :  { %1800 = vmatpush1.msra.mxu0 %v5785_v4  ;;  %1871 = vmatpush1.msra.mxu1 %v5787_v9 }
 0x44f   :  { %1801 = vmatprep.subr.mxu0 %v5791_v37  ;;  %1872 = vmatprep.subr.mxu1 %v5793_v7 }
 0x450   :  { %1802 = vmatpush1.msra.mxu0 %v5795_v13  ;;  %1873 = vmatpush1.msra.mxu1 %v5799_v14 }
 0x451   :  { %1803 = vmatprep.subr.mxu0 %v5801_v15  ;;  %1874 = vmatprep.subr.mxu1 %v5803_v16 }
 0x452   :  { %1804 = vmatpush1.msra.mxu0 %v5807_v17  ;;  %1875 = vmatpush1.msra.mxu1 %v5809_v18 }
 0x453   :  { %1805 = vmatprep.subr.mxu0 %v5811_v20  ;;  %1876 = vmatprep.subr.mxu1 %v5815_v21 }
 0x454   :  { %1806 = vmatpush1.msra.mxu0 %v5817_v22  ;;  %1877 = vmatpush1.msra.mxu1 %v5819_v23 }
 0x455   :  { %1807 = vmatprep.subr.mxu0 %v5823_v24  ;;  %1878 = vmatprep.subr.mxu1 %v5825_v25 }
 0x456   :  { %1808 = vmatpush1.msra.mxu0 %v5829_v27  ;;  %1879 = vmatpush1.msra.mxu1 %v5831_v29 }
 0x457   :  { %1809 = vmatprep.subr.mxu0 %v7976_v0  ;;  %1880 = vmatprep.subr.mxu1 %v8011_v54 }
 0x458   :  { %1810 = vmatpush1.msra.mxu0 %v8012_v52  ;;  %1881 = vmatpush1.msra.mxu1 %v8013_v2 }
 0x459   :  { %1811 = vmatprep.subr.mxu0 %v8014_v8  ;;  %1882 = vmatprep.subr.mxu1 %v8015_v61 }
 0x45a   :  { %1812 = vmatpush1.msra.mxu0 %v8016_v47  ;;  %1883 = vmatpush1.msra.mxu1 %v8017_v56  ;;  %v8028_v56 = vld [vmem:[#allocation34_spill] sm:$0xff] }
 0x45b   :  { %1813 = vmatprep.subr.mxu0 %v8018_v19  ;;  %1884 = vmatprep.subr.mxu1 %v8019_v48  ;;  %v8029_v19 = vmov 0.0   ;;  %v8030_v48 = vld [vmem:[#allocation35_spill] sm:$0xff] }
 0x45c   :  { %1814 = vmatpush1.msra.mxu0 %v8020_v3  ;;  %1885 = vmatpush1.msra.mxu1 %v8021_v28  ;;  %v8031_v28 = vld [vmem:[#allocation14_spill] sm:$0xff] }
 0x45d   :  { %1815 = vmatprep.subr.mxu0 %v8022_v59  ;;  %1886 = vmatprep.subr.mxu1 %v8023_v12  ;;  %v8032_v59 = vld [vmem:[#allocation15_spill] sm:$0xff] }
 0x45e   :  { %1816 = vmatpush1.msra.mxu0 %v8024_v26  ;;  %1887 = vmatpush1.msra.mxu1 %v8025_v63  ;;  %v8033_v26 = vld [vmem:[#allocation63_spill] sm:$0xff] }
 0x45f   :  { %1817 = vmatprep.subr.mxu0 %v8026_v49  ;;  %1888 = vmatprep.subr.mxu1 %v8027_v50  ;;  %v8035_v50 = vld [vmem:[#allocation54_spill] sm:$0xff] }
 0x460   :  { %1818 = vmatpush1.msra.mxu0 %v8028_v56  ;;  %1851 = vmatprep.mubr.f32.mxu0 %v8029_v19  ;;  %v8036_v56 = vsel %vm5416_vm2, %v8001_v62, %v8035_v50 }
 0x461   :  { %1889 = vmatpush1.msra.mxu1 %v8030_v48  ;;  %1922 = vmatprep.mubr.f32.mxu1 %v8029_v19 }
 0x462   :  { %2037 = vmatprep.subr.mxu0 %v8031_v28  ;;  %2108 = vmatprep.subr.mxu1 %v8032_v59  ;;  %v8038_v28 = vld [vmem:[#allocation60_spill] sm:$0xff]  ;;  %v8039_v59 = vld [vmem:[#allocation55_spill] sm:$0xff] }
 0x463   :  { %v8040_v52 = vsel %vm5438_vm4, %v8038_v28, %v8039_v59 }
 0x501   :  { %v1603_v12 = vpop.f32.mrf.mxu0  ;;  %v1674_v8 = vpop.f32.mrf.mxu1 }
 0x502   :  { %v1604_v3 = vadd.f32 %v1603_v12, %v8033_v26 }
 0x503   :  { %v1605_v63 = vpop.f32.mrf.mxu0  ;;  %v1676_v19 = vpop.f32.mrf.mxu1 }
 0x504   :  { %v4446_v47 = vmul.f32 -1.442695, %v1604_v3  ;;  %v1606_v61 = vadd.f32 %v1605_v63, %v8036_v56  ;;  %v1677_v54 = vadd.f32 %v1676_v19, %v8040_v52  ;;  %v8042_v3 = vsel %vm5420_vm3, %v8008_v31, %v8007_v1 }
 0x505   :  { %v1675_v26 = vadd.f32 %v1674_v8, %v8042_v3 }
 0x506   :  { %4607 = vpow2.f32 %v4446_v47  ;;  %v4447_v48 = vmul.f32 -1.442695, %v1606_v61  ;;  %v4448_v49 = vmul.f32 -1.442695, %v1677_v54 }
 0x508   :  { %4609 = vpow2.f32 %v4447_v48 }
 0x509   :  { %4611 = vtanh.f32 %v1675_v26 }
 0x50a   :  { %4613 = vpow2.f32 %v4448_v49 }
 0x513   :  { %v4608_v62 = vpop.eup %4607 }
 0x514   :  { %v1682_v50 = vadd.f32 1.0, %v4608_v62 }
 0x515   :  { %v4610_v47 = vpop.eup %4609 }
 0x516   :  { %4615 = vrcp.f32 %v1682_v50  ;;  %v1688_v61 = vadd.f32 1.0, %v4610_v47  ;;  %v4612_v56 = vpop.eup %4611 }
 0x517   :  { %v4614_v48 = vpop.eup %4613 }
 0x518   :  { %4617 = vrcp.f32 %v1688_v61  ;;  %v1695_v19 = vadd.f32 1.0, %v4614_v48 }
 0x51a   :  { %4619 = vrcp.f32 %v1695_v19 }
 0x523   :  { %v4616_v63 = vpop.eup %4615 }
 0x524   :  { %v1699_v28 = vmul.f32 %v4616_v63, %v4612_v56 }
 0x525   :  { %v4618_v52 = vpop.eup %4617 }
 0x526   :  { %v1698_v59 = vmul.f32 %v4618_v52, %v6010_v30 }
 0x527   :  { %v4620_v1 = vpop.eup %4619 }
 0x528   :  { %v6102_v12 = vadd.f32 %v1699_v28, %v1698_v59  ;;  %v8076_v59 = vld [vmem:[#allocation79_spill] sm:$0xff] }
 0x52a   :  { %4621 = vtanh.f32 %v6102_v12 }
 0x537   :  { %v4622_v31 = vpop.eup %4621 }
 0x538   :  { %v6105_v54 = vmul.f32 %v4622_v31, %v4620_v1  ;;  %v2284_v1 = vld [vmem:[#allocation6 + $0x1e8] sm:$0xff]  ;;  %v2286_v31 = vld [vmem:[#allocation6 + $0x1f8] sm:$0xff] }
 0x53a   :  { %1704 = vst.msk [vmem:[#allocation3 + $0x20] sm:$0xff] %vm697_vm5, %v6105_v54  ;;  %1852 = vmatmul.mubr.f32.vlgmr.msra.gmra.mxu0 %v6105_v54  ;;  %1923 = vmatmul.mubr.f32.vlgmr.msra.gmra.mxu1 %v6105_v54 }
 0x53b   :  { %2038 = vmatpush1.msra.mxu0 %v5713_v32  ;;  %2109 = vmatpush1.msra.mxu1 %v5715_v33  ;;  %v8043_v32 = vld [vmem:[#allocation17_spill] sm:$0xff]  ;;  %v8044_v33 = vld [vmem:[#allocation18_spill] sm:$0xff] }
 0x53c   :  { %2039 = vmatprep.subr.mxu0 %v5719_v34  ;;  %2110 = vmatprep.subr.mxu1 %v5721_v35  ;;  %v8045_v34 = vld [vmem:[#allocation19_spill] sm:$0xff]  ;;  %v8046_v35 = vld [vmem:[#allocation20_spill] sm:$0xff] }
 0x53d   :  { %2040 = vmatpush1.msra.mxu0 %v5725_v36  ;;  %2111 = vmatpush1.msra.mxu1 %v5727_v38  ;;  %v8047_v36 = vld [vmem:[#allocation21_spill] sm:$0xff]  ;;  %v8048_v38 = vld [vmem:[#allocation22_spill] sm:$0xff] }
 0x53e   :  { %2041 = vmatprep.subr.mxu0 %v5731_v39  ;;  %2112 = vmatprep.subr.mxu1 %v5733_v40  ;;  %v8049_v39 = vld [vmem:[#allocation23_spill] sm:$0xff]  ;;  %v8050_v40 = vld [vmem:[#allocation24_spill] sm:$0xff] }
 0x53f   :  { %2042 = vmatpush1.msra.mxu0 %v5737_v41  ;;  %2113 = vmatpush1.msra.mxu1 %v5739_v42  ;;  %v8051_v41 = vld [vmem:[#allocation25_spill] sm:$0xff]  ;;  %v8052_v42 = vld [vmem:[#allocation26_spill] sm:$0xff] }
 0x540   :  { %2043 = vmatprep.subr.mxu0 %v5743_v43  ;;  %2114 = vmatprep.subr.mxu1 %v5745_v44  ;;  %v8053_v43 = vld [vmem:[#allocation27_spill] sm:$0xff]  ;;  %v8054_v44 = vld [vmem:[#allocation28_spill] sm:$0xff] }
 0x541   :  { %2044 = vmatpush1.msra.mxu0 %v5749_v45  ;;  %2115 = vmatpush1.msra.mxu1 %v5751_v51  ;;  %v8055_v45 = vld [vmem:[#allocation29_spill] sm:$0xff]  ;;  %v8056_v51 = vld [vmem:[#allocation30_spill] sm:$0xff] }
 0x542   :  { %2045 = vmatprep.subr.mxu0 %v5755_v6  ;;  %2116 = vmatprep.subr.mxu1 %v5757_v60  ;;  %v8057_v6 = vld [vmem:[#allocation31_spill] sm:$0xff]  ;;  %v8058_v60 = vld [vmem:[#allocation32_spill] sm:$0xff] }
 0x543   :  { %2046 = vmatpush1.msra.mxu0 %v5761_v55  ;;  %2117 = vmatpush1.msra.mxu1 %v5763_v11  ;;  %v8059_v55 = vld [vmem:[#allocation33_spill] sm:$0xff]  ;;  %v8060_v11 = vld [vmem:[#allocation34_spill] sm:$0xff] }
 0x544   :  { %2047 = vmatprep.subr.mxu0 %v5767_v10  ;;  %2118 = vmatprep.subr.mxu1 %v5769_v58  ;;  %v8061_v10 = vmov 0.0   ;;  %v8062_v58 = vld [vmem:[#allocation35_spill] sm:$0xff] }
 0x545   :  { %2048 = vmatpush1.msra.mxu0 %v5773_v46  ;;  %2119 = vmatpush1.msra.mxu1 %v5775_v57  ;;  %v8063_v57 = vld [vmem:[#allocation67_spill] sm:$0xff] }
 0x546   :  { %2049 = vmatprep.subr.mxu0 %v5779_v53  ;;  %2120 = vmatprep.subr.mxu1 %v5781_v5 }
 0x547   :  { %2050 = vmatpush1.msra.mxu0 %v5785_v4  ;;  %2121 = vmatpush1.msra.mxu1 %v5787_v9  ;;  %v6458_v9 = vld [vmem:[#allocation10 + $0x20] sm:$0xff] }
 0x548   :  { %2051 = vmatprep.subr.mxu0 %v5791_v37  ;;  %2122 = vmatprep.subr.mxu1 %v5793_v7  ;;  %v8065_v37 = vld [vmem:[#allocation65_spill] sm:$0xff]  ;;  %v8066_v7 = vld [vmem:[#allocation51_spill] sm:$0xff]  ;;  %8127 = vst [vmem:[#allocation27_spill] sm:$0xff] %v6458_v9 }
 0x549   :  { %2052 = vmatpush1.msra.mxu0 %v5795_v13  ;;  %2123 = vmatpush1.msra.mxu1 %v5799_v14  ;;  %v8067_v13 = vsel %vm5416_vm2, %v8065_v37, %v8066_v7  ;;  %v2261_v37 = vld [vmem:[#allocation6 + $0x130] sm:$0xff]  ;;  %v2256_v7 = vld [vmem:[#allocation6 + $0x108] sm:$0xff] }
 0x54a   :  { %2053 = vmatprep.subr.mxu0 %v5801_v15  ;;  %2124 = vmatprep.subr.mxu1 %v5803_v16 }
 0x54b   :  { %2054 = vmatpush1.msra.mxu0 %v5807_v17  ;;  %2125 = vmatpush1.msra.mxu1 %v5809_v18  ;;  %v8068_v18 = vld [vmem:[#allocation66_spill] sm:$0xff] }
 0x54c   :  { %2055 = vmatprep.subr.mxu0 %v5811_v20  ;;  %2126 = vmatprep.subr.mxu1 %v5815_v21  ;;  %v8069_v20 = vld [vmem:[#allocation52_spill] sm:$0xff] }
 0x54d   :  { %2056 = vmatpush1.msra.mxu0 %v5817_v22  ;;  %2127 = vmatpush1.msra.mxu1 %v5819_v23  ;;  %v8070_v21 = vsel %vm5438_vm4, %v8068_v18, %v8069_v20  ;;  %v2251_v18 = vld [vmem:[#allocation6 + $0xe0] sm:$0xff]  ;;  %v2253_v20 = vld [vmem:[#allocation6 + $0xf0] sm:$0xff] }
 0x54e   :  { %2057 = vmatprep.subr.mxu0 %v5823_v24  ;;  %2128 = vmatprep.subr.mxu1 %v5825_v25  ;;  %v8072_v24 = vld [vmem:[#allocation64_spill] sm:$0xff]  ;;  %v8073_v25 = vld [vmem:[#allocation49_spill] sm:$0xff]  ;;  %v6460_v23 = vld [vmem:[#allocation10 + $0x30] sm:$0xff] }
 0x54f   :  { %2058 = vmatpush1.msra.mxu0 %v5829_v27  ;;  %2129 = vmatpush1.msra.mxu1 %v5831_v29  ;;  %v8074_v27 = vsel %vm5420_vm3, %v8072_v24, %v8073_v25  ;;  %v2247_v24 = vld [vmem:[#allocation6 + $0xc0] sm:$0xff]  ;;  %v2249_v25 = vld [vmem:[#allocation6 + $0xd0] sm:$0xff]  ;;  %8128 = vst [vmem:[#allocation28_spill] sm:$0xff] %v6460_v23 }
 0x550   :  { %2059 = vmatprep.subr.mxu0 %v7976_v0  ;;  %2130 = vmatprep.subr.mxu1 %v8043_v32  ;;  %v2283_v32 = vld [vmem:[#allocation6 + $0x1e0] sm:$0xff] }
 0x551   :  { %2060 = vmatpush1.msra.mxu0 %v8044_v33  ;;  %2131 = vmatpush1.msra.mxu1 %v8045_v34  ;;  %v2285_v33 = vld [vmem:[#allocation6 + $0x1f0] sm:$0xff]  ;;  %v2280_v34 = vld [vmem:[#allocation6 + $0x1c8] sm:$0xff] }
 0x552   :  { %2061 = vmatprep.subr.mxu0 %v8046_v35  ;;  %2132 = vmatprep.subr.mxu1 %v8047_v36  ;;  %v2282_v35 = vld [vmem:[#allocation6 + $0x1d8] sm:$0xff]  ;;  %v2279_v36 = vld [vmem:[#allocation6 + $0x1c0] sm:$0xff] }
 0x553   :  { %2062 = vmatpush1.msra.mxu0 %v8048_v38  ;;  %2133 = vmatpush1.msra.mxu1 %v8049_v39  ;;  %v2276_v38 = vld [vmem:[#allocation6 + $0x1a8] sm:$0xff]  ;;  %v2278_v39 = vld [vmem:[#allocation6 + $0x1b8] sm:$0xff] }
 0x554   :  { %2063 = vmatprep.subr.mxu0 %v8050_v40  ;;  %2134 = vmatprep.subr.mxu1 %v8051_v41  ;;  %v2275_v40 = vld [vmem:[#allocation6 + $0x1a0] sm:$0xff]  ;;  %v2277_v41 = vld [vmem:[#allocation6 + $0x1b0] sm:$0xff] }
 0x555   :  { %2064 = vmatpush1.msra.mxu0 %v8052_v42  ;;  %2135 = vmatpush1.msra.mxu1 %v8053_v43  ;;  %v2272_v42 = vld [vmem:[#allocation6 + $0x188] sm:$0xff]  ;;  %v2274_v43 = vld [vmem:[#allocation6 + $0x198] sm:$0xff] }
 0x556   :  { %2065 = vmatprep.subr.mxu0 %v8054_v44  ;;  %2136 = vmatprep.subr.mxu1 %v8055_v45  ;;  %v2271_v44 = vld [vmem:[#allocation6 + $0x180] sm:$0xff]  ;;  %v2273_v45 = vld [vmem:[#allocation6 + $0x190] sm:$0xff] }
 0x557   :  { %2066 = vmatpush1.msra.mxu0 %v8056_v51  ;;  %2137 = vmatpush1.msra.mxu1 %v8057_v6  ;;  %v2268_v51 = vld [vmem:[#allocation6 + $0x168] sm:$0xff]  ;;  %v2270_v6 = vld [vmem:[#allocation6 + $0x178] sm:$0xff] }
 0x558   :  { %2067 = vmatprep.subr.mxu0 %v8058_v60  ;;  %2138 = vmatprep.subr.mxu1 %v8059_v55  ;;  %v2267_v60 = vld [vmem:[#allocation6 + $0x160] sm:$0xff]  ;;  %v2269_v55 = vld [vmem:[#allocation6 + $0x170] sm:$0xff] }
 0x559   :  { %2068 = vmatpush1.msra.mxu0 %v8060_v11  ;;  %2101 = vmatprep.mubr.f32.mxu0 %v8061_v10  ;;  %v2264_v11 = vld [vmem:[#allocation6 + $0x148] sm:$0xff] }
 0x55a   :  { %2139 = vmatpush1.msra.mxu1 %v8062_v58  ;;  %2172 = vmatprep.mubr.f32.mxu1 %v8061_v10  ;;  %v2266_v58 = vld [vmem:[#allocation6 + $0x158] sm:$0xff] }
 0x55b   :  { %2287 = vmatprep.subr.mxu0 %v2284_v1  ;;  %2358 = vmatprep.subr.mxu1 %v2286_v31  ;;  %v2227_v1 = vld [vmem:[#allocation6 + $0x20] sm:$0xff]  ;;  %v2229_v31 = vld [vmem:[#allocation6 + $0x30] sm:$0xff] }
 0x5fa   :  { %v1853_v46 = vpop.f32.mrf.mxu0  ;;  %v1924_v15 = vpop.f32.mrf.mxu1 }
 0x5fb   :  { %v1854_v53 = vadd.f32 %v1853_v46, %v8063_v57  ;;  %v1925_v29 = vadd.f32 %v1924_v15, %v8074_v27  ;;  %v2263_v46 = vld [vmem:[#allocation6 + $0x140] sm:$0xff]  ;;  %v2265_v57 = vld [vmem:[#allocation6 + $0x150] sm:$0xff]  ;;  %v2244_v27 = vld [vmem:[#allocation6 + $0xa8] sm:$0xff] }
 0x5fc   :  { %v1855_v5 = vpop.f32.mrf.mxu0  ;;  %v1926_v17 = vpop.f32.mrf.mxu1  ;;  %v2257_v15 = vld [vmem:[#allocation6 + $0x110] sm:$0xff] }
 0x5fd   :  { %v4449_v4 = vmul.f32 -1.442695, %v1854_v53  ;;  %v1856_v14 = vadd.f32 %v1855_v5, %v8067_v13  ;;  %v1927_v22 = vadd.f32 %v1926_v17, %v8070_v21  ;;  %v2260_v53 = vld [vmem:[#allocation6 + $0x128] sm:$0xff]  ;;  %v2262_v5 = vld [vmem:[#allocation6 + $0x138] sm:$0xff] }
 0x5fe   :  { %v2258_v13 = vld [vmem:[#allocation6 + $0x118] sm:$0xff]  ;;  %v2248_v21 = vld [vmem:[#allocation6 + $0xc8] sm:$0xff] }
 0x5ff   :  { %4623 = vpow2.f32 %v4449_v4  ;;  %v4450_v16 = vmul.f32 -1.442695, %v1856_v14  ;;  %v4451_v0 = vmul.f32 -1.442695, %v1927_v22  ;;  %v2259_v4 = vld [vmem:[#allocation6 + $0x120] sm:$0xff]  ;;  %v2254_v17 = vld [vmem:[#allocation6 + $0xf8] sm:$0xff] }
 0x600   :  { %v2255_v14 = vld [vmem:[#allocation6 + $0x100] sm:$0xff]  ;;  %v2250_v22 = vld [vmem:[#allocation6 + $0xd8] sm:$0xff] }
 0x601   :  { %4625 = vpow2.f32 %v4450_v16  ;;  %v2252_v16 = vld [vmem:[#allocation6 + $0xe8] sm:$0xff] }
 0x602   :  { %4627 = vtanh.f32 %v1925_v29  ;;  %v2246_v29 = vld [vmem:[#allocation6 + $0xb8] sm:$0xff] }
 0x603   :  { %4629 = vpow2.f32 %v4451_v0  ;;  %v2243_v0 = vld [vmem:[#allocation6 + $0xa0] sm:$0xff] }
 0x60c   :  { %v4624_v30 = vpop.eup %4623 }
 0x60d   :  { %v1932_v8 = vadd.f32 1.0, %v4624_v30  ;;  %v2245_v30 = vld [vmem:[#allocation6 + $0xb0] sm:$0xff] }
 0x60e   :  { %v4626_v49 = vpop.eup %4625 }
 0x60f   :  { %4631 = vrcp.f32 %v1932_v8  ;;  %v1938_v3 = vadd.f32 1.0, %v4626_v49  ;;  %v4628_v26 = vpop.eup %4627  ;;  %v2240_v8 = vld [vmem:[#allocation6 + $0x88] sm:$0xff]  ;;  %v2242_v49 = vld [vmem:[#allocation6 + $0x98] sm:$0xff] }
 0x610   :  { %v4630_v62 = vpop.eup %4629 }
 0x611   :  { %4633 = vrcp.f32 %v1938_v3  ;;  %v1945_v56 = vadd.f32 1.0, %v4630_v62  ;;  %v2239_v3 = vld [vmem:[#allocation6 + $0x80] sm:$0xff]  ;;  %v2236_v62 = vld [vmem:[#allocation6 + $0x68] sm:$0xff] }
 0x613   :  { %4635 = vrcp.f32 %v1945_v56  ;;  %v2232_v56 = vld [vmem:[#allocation6 + $0x48] sm:$0xff] }
 0x61c   :  { %v4632_v50 = vpop.eup %4631 }
 0x61d   :  { %v1949_v47 = vmul.f32 %v4632_v50, %v4628_v26  ;;  %v2241_v26 = vld [vmem:[#allocation6 + $0x90] sm:$0xff]  ;;  %v2238_v50 = vld [vmem:[#allocation6 + $0x78] sm:$0xff] }
 0x61e   :  { %v4634_v61 = vpop.eup %4633 }
 0x61f   :  { %v1948_v48 = vmul.f32 %v4634_v61, %v6102_v12  ;;  %v8075_v12 = vld [vmem:[#allocation36_spill] sm:$0xff]  ;;  %v2237_v61 = vld [vmem:[#allocation6 + $0x70] sm:$0xff] }
 0x620   :  { %v4636_v28 = vpop.eup %4635 }
 0x621   :  { %v6192_v63 = vadd.f32 %v1949_v47, %v1948_v48  ;;  %v2235_v47 = vld [vmem:[#allocation6 + $0x60] sm:$0xff]  ;;  %v2234_v48 = vld [vmem:[#allocation6 + $0x58] sm:$0xff] }
 0x623   :  { %4637 = vtanh.f32 %v6192_v63 }
 0x630   :  { %v4638_v52 = vpop.eup %4637 }
 0x631   :  { %v1952_v19 = vmul.f32 %v4638_v52, %v4636_v28  ;;  %v2231_v52 = vld [vmem:[#allocation6 + $0x40] sm:$0xff] }
 0x633   :  { %1956 = vrot.lane.b32.xlu1 %v1952_v19, %s4933_s3  ;;  %1954 = vst.msk [vmem:[#allocation3 + $0x28] sm:$0xff] %vm697_vm5, %v1952_v19  ;;  %2102 = vmatmul.mubr.f32.vlgmr.msra.gmra.mxu0 %v1952_v19 }
 0x634   :  { %2173 = vmatmul.mubr.f32.vlgmr.msra.gmra.mxu1 %v1952_v19  ;;  %2351 = vmatprep.mubr.f32.mxu0 %v8061_v10  ;;  %v2233_v19 = vld [vmem:[#allocation6 + $0x50] sm:$0xff] }
 0x635   :  { %2422 = vmatprep.mubr.f32.mxu1 %v8061_v10  ;;  %2288 = vmatpush1.msra.mxu0 %v2283_v32  ;;  %v2224_v32 = vld [vmem:[#allocation6 + $0x8] sm:$0xff] }
 0x636   :  { %2359 = vmatpush1.msra.mxu1 %v2285_v33  ;;  %2289 = vmatprep.subr.mxu0 %v2280_v34  ;;  %v2226_v33 = vld [vmem:[#allocation6 + $0x18] sm:$0xff] }
 0x637   :  { %1706 = vrot.lane.b32.xlu1 %v6105_v54, %s4933_s3  ;;  %2360 = vmatprep.subr.mxu1 %v2282_v35  ;;  %v2281_v54 = vld [vmem:[#allocation6 + $0x1d0] sm:$0xff]  ;;  %v2223_v35 = vld [vmem:[#allocation6] sm:$0xff] }
 0x638   :  { %2290 = vmatpush1.msra.mxu0 %v2279_v36  ;;  %2361 = vmatpush1.msra.mxu1 %v2281_v54  ;;  %v2225_v36 = vld [vmem:[#allocation6 + $0x10] sm:$0xff] }
 0x639   :  { %2291 = vmatprep.subr.mxu0 %v2276_v38  ;;  %2362 = vmatprep.subr.mxu1 %v2278_v39 }
 0x63a   :  { %2292 = vmatpush1.msra.mxu0 %v2275_v40  ;;  %2363 = vmatpush1.msra.mxu1 %v2277_v41  ;;  %v8077_v40 = vld [vmem:[#allocation71_spill] sm:$0xff] }
 0x63b   :  { %1204 = vrot.lane.b32.xlu1 %v8075_v12, %s4933_s3  ;;  %2293 = vmatprep.subr.mxu0 %v2272_v42  ;;  %v2228_v12 = vld [vmem:[#allocation6 + $0x28] sm:$0xff] }
 0x63c   :  { %2364 = vmatprep.subr.mxu1 %v2274_v43  ;;  %2294 = vmatpush1.msra.mxu0 %v2271_v44  ;;  %v8078_v44 = vld [vmem:[#allocation69_spill] sm:$0xff] }
 0x63d   :  { %2365 = vmatpush1.msra.mxu1 %v2273_v45  ;;  %2295 = vmatprep.subr.mxu0 %v2268_v51  ;;  %v8079_v45 = vld [vmem:[#allocation47_spill] sm:$0xff] }
 0x63e   :  { %2366 = vmatprep.subr.mxu1 %v2270_v6  ;;  %2296 = vmatpush1.msra.mxu0 %v2267_v60  ;;  %v8080_v51 = vsel %vm5416_vm2, %v8078_v44, %v8079_v45 }
 0x63f   :  { %700 = vrot.lane.b32.xlu1 %v8076_v59, %s4933_s3  ;;  %2367 = vmatpush1.msra.mxu1 %v2269_v55  ;;  %v2230_v59 = vld [vmem:[#allocation6 + $0x38] sm:$0xff] }
 0x640   :  { %2297 = vmatprep.subr.mxu0 %v2264_v11  ;;  %2368 = vmatprep.subr.mxu1 %v2266_v58  ;;  %v8081_v58 = vld [vmem:[#allocation70_spill] sm:$0xff] }
 0x641   :  { %2298 = vmatpush1.msra.mxu0 %v2263_v46  ;;  %2369 = vmatpush1.msra.mxu1 %v2265_v57  ;;  %v8082_v46 = vld [vmem:[#allocation48_spill] sm:$0xff] }
 0x642   :  { %2299 = vmatprep.subr.mxu0 %v2260_v53  ;;  %2370 = vmatprep.subr.mxu1 %v2262_v5  ;;  %v8083_v57 = vsel %vm5438_vm4, %v8081_v58, %v8082_v46  ;;  %v8084_v5 = vld [vmem:[#allocation68_spill] sm:$0xff]  ;;  %v8097_v58 = vld [vmem:[#allocation37_spill] sm:$0xff]  ;;  %v2577_v46 = vld [vmem:[#allocation8 + $0x1e8] sm:$0xff] }
 0x643   :  { %2300 = vmatpush1.msra.mxu0 %v2259_v4  ;;  %2371 = vmatpush1.msra.mxu1 %v2261_v37  ;;  %v8085_v4 = vld [vmem:[#allocation46_spill] sm:$0xff] }
 0x644   :  { %2301 = vmatprep.subr.mxu0 %v2256_v7  ;;  %2372 = vmatprep.subr.mxu1 %v2258_v13  ;;  %v8086_v37 = vsel %vm5420_vm3, %v8084_v5, %v8085_v4  ;;  %v8098_v5 = vld [vmem:[#allocation13_spill] sm:$0xff]  ;;  %v2578_v4 = vld [vmem:[#allocation8 + $0x1f0] sm:$0xff] }
 0x645   :  { %2302 = vmatpush1.msra.mxu0 %v2255_v14  ;;  %2373 = vmatpush1.msra.mxu1 %v2257_v15 }
 0x646   :  { %2303 = vmatprep.subr.mxu0 %v2252_v16  ;;  %2374 = vmatprep.subr.mxu1 %v2254_v17 }
 0x647   :  { %2304 = vmatpush1.msra.mxu0 %v2251_v18  ;;  %2375 = vmatpush1.msra.mxu1 %v2253_v20 }
 0x648   :  { %2305 = vmatprep.subr.mxu0 %v2248_v21  ;;  %2376 = vmatprep.subr.mxu1 %v2250_v22 }
 0x649   :  { %2306 = vmatpush1.msra.mxu0 %v2247_v24  ;;  %2377 = vmatpush1.msra.mxu1 %v2249_v25 }
 0x64a   :  { %2307 = vmatprep.subr.mxu0 %v2244_v27  ;;  %2378 = vmatprep.subr.mxu1 %v2246_v29 }
 0x64b   :  { %2308 = vmatpush1.msra.mxu0 %v2243_v0  ;;  %2379 = vmatpush1.msra.mxu1 %v2245_v30 }
 0x64c   :  { %2309 = vmatprep.subr.mxu0 %v2240_v8  ;;  %2380 = vmatprep.subr.mxu1 %v2242_v49 }
 0x64d   :  { %2310 = vmatpush1.msra.mxu0 %v2239_v3  ;;  %2381 = vmatpush1.msra.mxu1 %v2241_v26  ;;  %v8087_v3 = vld [vmem:[#allocation78_spill] sm:$0xff] }
 0x64e   :  { %2311 = vmatprep.subr.mxu0 %v2236_v62  ;;  %2382 = vmatprep.subr.mxu1 %v2238_v50 }
 0x64f   :  { %2312 = vmatpush1.msra.mxu0 %v2235_v47  ;;  %2383 = vmatpush1.msra.mxu1 %v2237_v61  ;;  %v8089_v47 = vld [vmem:[#allocation74_spill] sm:$0xff] }
 0x650   :  { %2313 = vmatprep.subr.mxu0 %v2232_v56  ;;  %2384 = vmatprep.subr.mxu1 %v2234_v48 }
 0x651   :  { %2314 = vmatpush1.msra.mxu0 %v2231_v52  ;;  %2385 = vmatpush1.msra.mxu1 %v2233_v19  ;;  %v8091_v19 = vld [vmem:[#allocation77_spill] sm:$0xff] }
 0x652   :  { %2315 = vmatprep.subr.mxu0 %v2228_v12  ;;  %2386 = vmatprep.subr.mxu1 %v2230_v59  ;;  %v8092_v12 = vld [vmem:[#allocation75_spill] sm:$0xff] }
 0x653   :  { %2316 = vmatpush1.msra.mxu0 %v2227_v1  ;;  %2387 = vmatpush1.msra.mxu1 %v2229_v31  ;;  %v8093_v59 = vsel %vm5438_vm4, %v8091_v19, %v8092_v12  ;;  %v8094_v31 = vld [vmem:[#allocation72_spill] sm:$0xff]  ;;  %v2544_v19 = vld [vmem:[#allocation8 + $0xe0] sm:$0xff]  ;;  %v2546_v12 = vld [vmem:[#allocation8 + $0xf0] sm:$0xff] }
 0x654   :  { %2317 = vmatprep.subr.mxu0 %v2224_v32  ;;  %2388 = vmatprep.subr.mxu1 %v2226_v33  ;;  %v8095_v32 = vld [vmem:[#allocation73_spill] sm:$0xff] }
 0x655   :  { %2318 = vmatpush1.msra.mxu0 %v2223_v35  ;;  %2389 = vmatpush1.msra.mxu1 %v2225_v36  ;;  %v8096_v33 = vsel %vm5420_vm3, %v8094_v31, %v8095_v32  ;;  %v2540_v31 = vld [vmem:[#allocation8 + $0xc0] sm:$0xff]  ;;  %v2542_v32 = vld [vmem:[#allocation8 + $0xd0] sm:$0xff] }
 0x656   :  { %2602 = vmatprep.subr.mxu0 %v2577_v46  ;;  %v2522_v46 = vld [vmem:[#allocation8 + $0x30] sm:$0xff] }
 0x6a5   :  { %v1957_v28 = vpop.permute.xlu1 %1956 }
 0x6a6   :  { %1960 = vst.msk [vmem:[#allocation4 + $0x10] sm:$0xff] %vm697_vm5, %v1957_v28 }
 0x6a9   :  { %v1707_v34 = vpop.permute.xlu1 %1706 }
 0x6aa   :  { %1710 = vst.msk [vmem:[#allocation4 + $0x18] sm:$0xff] %vm697_vm5, %v1707_v34 }
 0x6ad   :  { %v1205_v54 = vpop.permute.xlu1 %1204 }
 0x6ae   :  { %1208 = vst.msk [vmem:[#allocation4 + $0x28] sm:$0xff] %vm697_vm5, %v1205_v54 }
 0x6b1   :  { %v701_v38 = vpop.permute.xlu1 %700 }
 0x6b2   :  { %704 = vst.msk [vmem:[#allocation4 + $0x38] sm:$0xff] %vm697_vm5, %v701_v38 }
 0x6f3   :  { %v2103_v39 = vpop.f32.mrf.mxu0 }
 0x6f4   :  { %v2104_v41 = vadd.f32 %v2103_v39, %v8077_v40  ;;  %v2174_v60 = vpop.f32.mrf.mxu1 }
 0x6f5   :  { %v2105_v42 = vpop.f32.mrf.mxu0  ;;  %v2175_v7 = vadd.f32 %v2174_v60, %v8086_v37  ;;  %v2573_v37 = vld [vmem:[#allocation8 + $0x1c8] sm:$0xff] }
 0x6f6   :  { %v4452_v43 = vmul.f32 -1.442695, %v2104_v41  ;;  %v2106_v6 = vadd.f32 %v2105_v42, %v8080_v51  ;;  %v2176_v11 = vpop.f32.mrf.mxu1 }
 0x6f7   :  { %v2177_v53 = vadd.f32 %v2176_v11, %v8083_v57  ;;  %v2579_v57 = vld [vmem:[#allocation8 + $0x1f8] sm:$0xff] }
 0x6f8   :  { %4639 = vpow2.f32 %v4452_v43  ;;  %v4453_v55 = vmul.f32 -1.442695, %v2106_v6  ;;  %2715 = vmatprep.subr.mxu1 %v2579_v57  ;;  %v2517_v57 = vld [vmem:[#allocation8 + $0x8] sm:$0xff] }
 0x6f9   :  { %v4454_v13 = vmul.f32 -1.442695, %v2177_v53  ;;  %v2576_v53 = vld [vmem:[#allocation8 + $0x1e0] sm:$0xff] }
 0x6fa   :  { %4641 = vpow2.f32 %v4453_v55 }
 0x6fb   :  { %4643 = vtanh.f32 %v2175_v7  ;;  %v2575_v7 = vld [vmem:[#allocation8 + $0x1d8] sm:$0xff] }
 0x6fc   :  { %4645 = vpow2.f32 %v4454_v13  ;;  %v2572_v13 = vld [vmem:[#allocation8 + $0x1c0] sm:$0xff] }
 0x705   :  { %v4640_v14 = vpop.eup %4639 }
 0x706   :  { %v2182_v15 = vadd.f32 1.0, %v4640_v14  ;;  %v2574_v14 = vld [vmem:[#allocation8 + $0x1d0] sm:$0xff] }
 0x707   :  { %v4642_v16 = vpop.eup %4641 }
 0x708   :  { %4647 = vrcp.f32 %v2182_v15  ;;  %v2188_v17 = vadd.f32 1.0, %v4642_v16  ;;  %v4644_v18 = vpop.eup %4643  ;;  %v2569_v15 = vld [vmem:[#allocation8 + $0x1a8] sm:$0xff]  ;;  %v2571_v16 = vld [vmem:[#allocation8 + $0x1b8] sm:$0xff] }
 0x709   :  { %v4646_v20 = vpop.eup %4645 }
 0x70a   :  { %4649 = vrcp.f32 %v2188_v17  ;;  %v2195_v25 = vadd.f32 1.0, %v4646_v20  ;;  %v2568_v17 = vld [vmem:[#allocation8 + $0x1a0] sm:$0xff]  ;;  %v2565_v20 = vld [vmem:[#allocation8 + $0x188] sm:$0xff] }
 0x70c   :  { %4651 = vrcp.f32 %v2195_v25  ;;  %v2561_v25 = vld [vmem:[#allocation8 + $0x168] sm:$0xff] }
 0x715   :  { %v4648_v21 = vpop.eup %4647 }
 0x716   :  { %v2199_v22 = vmul.f32 %v4648_v21, %v4644_v18  ;;  %v2570_v18 = vld [vmem:[#allocation8 + $0x1b0] sm:$0xff]  ;;  %v2567_v21 = vld [vmem:[#allocation8 + $0x198] sm:$0xff] }
 0x717   :  { %v4650_v24 = vpop.eup %4649 }
 0x718   :  { %v2198_v27 = vmul.f32 %v4650_v24, %v6192_v63  ;;  %v8088_v63 = vld [vmem:[#allocation76_spill] sm:$0xff]  ;;  %v2566_v24 = vld [vmem:[#allocation8 + $0x190] sm:$0xff] }
 0x719   :  { %v4652_v0 = vpop.eup %4651  ;;  %v8090_v61 = vsel %vm5416_vm2, %v8088_v63, %v8089_v47  ;;  %v2554_v63 = vld [vmem:[#allocation8 + $0x130] sm:$0xff]  ;;  %v2549_v47 = vld [vmem:[#allocation8 + $0x108] sm:$0xff] }
 0x71a   :  { %v2200_v29 = vadd.f32 %v2199_v22, %v2198_v27  ;;  %v2564_v22 = vld [vmem:[#allocation8 + $0x180] sm:$0xff]  ;;  %v2563_v27 = vld [vmem:[#allocation8 + $0x178] sm:$0xff] }
 0x71c   :  { %4653 = vtanh.f32 %v2200_v29 }
 0x729   :  { %v4654_v30 = vpop.eup %4653 }
 0x72a   :  { %v2202_v8 = vmul.f32 %v4654_v30, %v4652_v0  ;;  %v2562_v0 = vld [vmem:[#allocation8 + $0x170] sm:$0xff]  ;;  %v2557_v30 = vld [vmem:[#allocation8 + $0x148] sm:$0xff] }
 0x72c   :  { %2204 = vst.msk [vmem:[#allocation3 + $0x30] sm:$0xff] %vm697_vm5, %v2202_v8  ;;  %2352 = vmatmul.mubr.f32.vlgmr.msra.gmra.mxu0 %v2202_v8  ;;  %2423 = vmatmul.mubr.f32.vlgmr.msra.gmra.mxu1 %v2202_v8 }
 0x72d   :  { %2666 = vmatprep.mubr.f32.mxu0 %v8061_v10  ;;  %2779 = vmatprep.mubr.f32.mxu1 %v8061_v10 }
 0x72e   :  { %2603 = vmatpush1.msra.mxu0 %v2576_v53  ;;  %2716 = vmatpush1.msra.mxu1 %v2578_v4  ;;  %v2519_v53 = vld [vmem:[#allocation8 + $0x18] sm:$0xff]  ;;  %v2518_v4 = vld [vmem:[#allocation8 + $0x10] sm:$0xff] }
 0x72f   :  { %2604 = vmatprep.subr.mxu0 %v2573_v37  ;;  %2717 = vmatprep.subr.mxu1 %v2575_v7  ;;  %v6252_v37 = vld [vmem:[#allocation10 + $0x1e8] sm:$0xff]  ;;  %v6254_v7 = vld [vmem:[#allocation10 + $0x1f8] sm:$0xff] }
 0x730   :  { %2605 = vmatpush1.msra.mxu0 %v2572_v13  ;;  %2718 = vmatpush1.msra.mxu1 %v2574_v14  ;;  %8099 = vst [vmem:[#allocation38_spill] sm:$0xff] %v6252_v37  ;;  %8100 = vst [vmem:[#allocation39_spill] sm:$0xff] %v6254_v7 }
 0x731   :  { %2606 = vmatprep.subr.mxu0 %v2569_v15  ;;  %2719 = vmatprep.subr.mxu1 %v2571_v16 }
 0x732   :  { %2607 = vmatpush1.msra.mxu0 %v2568_v17  ;;  %2720 = vmatpush1.msra.mxu1 %v2570_v18  ;;  %v2470_v18 = vld [vmem:[#allocation4 + $0x10] sm:$0xff] }
 0x733   :  { %2608 = vmatprep.subr.mxu0 %v2565_v20  ;;  %2721 = vmatprep.subr.mxu1 %v2567_v21  ;;  %v2471_v21 = vld [vmem:[#allocation4 + $0x18] sm:$0xff] }
 0x734   :  { %2609 = vmatpush1.msra.mxu0 %v2564_v22  ;;  %2722 = vmatpush1.msra.mxu1 %v2566_v24  ;;  %v2473_v24 = vld [vmem:[#allocation4 + $0x28] sm:$0xff] }
 0x735   :  { %2610 = vmatprep.subr.mxu0 %v2561_v25  ;;  %2723 = vmatprep.subr.mxu1 %v2563_v27  ;;  %v2475_v27 = vld [vmem:[#allocation4 + $0x38] sm:$0xff] }
 0x736   :  { %2724 = vmatpush1.msra.mxu1 %v2562_v0  ;;  %v2460_v0 = vld [vmem:[#allocation3] sm:$0xff] }
 0x7ec   :  { %v2353_v49 = vpop.f32.mrf.mxu0  ;;  %v2424_v48 = vpop.f32.mrf.mxu1 }
 0x7ed   :  { %v2354_v26 = vadd.f32 %v2353_v49, %v8087_v3  ;;  %v2425_v34 = vadd.f32 %v2424_v48, %v8096_v33  ;;  %v2556_v49 = vld [vmem:[#allocation8 + $0x140] sm:$0xff]  ;;  %v2558_v3 = vld [vmem:[#allocation8 + $0x150] sm:$0xff]  ;;  %v2537_v33 = vld [vmem:[#allocation8 + $0xa8] sm:$0xff] }
 0x7ee   :  { %v2355_v62 = vpop.f32.mrf.mxu0  ;;  %v2426_v52 = vpop.f32.mrf.mxu1  ;;  %v2550_v48 = vld [vmem:[#allocation8 + $0x110] sm:$0xff] }
 0x7ef   :  { %v4455_v50 = vmul.f32 -1.442695, %v2354_v26  ;;  %v2356_v56 = vadd.f32 %v2355_v62, %v8090_v61  ;;  %v2427_v1 = vadd.f32 %v2426_v52, %v8093_v59  ;;  %v2553_v26 = vld [vmem:[#allocation8 + $0x128] sm:$0xff]  ;;  %v2555_v62 = vld [vmem:[#allocation8 + $0x138] sm:$0xff] }
 0x7f0   :  { %v2551_v61 = vld [vmem:[#allocation8 + $0x118] sm:$0xff]  ;;  %v2541_v59 = vld [vmem:[#allocation8 + $0xc8] sm:$0xff] }
 0x7f1   :  { %4655 = vpow2.f32 %v4455_v50  ;;  %v4456_v28 = vmul.f32 -1.442695, %v2356_v56  ;;  %v4457_v35 = vmul.f32 -1.442695, %v2427_v1  ;;  %v2552_v50 = vld [vmem:[#allocation8 + $0x120] sm:$0xff]  ;;  %v2547_v52 = vld [vmem:[#allocation8 + $0xf8] sm:$0xff] }
 0x7f2   :  { %v2548_v56 = vld [vmem:[#allocation8 + $0x100] sm:$0xff]  ;;  %v2543_v1 = vld [vmem:[#allocation8 + $0xd8] sm:$0xff] }
 0x7f3   :  { %4657 = vpow2.f32 %v4456_v28  ;;  %v2545_v28 = vld [vmem:[#allocation8 + $0xe8] sm:$0xff] }
 0x7f4   :  { %4659 = vtanh.f32 %v2425_v34  ;;  %v2539_v34 = vld [vmem:[#allocation8 + $0xb8] sm:$0xff] }
 0x7f5   :  { %4661 = vpow2.f32 %v4457_v35  ;;  %v2536_v35 = vld [vmem:[#allocation8 + $0xa0] sm:$0xff] }
 0x7fe   :  { %v4656_v36 = vpop.eup %4655 }
 0x7ff   :  { %v2432_v54 = vadd.f32 1.0, %v4656_v36  ;;  %v2538_v36 = vld [vmem:[#allocation8 + $0xb0] sm:$0xff] }
 0x800   :  { %v4658_v38 = vpop.eup %4657 }
 0x801   :  { %4663 = vrcp.f32 %v2432_v54  ;;  %v2438_v39 = vadd.f32 1.0, %v4658_v38  ;;  %v4660_v40 = vpop.eup %4659  ;;  %v2533_v54 = vld [vmem:[#allocation8 + $0x88] sm:$0xff]  ;;  %v2535_v38 = vld [vmem:[#allocation8 + $0x98] sm:$0xff] }
 0x802   :  { %v4662_v41 = vpop.eup %4661 }
 0x803   :  { %4665 = vrcp.f32 %v2438_v39  ;;  %v2445_v45 = vadd.f32 1.0, %v4662_v41  ;;  %v2532_v39 = vld [vmem:[#allocation8 + $0x80] sm:$0xff]  ;;  %v2529_v41 = vld [vmem:[#allocation8 + $0x68] sm:$0xff] }
 0x805   :  { %4667 = vrcp.f32 %v2445_v45  ;;  %v2525_v45 = vld [vmem:[#allocation8 + $0x48] sm:$0xff] }
 0x80e   :  { %v4664_v42 = vpop.eup %4663 }
 0x80f   :  { %v2449_v43 = vmul.f32 %v4664_v42, %v4660_v40  ;;  %v2534_v40 = vld [vmem:[#allocation8 + $0x90] sm:$0xff]  ;;  %v2531_v42 = vld [vmem:[#allocation8 + $0x78] sm:$0xff] }
 0x810   :  { %v4666_v44 = vpop.eup %4665 }
 0x811   :  { %v2448_v51 = vmul.f32 %v4666_v44, %v2200_v29  ;;  %v2560_v29 = vld [vmem:[#allocation8 + $0x160] sm:$0xff]  ;;  %v2530_v44 = vld [vmem:[#allocation8 + $0x70] sm:$0xff] }
 0x812   :  { %v4668_v60 = vpop.eup %4667  ;;  %2611 = vmatpush1.msra.mxu0 %v2560_v29 }
 0x813   :  { %v2450_v6 = vadd.f32 %v2449_v43, %v2448_v51  ;;  %2612 = vmatprep.subr.mxu0 %v2557_v30  ;;  %v2528_v43 = vld [vmem:[#allocation8 + $0x60] sm:$0xff]  ;;  %v2527_v51 = vld [vmem:[#allocation8 + $0x58] sm:$0xff] }
 0x814   :  { %2613 = vmatpush1.msra.mxu0 %v2556_v49  ;;  %v6270_v30 = vld [vmem:[#allocation10 + $0x1e0] sm:$0xff] }
 0x815   :  { %4669 = vtanh.f32 %v2450_v6  ;;  %2614 = vmatprep.subr.mxu0 %v2553_v26  ;;  %v2524_v6 = vld [vmem:[#allocation8 + $0x40] sm:$0xff]  ;;  %v6277_v26 = vld [vmem:[#allocation10 + $0x1d8] sm:$0xff] }
 0x816   :  { %2615 = vmatpush1.msra.mxu0 %v2552_v50  ;;  %v6283_v50 = vld [vmem:[#allocation10 + $0x1d0] sm:$0xff] }
 0x817   :  { %2616 = vmatprep.subr.mxu0 %v2549_v47  ;;  %v2461_v47 = vld [vmem:[#allocation3 + $0x8] sm:$0xff] }
 0x818   :  { %2617 = vmatpush1.msra.mxu0 %v2548_v56  ;;  %v6290_v56 = vld [vmem:[#allocation10 + $0x1a8] sm:$0xff] }
 0x819   :  { %2618 = vmatprep.subr.mxu0 %v2545_v28  ;;  %v6296_v28 = vld [vmem:[#allocation10 + $0x1a0] sm:$0xff] }
 0x81a   :  { %2619 = vmatpush1.msra.mxu0 %v2544_v19  ;;  %v6300_v19 = vld [vmem:[#allocation10 + $0x188] sm:$0xff] }
 0x81b   :  { %2620 = vmatprep.subr.mxu0 %v2541_v59 }
 0x81c   :  { %2621 = vmatpush1.msra.mxu0 %v2540_v31  ;;  %v6310_v31 = vld [vmem:[#allocation10 + $0x190] sm:$0xff] }
 0x81d   :  { %2622 = vmatprep.subr.mxu0 %v2537_v33  ;;  %v6316_v33 = vld [vmem:[#allocation10 + $0x168] sm:$0xff] }
 0x81e   :  { %2623 = vmatpush1.msra.mxu0 %v2536_v35 }
 0x81f   :  { %2624 = vmatprep.subr.mxu0 %v2533_v54  ;;  %v6325_v54 = vld [vmem:[#allocation10 + $0x170] sm:$0xff] }
 0x820   :  { %2625 = vmatpush1.msra.mxu0 %v2532_v39  ;;  %v6329_v39 = vld [vmem:[#allocation10 + $0x158] sm:$0xff] }
 0x821   :  { %2626 = vmatprep.subr.mxu0 %v2529_v41  ;;  %v6335_v41 = vld [vmem:[#allocation10 + $0x140] sm:$0xff] }
 0x822   :  { %v4670_v55 = vpop.eup %4669  ;;  %2627 = vmatpush1.msra.mxu0 %v2528_v43  ;;  %v2463_v43 = vld [vmem:[#allocation3 + $0x18] sm:$0xff] }
 0x823   :  { %v2452_v11 = vmul.f32 %v4670_v55, %v4668_v60  ;;  %v2526_v60 = vld [vmem:[#allocation8 + $0x50] sm:$0xff]  ;;  %v2521_v55 = vld [vmem:[#allocation8 + $0x28] sm:$0xff]  ;;  %2628 = vmatprep.subr.mxu0 %v2525_v45  ;;  %v6345_v45 = vld [vmem:[#allocation10 + $0x138] sm:$0xff] }
 0x824   :  { %2629 = vmatpush1.msra.mxu0 %v2524_v6  ;;  %v6350_v6 = vld [vmem:[#allocation10 + $0x120] sm:$0xff] }
 0x825   :  { %2456 = vrot.lane.b32.xlu0 %v2452_v11, %s4933_s3  ;;  %2454 = vst.msk [vmem:[#allocation3 + $0x38] sm:$0xff] %vm697_vm5, %v2452_v11  ;;  %v2523_v11 = vld [vmem:[#allocation8 + $0x38] sm:$0xff]  ;;  %2630 = vmatprep.subr.mxu0 %v2521_v55  ;;  %v6354_v55 = vld [vmem:[#allocation10 + $0x108] sm:$0xff] }
 0x829   :  { %2206 = vrot.lane.b32.xlu0 %v2202_v8, %s4933_s3  ;;  %v2559_v8 = vld [vmem:[#allocation8 + $0x158] sm:$0xff] }
 0x82a   :  { %2725 = vmatprep.subr.mxu1 %v2559_v8  ;;  %v6272_v8 = vld [vmem:[#allocation10 + $0x1f0] sm:$0xff] }
 0x82b   :  { %2726 = vmatpush1.msra.mxu1 %v2558_v3  ;;  %v6275_v3 = vld [vmem:[#allocation10 + $0x1c8] sm:$0xff] }
 0x82c   :  { %2727 = vmatprep.subr.mxu1 %v2555_v62  ;;  %v6281_v62 = vld [vmem:[#allocation10 + $0x1c0] sm:$0xff] }
 0x82d   :  { %1456 = vrot.lane.b32.xlu0 %v8097_v58, %s4933_s3  ;;  %2728 = vmatpush1.msra.mxu1 %v2554_v63  ;;  %v2520_v58 = vld [vmem:[#allocation8 + $0x20] sm:$0xff] }
 0x82e   :  { %2729 = vmatprep.subr.mxu1 %v2551_v61  ;;  %2631 = vmatpush1.msra.mxu0 %v2520_v58 }
 0x82f   :  { %2730 = vmatpush1.msra.mxu1 %v2550_v48  ;;  %2632 = vmatprep.subr.mxu0 %v2517_v57  ;;  %v6292_v48 = vld [vmem:[#allocation10 + $0x1b8] sm:$0xff]  ;;  %v6364_v57 = vld [vmem:[#allocation10 + $0x110] sm:$0xff] }
 0x830   :  { %2731 = vmatprep.subr.mxu1 %v2547_v52  ;;  %v6298_v52 = vld [vmem:[#allocation10 + $0x1b0] sm:$0xff] }
 0x831   :  { %952 = vrot.lane.b32.xlu0 %v8098_v5, %s4933_s3  ;;  %2732 = vmatpush1.msra.mxu1 %v2546_v12  ;;  %v2516_v5 = vld [vmem:[#allocation8] sm:$0xff]  ;;  %v6302_v12 = vld [vmem:[#allocation10 + $0x198] sm:$0xff] }
 0x832   :  { %2733 = vmatprep.subr.mxu1 %v2543_v1  ;;  %2633 = vmatpush1.msra.mxu0 %v2516_v5  ;;  %v6308_v1 = vld [vmem:[#allocation10 + $0x180] sm:$0xff]  ;;  %v6370_v5 = vld [vmem:[#allocation10 + $0xe8] sm:$0xff] }
 0x833   :  { %2734 = vmatpush1.msra.mxu1 %v2542_v32  ;;  %2936 = vmatprep.subr.mxu0 %v6252_v37  ;;  %v2462_v32 = vld [vmem:[#allocation3 + $0x10] sm:$0xff]  ;;  %8101 = vst [vmem:[#allocation40_spill] sm:$0xff] %v6370_v5 }
 0x834   :  { %2735 = vmatprep.subr.mxu1 %v2539_v34  ;;  %v6318_v34 = vld [vmem:[#allocation10 + $0x178] sm:$0xff] }
 0x835   :  { %2736 = vmatpush1.msra.mxu1 %v2538_v36  ;;  %v6323_v36 = vld [vmem:[#allocation10 + $0x160] sm:$0xff] }
 0x836   :  { %2737 = vmatprep.subr.mxu1 %v2535_v38  ;;  %v6327_v38 = vld [vmem:[#allocation10 + $0x148] sm:$0xff] }
 0x837   :  { %2738 = vmatpush1.msra.mxu1 %v2534_v40 }
 0x838   :  { %2739 = vmatprep.subr.mxu1 %v2531_v42  ;;  %v6337_v42 = vld [vmem:[#allocation10 + $0x150] sm:$0xff] }
 0x839   :  { %2740 = vmatpush1.msra.mxu1 %v2530_v44  ;;  %v6343_v44 = vld [vmem:[#allocation10 + $0x128] sm:$0xff] }
 0x83a   :  { %2741 = vmatprep.subr.mxu1 %v2527_v51 }
 0x83b   :  { %2742 = vmatpush1.msra.mxu1 %v2526_v60  ;;  %v6352_v60 = vld [vmem:[#allocation10 + $0x130] sm:$0xff] }
 0x83c   :  { %2743 = vmatprep.subr.mxu1 %v2523_v11  ;;  %v6356_v11 = vld [vmem:[#allocation10 + $0x118] sm:$0xff] }
 0x83d   :  { %2744 = vmatpush1.msra.mxu1 %v2522_v46  ;;  %v6362_v46 = vld [vmem:[#allocation10 + $0x100] sm:$0xff] }
 0x83e   :  { %2745 = vmatprep.subr.mxu1 %v2519_v53  ;;  %v2464_v53 = vld [vmem:[#allocation3 + $0x20] sm:$0xff] }
 0x83f   :  { %2746 = vmatpush1.msra.mxu1 %v2518_v4  ;;  %v6372_v4 = vld [vmem:[#allocation10 + $0xf8] sm:$0xff] }
 0x840   :  { %3007 = vmatprep.subr.mxu1 %v6254_v7  ;;  %8102 = vst [vmem:[#allocation41_spill] sm:$0xff] %v6372_v4 }
 0x897   :  { %v2457_v13 = vpop.permute.xlu0 %2456 }
 0x898   :  { %2459 = vst.msk [vmem:[#allocation4] sm:$0xff] %vm697_vm5, %v2457_v13 }
 0x89b   :  { %v2207_v14 = vpop.permute.xlu0 %2206 }
 0x89c   :  { %2210 = vst.msk [vmem:[#allocation4 + $0x8] sm:$0xff] %vm697_vm5, %v2207_v14  ;;  %v6377_v14 = vld [vmem:[#allocation10 + $0xe0] sm:$0xff] }
 0x89d   :  { %8103 = vst [vmem:[#allocation42_spill] sm:$0xff] %v6377_v14 }
 0x89f   :  { %v1457_v15 = vpop.permute.xlu0 %1456  ;;  %v2468_v16 = vld [vmem:[#allocation4] sm:$0xff] }
 0x8a0   :  { %1460 = vst.msk [vmem:[#allocation4 + $0x20] sm:$0xff] %vm697_vm5, %v1457_v15  ;;  %2484 = vrot.lane.b32.xlu0 %v2468_v16, %s4933_s3  ;;  %v6379_v15 = vld [vmem:[#allocation10 + $0xf0] sm:$0xff]  ;;  %v6381_v16 = vld [vmem:[#allocation10 + $0xc8] sm:$0xff] }
 0x8a1   :  { %8104 = vst [vmem:[#allocation43_spill] sm:$0xff] %v6379_v15  ;;  %8105 = vst [vmem:[#allocation44_spill] sm:$0xff] %v6381_v16 }
 0x8a3   :  { %v953_v17 = vpop.permute.xlu0 %952  ;;  %v2469_v20 = vld [vmem:[#allocation4 + $0x8] sm:$0xff] }
 0x8a4   :  { %956 = vst.msk [vmem:[#allocation4 + $0x30] sm:$0xff] %vm697_vm5, %v953_v17  ;;  %2488 = vrot.lane.b32.xlu0 %v2470_v18, %s4933_s3  ;;  %2486 = vrot.lane.b32.xlu1 %v2469_v20, %s4933_s3  ;;  %v6383_v17 = vld [vmem:[#allocation10 + $0xd8] sm:$0xff]  ;;  %v6389_v20 = vld [vmem:[#allocation10 + $0xc0] sm:$0xff] }
 0x8a5   :  { %8106 = vst [vmem:[#allocation16_spill] sm:$0xff] %v6383_v17  ;;  %8107 = vst [vmem:[#allocation61_spill] sm:$0xff] %v6389_v20 }
 0x8a7   :  { %v2472_v22 = vld [vmem:[#allocation4 + $0x20] sm:$0xff] }
 0x8a8   :  { %2490 = vrot.lane.b32.xlu1 %v2471_v21, %s4933_s3  ;;  %2492 = vrot.lane.b32.xlu0 %v2472_v22, %s4933_s3  ;;  %v6391_v21 = vld [vmem:[#allocation10 + $0xd0] sm:$0xff]  ;;  %v2465_v22 = vld [vmem:[#allocation3 + $0x28] sm:$0xff] }
 0x8a9   :  { %8108 = vst [vmem:[#allocation59_spill] sm:$0xff] %v6391_v21 }
 0x8ab   :  { %v2474_v25 = vld [vmem:[#allocation4 + $0x30] sm:$0xff] }
 0x8ac   :  { %2494 = vrot.lane.b32.xlu1 %v2473_v24, %s4933_s3  ;;  %2496 = vrot.lane.b32.xlu0 %v2474_v25, %s4933_s3  ;;  %v6397_v24 = vld [vmem:[#allocation10 + $0xa8] sm:$0xff]  ;;  %v6399_v25 = vld [vmem:[#allocation10 + $0xb8] sm:$0xff] }
 0x8ad   :  { %8109 = vst [vmem:[#allocation53_spill] sm:$0xff] %v6397_v24  ;;  %8110 = vst [vmem:[#allocation56_spill] sm:$0xff] %v6399_v25 }
 0x8b0   :  { %2498 = vrot.lane.b32.xlu1 %v2475_v27, %s4933_s3 }
 0x912   :  { %v2485_v29 = vpop.permute.xlu0 %2484 }
 0x913   :  { %v2508_v49 = vsel %vm697_vm5, %v2460_v0, %v2485_v29  ;;  %v6404_v29 = vld [vmem:[#allocation10 + $0xa0] sm:$0xff]  ;;  %v6406_v0 = vld [vmem:[#allocation10 + $0xb0] sm:$0xff] }
 0x914   :  { %2667 = vmatmul.mubr.f32.vlgmr.msra.gmra.mxu0 %v2508_v49  ;;  %2780 = vmatmul.mubr.f32.vlgmr.msra.gmra.mxu1 %v2508_v49  ;;  %8111 = vst [vmem:[#allocation14_spill] sm:$0xff] %v6404_v29  ;;  %8112 = vst [vmem:[#allocation15_spill] sm:$0xff] %v6406_v0  ;;  %v6408_v49 = vld [vmem:[#allocation10 + $0x88] sm:$0xff] }
 0x915   :  { %2937 = vmatpush1.msra.mxu0 %v6270_v30  ;;  %3008 = vmatpush1.msra.mxu1 %v6272_v8  ;;  %8113 = vst [vmem:[#allocation63_spill] sm:$0xff] %v6408_v49 }
 0x916   :  { %v2487_v63 = vpop.permute.xlu1 %2486  ;;  %2938 = vmatprep.subr.mxu0 %v6275_v3  ;;  %3009 = vmatprep.subr.mxu1 %v6277_v26  ;;  %v2489_v59 = vpop.permute.xlu0 %2488 }
 0x917   :  { %2672 = vmatprep.mubr.f32.mxu0 %v8061_v10  ;;  %2785 = vmatprep.mubr.f32.mxu1 %v8061_v10  ;;  %v2509_v61 = vsel %vm697_vm5, %v2461_v47, %v2487_v63  ;;  %v2510_v35 = vsel %vm697_vm5, %v2462_v32, %v2489_v59  ;;  %v6410_v63 = vld [vmem:[#allocation10 + $0x98] sm:$0xff]  ;;  %v6418_v59 = vld [vmem:[#allocation10 + $0x90] sm:$0xff] }
 0x918   :  { %2939 = vmatpush1.msra.mxu0 %v6281_v62  ;;  %3010 = vmatpush1.msra.mxu1 %v6283_v50  ;;  %8114 = vst [vmem:[#allocation54_spill] sm:$0xff] %v6410_v63  ;;  %8116 = vst [vmem:[#allocation55_spill] sm:$0xff] %v6418_v59  ;;  %v2466_v32 = vld [vmem:[#allocation3 + $0x30] sm:$0xff] }
 0x919   :  { %2673 = vmatmul.mubr.f32.gmra.mxu0 %v2509_v61  ;;  %2786 = vmatmul.mubr.f32.gmra.mxu1 %v2509_v61  ;;  %v6416_v61 = vld [vmem:[#allocation10 + $0x80] sm:$0xff] }
 0x91a   :  { %2940 = vmatprep.subr.mxu0 %v6290_v56  ;;  %3011 = vmatprep.subr.mxu1 %v6292_v48  ;;  %v2491_v40 = vpop.permute.xlu1 %2490  ;;  %v2493_v58 = vpop.permute.xlu0 %2492  ;;  %8115 = vst [vmem:[#allocation60_spill] sm:$0xff] %v6416_v61 }
 0x91b   :  { %2941 = vmatpush1.msra.mxu0 %v6296_v28  ;;  %3012 = vmatpush1.msra.mxu1 %v6298_v52  ;;  %v2511_v51 = vsel %vm697_vm5, %v2463_v43, %v2491_v40  ;;  %v2512_v13 = vsel %vm697_vm5, %v2464_v53, %v2493_v58  ;;  %v6426_v40 = vld [vmem:[#allocation10 + $0x78] sm:$0xff]  ;;  %v6433_v58 = vld [vmem:[#allocation10 + $0x70] sm:$0xff]  ;;  %v6435_v53 = vld [vmem:[#allocation10 + $0x48] sm:$0xff] }
 0x91c   :  { %2942 = vmatprep.subr.mxu0 %v6300_v19  ;;  %3013 = vmatprep.subr.mxu1 %v6302_v12  ;;  %8118 = vst [vmem:[#allocation18_spill] sm:$0xff] %v6426_v40  ;;  %8120 = vst [vmem:[#allocation20_spill] sm:$0xff] %v6433_v58 }
 0x91d   :  { %2678 = vmatprep.mubr.f32.mxu0 %v8061_v10  ;;  %2791 = vmatprep.mubr.f32.mxu1 %v8061_v10  ;;  %8121 = vst [vmem:[#allocation21_spill] sm:$0xff] %v6435_v53 }
 0x91e   :  { %2943 = vmatpush1.msra.mxu0 %v6308_v1  ;;  %3014 = vmatpush1.msra.mxu1 %v6310_v31  ;;  %v2495_v18 = vpop.permute.xlu1 %2494  ;;  %v2497_v47 = vpop.permute.xlu0 %2496 }
 0x91f   :  { %2679 = vmatmul.mubr.f32.gmra.mxu0 %v2510_v35  ;;  %2792 = vmatmul.mubr.f32.gmra.mxu1 %v2510_v35  ;;  %v2513_v27 = vsel %vm697_vm5, %v2465_v22, %v2495_v18  ;;  %v6424_v35 = vld [vmem:[#allocation10 + $0x68] sm:$0xff]  ;;  %v2514_v43 = vsel %vm697_vm5, %v2466_v32, %v2497_v47  ;;  %v6443_v22 = vld [vmem:[#allocation10 + $0x40] sm:$0xff]  ;;  %v2467_v47 = vld [vmem:[#allocation3 + $0x38] sm:$0xff] }
 0x920   :  { %2944 = vmatprep.subr.mxu0 %v6316_v33  ;;  %3015 = vmatprep.subr.mxu1 %v6318_v34  ;;  %8117 = vst [vmem:[#allocation17_spill] sm:$0xff] %v6424_v35  ;;  %8123 = vst [vmem:[#allocation23_spill] sm:$0xff] %v6443_v22  ;;  %v6451_v32 = vld [vmem:[#allocation10 + $0x28] sm:$0xff] }
 0x921   :  { %2945 = vmatpush1.msra.mxu0 %v6323_v36  ;;  %3016 = vmatpush1.msra.mxu1 %v6325_v54  ;;  %8125 = vst [vmem:[#allocation25_spill] sm:$0xff] %v6451_v32 }
 0x922   :  { %2946 = vmatprep.subr.mxu0 %v6327_v38  ;;  %3017 = vmatprep.subr.mxu1 %v6329_v39  ;;  %v2499_v18 = vpop.permute.xlu1 %2498 }
 0x923   :  { %2684 = vmatprep.mubr.f32.mxu0 %v8061_v10  ;;  %2797 = vmatprep.mubr.f32.mxu1 %v8061_v10  ;;  %v2515_v2 = vsel %vm697_vm5, %v2467_v47, %v2499_v18  ;;  %v6472_v18 = vld [vmem:[#allocation10 + $0x10] sm:$0xff] }
 0x924   :  { %2947 = vmatpush1.msra.mxu0 %v6335_v41  ;;  %3018 = vmatpush1.msra.mxu1 %v6337_v42  ;;  %8132 = vst [vmem:[#allocation32_spill] sm:$0xff] %v6472_v18  ;;  %v8134_v47 = vld [vmem:[#allocation21_spill] sm:$0xff] }
 0x925   :  { %2685 = vmatmul.mubr.f32.gmra.mxu0 %v2511_v51  ;;  %2798 = vmatmul.mubr.f32.gmra.mxu1 %v2511_v51  ;;  %v6431_v51 = vld [vmem:[#allocation10 + $0x60] sm:$0xff] }
 0x926   :  { %2948 = vmatprep.subr.mxu0 %v6343_v44  ;;  %3019 = vmatprep.subr.mxu1 %v6345_v45  ;;  %8119 = vst [vmem:[#allocation19_spill] sm:$0xff] %v6431_v51 }
 0x927   :  { %2949 = vmatpush1.msra.mxu0 %v6350_v6  ;;  %3020 = vmatpush1.msra.mxu1 %v6352_v60 }
 0x928   :  { %2950 = vmatprep.subr.mxu0 %v6354_v55  ;;  %3021 = vmatprep.subr.mxu1 %v6356_v11 }
 0x929   :  { %2690 = vmatprep.mubr.f32.mxu0 %v8061_v10  ;;  %2803 = vmatprep.mubr.f32.mxu1 %v8061_v10 }
 0x92a   :  { %2951 = vmatpush1.msra.mxu0 %v6362_v46  ;;  %3022 = vmatpush1.msra.mxu1 %v6364_v57 }
 0x92b   :  { %2691 = vmatmul.mubr.f32.gmra.mxu0 %v2512_v13  ;;  %2804 = vmatmul.mubr.f32.gmra.mxu1 %v2512_v13  ;;  %v6437_v13 = vld [vmem:[#allocation10 + $0x58] sm:$0xff] }
 0x92c   :  { %2952 = vmatprep.subr.mxu0 %v6370_v5  ;;  %3023 = vmatprep.subr.mxu1 %v6372_v4  ;;  %8122 = vst [vmem:[#allocation22_spill] sm:$0xff] %v6437_v13 }
 0x92d   :  { %2953 = vmatpush1.msra.mxu0 %v6377_v14  ;;  %3024 = vmatpush1.msra.mxu1 %v6379_v15 }
 0x92e   :  { %2954 = vmatprep.subr.mxu0 %v6381_v16  ;;  %3025 = vmatprep.subr.mxu1 %v6383_v17 }
 0x92f   :  { %2696 = vmatprep.mubr.f32.mxu0 %v8061_v10  ;;  %2809 = vmatprep.mubr.f32.mxu1 %v8061_v10 }
 0x930   :  { %2955 = vmatpush1.msra.mxu0 %v6389_v20  ;;  %3026 = vmatpush1.msra.mxu1 %v6391_v21 }
 0x931   :  { %2697 = vmatmul.mubr.f32.gmra.mxu0 %v2513_v27  ;;  %2810 = vmatmul.mubr.f32.gmra.mxu1 %v2513_v27  ;;  %v6445_v27 = vld [vmem:[#allocation10 + $0x50] sm:$0xff] }
 0x932   :  { %2956 = vmatprep.subr.mxu0 %v6397_v24  ;;  %3027 = vmatprep.subr.mxu1 %v6399_v25  ;;  %8124 = vst [vmem:[#allocation24_spill] sm:$0xff] %v6445_v27 }
 0x933   :  { %2957 = vmatpush1.msra.mxu0 %v6404_v29  ;;  %3028 = vmatpush1.msra.mxu1 %v6406_v0 }
 0x934   :  { %2958 = vmatprep.subr.mxu0 %v6408_v49  ;;  %3029 = vmatprep.subr.mxu1 %v6410_v63 }
 0x935   :  { %2702 = vmatprep.mubr.f32.mxu0 %v8061_v10  ;;  %2815 = vmatprep.mubr.f32.mxu1 %v8061_v10 }
 0x936   :  { %2959 = vmatpush1.msra.mxu0 %v6416_v61  ;;  %3030 = vmatpush1.msra.mxu1 %v6418_v59 }
 0x937   :  { %2703 = vmatmul.mubr.f32.gmra.mxu0 %v2514_v43  ;;  %2816 = vmatmul.mubr.f32.gmra.mxu1 %v2514_v43  ;;  %v6453_v43 = vld [vmem:[#allocation10 + $0x38] sm:$0xff] }
 0x938   :  { %2960 = vmatprep.subr.mxu0 %v6424_v35  ;;  %3031 = vmatprep.subr.mxu1 %v6426_v40  ;;  %8126 = vst [vmem:[#allocation26_spill] sm:$0xff] %v6453_v43 }
 0x939   :  { %2961 = vmatpush1.msra.mxu0 %v6431_v51  ;;  %3032 = vmatpush1.msra.mxu1 %v6433_v58  ;;  %v6468_v58 = vld [vmem:[#allocation10] sm:$0xff] }
 0x93a   :  { %2962 = vmatprep.subr.mxu0 %v6435_v53  ;;  %3033 = vmatprep.subr.mxu1 %v6437_v13  ;;  %v6462_v13 = vld [vmem:[#allocation10 + $0x8] sm:$0xff]  ;;  %v6464_v53 = vld [vmem:[#allocation10 + $0x18] sm:$0xff]  ;;  %8131 = vst [vmem:[#allocation31_spill] sm:$0xff] %v6468_v58 }
 0x93b   :  { %2708 = vmatprep.mubr.f32.mxu0 %v8061_v10  ;;  %2821 = vmatprep.mubr.f32.mxu1 %v8061_v10  ;;  %8129 = vst [vmem:[#allocation29_spill] sm:$0xff] %v6462_v13  ;;  %8130 = vst [vmem:[#allocation30_spill] sm:$0xff] %v6464_v53 }
 0x93c   :  { %2963 = vmatpush1.msra.mxu0 %v6443_v22  ;;  %3034 = vmatpush1.msra.mxu1 %v6445_v27 }
 0x93d   :  { %2709 = vmatmul.mubr.f32.gmra.mxu0 %v2515_v2  ;;  %2822 = vmatmul.mubr.f32.gmra.mxu1 %v2515_v2  ;;  %v8133_v2 = vld [vmem:[#allocation20_spill] sm:$0xff] }
 0x93e   :  { %2964 = vmatprep.subr.mxu0 %v6451_v32  ;;  %3035 = vmatprep.subr.mxu1 %v6453_v43 }
 0x93f   :  { %2965 = vmatpush1.msra.mxu0 %v6458_v9  ;;  %3036 = vmatpush1.msra.mxu1 %v6460_v23 }
 0x940   :  { %2966 = vmatprep.subr.mxu0 %v6462_v13  ;;  %3037 = vmatprep.subr.mxu1 %v6464_v53 }
 0x941   :  { %2967 = vmatpush1.msra.mxu0 %v6468_v58  ;;  %3000 = vmatprep.mubr.f32.mxu0 %v8061_v10 }
 0x942   :  { %3038 = vmatpush1.msra.mxu1 %v6472_v18  ;;  %3071 = vmatprep.mubr.f32.mxu1 %v8061_v10 }
 0x943   :  { %3001 = vmatmul.mubr.f32.vlgmr.msra.gmra.mxu0 %v8061_v10  ;;  %3072 = vmatmul.mubr.f32.vlgmr.msra.gmra.mxu1 %v8061_v10 }
 0x944   :  { %3114 = vmatprep.subr.mxu0 %v6252_v37  ;;  %3185 = vmatprep.subr.mxu1 %v6254_v7 }
 0x945   :  { %3115 = vmatpush1.msra.mxu0 %v6270_v30  ;;  %3186 = vmatpush1.msra.mxu1 %v6272_v8 }
 0x946   :  { %3116 = vmatprep.subr.mxu0 %v6275_v3  ;;  %3187 = vmatprep.subr.mxu1 %v6277_v26 }
 0x947   :  { %3117 = vmatpush1.msra.mxu0 %v6281_v62  ;;  %3188 = vmatpush1.msra.mxu1 %v6283_v50 }
 0x948   :  { %3118 = vmatprep.subr.mxu0 %v6290_v56  ;;  %3189 = vmatprep.subr.mxu1 %v6292_v48 }
 0x949   :  { %3119 = vmatpush1.msra.mxu0 %v6296_v28  ;;  %3190 = vmatpush1.msra.mxu1 %v6298_v52 }
 0x94a   :  { %3120 = vmatprep.subr.mxu0 %v6300_v19  ;;  %3191 = vmatprep.subr.mxu1 %v6302_v12 }
 0x94b   :  { %3121 = vmatpush1.msra.mxu0 %v6308_v1  ;;  %3192 = vmatpush1.msra.mxu1 %v6310_v31 }
 0x94c   :  { %3122 = vmatprep.subr.mxu0 %v6316_v33  ;;  %3193 = vmatprep.subr.mxu1 %v6318_v34 }
 0x94d   :  { %3123 = vmatpush1.msra.mxu0 %v6323_v36  ;;  %3194 = vmatpush1.msra.mxu1 %v6325_v54 }
 0x94e   :  { %3124 = vmatprep.subr.mxu0 %v6327_v38  ;;  %3195 = vmatprep.subr.mxu1 %v6329_v39 }
 0x94f   :  { %3125 = vmatpush1.msra.mxu0 %v6335_v41  ;;  %3196 = vmatpush1.msra.mxu1 %v6337_v42 }
 0x950   :  { %3126 = vmatprep.subr.mxu0 %v6343_v44  ;;  %3197 = vmatprep.subr.mxu1 %v6345_v45 }
 0x951   :  { %3127 = vmatpush1.msra.mxu0 %v6350_v6  ;;  %3198 = vmatpush1.msra.mxu1 %v6352_v60 }
 0x952   :  { %3128 = vmatprep.subr.mxu0 %v6354_v55  ;;  %3199 = vmatprep.subr.mxu1 %v6356_v11 }
 0x953   :  { %3129 = vmatpush1.msra.mxu0 %v6362_v46  ;;  %3200 = vmatpush1.msra.mxu1 %v6364_v57 }
 0x954   :  { %3130 = vmatprep.subr.mxu0 %v6370_v5  ;;  %3201 = vmatprep.subr.mxu1 %v6372_v4 }
 0x955   :  { %3131 = vmatpush1.msra.mxu0 %v6377_v14  ;;  %3202 = vmatpush1.msra.mxu1 %v6379_v15 }
 0x956   :  { %3132 = vmatprep.subr.mxu0 %v6381_v16  ;;  %3203 = vmatprep.subr.mxu1 %v6383_v17 }
 0x957   :  { %3133 = vmatpush1.msra.mxu0 %v6389_v20  ;;  %3204 = vmatpush1.msra.mxu1 %v6391_v21 }
 0x958   :  { %3134 = vmatprep.subr.mxu0 %v6397_v24  ;;  %3205 = vmatprep.subr.mxu1 %v6399_v25 }
 0x959   :  { %3135 = vmatpush1.msra.mxu0 %v6404_v29  ;;  %3206 = vmatpush1.msra.mxu1 %v6406_v0  ;;  %v8135_v29 = vld [vmem:[#allocation22_spill] sm:$0xff] }
 0x95a   :  { %3136 = vmatprep.subr.mxu0 %v6408_v49  ;;  %3207 = vmatprep.subr.mxu1 %v6410_v63 }
 0x95b   :  { %3137 = vmatpush1.msra.mxu0 %v6416_v61  ;;  %3208 = vmatpush1.msra.mxu1 %v6418_v59 }
 0x95c   :  { %3138 = vmatprep.subr.mxu0 %v6424_v35  ;;  %3209 = vmatprep.subr.mxu1 %v6426_v40 }
 0x95d   :  { %3139 = vmatpush1.msra.mxu0 %v6431_v51  ;;  %3210 = vmatpush1.msra.mxu1 %v8133_v2 }
 0x95e   :  { %3140 = vmatprep.subr.mxu0 %v8134_v47  ;;  %3211 = vmatprep.subr.mxu1 %v8135_v29 }
 0x95f   :  { %3141 = vmatpush1.msra.mxu0 %v6443_v22  ;;  %3212 = vmatpush1.msra.mxu1 %v6445_v27 }
 0x960   :  { %3142 = vmatprep.subr.mxu0 %v6451_v32  ;;  %3213 = vmatprep.subr.mxu1 %v6453_v43 }
 0x961   :  { %3143 = vmatpush1.msra.mxu0 %v6458_v9  ;;  %3214 = vmatpush1.msra.mxu1 %v6460_v23  ;;  %v8136_v23 = vld [vmem:[#allocation45_spill] sm:$0xff] }
 0x962   :  { %3144 = vmatprep.subr.mxu0 %v6462_v13  ;;  %3215 = vmatprep.subr.mxu1 %v6464_v53  ;;  %v2580_v53 = vld [vmem:[%s7534_s6] sm:$0xf]  ;;  %v8139_v22 = vsub.s32 1, %v8136_v23  ;;  %v8140_v47 = vsub.s32 3, %v8136_v23 }
 0x963   :  { %3145 = vmatpush1.msra.mxu0 %v6468_v58  ;;  %3178 = vmatprep.mubr.f32.mxu0 %v8061_v10 }
 0x964   :  { %3216 = vmatpush1.msra.mxu1 %v6472_v18  ;;  %3249 = vmatprep.mubr.f32.mxu1 %v8061_v10  ;;  %v8137_v18 = vsub.s32 0, %v8136_v23  ;;  %v6571_v29 = vrot.slane %v2580_v53, %v8139_v22  ;;  %v6575_v2 = vrot.slane %v2580_v53, %v8140_v47 }
 0x965   :  { %3292 = vmatprep.subr.mxu0 %v6252_v37  ;;  %3363 = vmatprep.subr.mxu1 %v6254_v7  ;;  %v8138_v37 = vsub.s32 2, %v8136_v23 }
 0x966   :  { %v6563_v32 = vrot.slane %v2580_v53, %v8137_v18 }
 0x967   :  { %v6567_v10 = vrot.slane %v2580_v53, %v8138_v37 }
 0x9d4   :  { %v6550_v43 = vpop.f32.mrf.mxu0  ;;  %v6552_v9 = vpop.f32.mrf.mxu1 }
 0x9d6   :  { %v6557_v13 = vpop.f32.mrf.mxu0  ;;  %v6559_v58 = vpop.f32.mrf.mxu1 }
 0x9d9   :  { %v2674_v7 = vpop.f32.mrf.mxu0  ;;  %v2787_v27 = vpop.f32.mrf.mxu1 }
 0x9da   :  { %v6578_v51 = vadd.f32 %v2674_v7, %v6563_v32  ;;  %v6581_v18 = vadd.f32 %v2787_v27, %v6567_v10 }
 0x9db   :  { %v2676_v40 = vpop.f32.mrf.mxu0  ;;  %v2789_v35 = vpop.f32.mrf.mxu1 }
 0x9dc   :  { %8141 = vst [vmem:[#allocation33_spill] sm:$0xff] %v6581_v18  ;;  %v6584_v37 = vadd.f32 %v2676_v40, %v6571_v29  ;;  %v6587_v59 = vadd.f32 %v2789_v35, %v6575_v2 }
 0x9de   :  { %8142 = vst [vmem:[#allocation34_spill] sm:$0xff] %v6584_v37  ;;  %8143 = vst [vmem:[#allocation35_spill] sm:$0xff] %v6587_v59 }
 0x9df   :  { %v2680_v22 = vpop.f32.mrf.mxu0  ;;  %v2793_v61 = vpop.f32.mrf.mxu1 }
 0x9e0   :  { %v2681_v23 = vadd.f32 %v2680_v22, %v6563_v32  ;;  %v6591_v53 = vadd.f32 %v2793_v61, %v6567_v10 }
 0x9e1   :  { %v2682_v7 = vpop.f32.mrf.mxu0  ;;  %v2795_v47 = vpop.f32.mrf.mxu1 }
 0x9e2   :  { %8144 = vst [vmem:[#allocation67_spill] sm:$0xff] %v6591_v53  ;;  %v6594_v27 = vadd.f32 %v2682_v7, %v6571_v29  ;;  %v6597_v63 = vadd.f32 %v2795_v47, %v6575_v2  ;;  %v6749_v53 = vadd.f32 %v6557_v13, %v6571_v29 }
 0x9e4   :  { %8145 = vst [vmem:[#allocation65_spill] sm:$0xff] %v6594_v27  ;;  %8146 = vst [vmem:[#allocation51_spill] sm:$0xff] %v6597_v63  ;;  %v8195_v63 = vld [vmem:[#allocation20_spill] sm:$0xff]  ;;  %v8197_v27 = vld [vmem:[#allocation22_spill] sm:$0xff] }
 0x9e5   :  { %v2686_v40 = vpop.f32.mrf.mxu0  ;;  %v2799_v49 = vpop.f32.mrf.mxu1  ;;  %8170 = vst [vmem:[#allocation73_spill] sm:$0xff] %v6749_v53 }
 0x9e6   :  { %v2687_v35 = vadd.f32 %v2686_v40, %v6563_v32  ;;  %v6601_v0 = vadd.f32 %v2799_v49, %v6567_v10 }
 0x9e7   :  { %v2688_v25 = vpop.f32.mrf.mxu0  ;;  %v2801_v22 = vpop.f32.mrf.mxu1 }
 0x9e8   :  { %8147 = vst [vmem:[#allocation66_spill] sm:$0xff] %v6601_v0  ;;  %v6604_v61 = vadd.f32 %v2688_v25, %v6571_v29  ;;  %v6607_v24 = vadd.f32 %v2801_v22, %v6575_v2 }
 0x9ea   :  { %8148 = vst [vmem:[#allocation52_spill] sm:$0xff] %v6604_v61  ;;  %8149 = vst [vmem:[#allocation64_spill] sm:$0xff] %v6607_v24  ;;  %v6745_v61 = vadd.f32 %v6552_v9, %v6567_v10 }
 0x9eb   :  { %v2692_v7 = vpop.f32.mrf.mxu0  ;;  %v2805_v21 = vpop.f32.mrf.mxu1 }
 0x9ec   :  { %v2693_v47 = vadd.f32 %v2692_v7, %v6563_v32  ;;  %v6611_v20 = vadd.f32 %v2805_v21, %v6567_v10  ;;  %8169 = vst [vmem:[#allocation72_spill] sm:$0xff] %v6745_v61 }
 0x9ed   :  { %v2694_v17 = vpop.f32.mrf.mxu0  ;;  %v2807_v40 = vpop.f32.mrf.mxu1 }
 0x9ee   :  { %8150 = vst [vmem:[#allocation49_spill] sm:$0xff] %v6611_v20  ;;  %v6614_v49 = vadd.f32 %v2694_v17, %v6571_v29  ;;  %v6617_v16 = vadd.f32 %v2807_v40, %v6575_v2  ;;  %v6621_v15 = vsel %vm128_vm1, %v2687_v35, %v2693_v47  ;;  %v6629_v21 = vsel %vm128_vm1, %v2693_v47, %v2687_v35 }
 0x9ef   :  { %8154 = vst [vmem:[#allocation71_spill] sm:$0xff] %v6621_v15  ;;  %8156 = vst [vmem:[#allocation69_spill] sm:$0xff] %v6629_v21 }
 0x9f0   :  { %8151 = vst [vmem:[#allocation36_spill] sm:$0xff] %v6614_v49  ;;  %8152 = vst [vmem:[#allocation79_spill] sm:$0xff] %v6617_v16 }
 0x9f1   :  { %v2698_v17 = vpop.f32.mrf.mxu0  ;;  %v2811_v7 = vpop.f32.mrf.mxu1 }
 0x9f2   :  { %v2699_v21 = vadd.f32 %v2698_v17, %v6563_v32  ;;  %v6653_v14 = vadd.f32 %v2811_v7, %v6567_v10 }
 0x9f3   :  { %v2700_v20 = vpop.f32.mrf.mxu0  ;;  %v2813_v0 = vpop.f32.mrf.mxu1 }
 0x9f4   :  { %8159 = vst [vmem:[#allocation47_spill] sm:$0xff] %v6653_v14  ;;  %v6656_v4 = vadd.f32 %v2700_v20, %v6571_v29  ;;  %v6659_v5 = vadd.f32 %v2813_v0, %v6575_v2  ;;  %v6663_v35 = vsel %vm128_vm1, %v2681_v23, %v2699_v21  ;;  %v6671_v7 = vsel %vm128_vm1, %v2699_v21, %v2681_v23 }
 0x9f5   :  { %8162 = vst [vmem:[#allocation68_spill] sm:$0xff] %v6663_v35  ;;  %8163 = vst [vmem:[#allocation46_spill] sm:$0xff] %v6671_v7  ;;  %v2669_v21 = vadd.f32 %v6550_v43, %v6563_v32  ;;  %v8198_v35 = vld [vmem:[#allocation23_spill] sm:$0xff] }
 0x9f6   :  { %8160 = vst [vmem:[#allocation70_spill] sm:$0xff] %v6656_v4  ;;  %8161 = vst [vmem:[#allocation48_spill] sm:$0xff] %v6659_v5  ;;  %v8194_v5 = vld [vmem:[#allocation19_spill] sm:$0xff]  ;;  %v8196_v4 = vld [vmem:[#allocation21_spill] sm:$0xff] }
 0x9f7   :  { %v2704_v20 = vpop.f32.mrf.mxu0  ;;  %v2817_v17 = vpop.f32.mrf.mxu1 }
 0x9f8   :  { %v2705_v7 = vadd.f32 %v2704_v20, %v6563_v32  ;;  %v6695_v0 = vadd.f32 %v2817_v17, %v6567_v10 }
 0x9f9   :  { %v2706_v16 = vpop.f32.mrf.mxu0  ;;  %v2819_v24 = vpop.f32.mrf.mxu1 }
 0x9fa   :  { %8164 = vst [vmem:[#allocation78_spill] sm:$0xff] %v6695_v0  ;;  %v6698_v47 = vadd.f32 %v2706_v16, %v6571_v29  ;;  %v6701_v49 = vadd.f32 %v2819_v24, %v6575_v2  ;;  %v6706_v23 = vsel %vm128_vm1, %v6578_v51, %v2705_v7  ;;  %v6715_v17 = vsel %vm128_vm1, %v2705_v7, %v6578_v51 }
 0x9fb   :  { %8167 = vst [vmem:[#allocation77_spill] sm:$0xff] %v6715_v17  ;;  %v6753_v7 = vadd.f32 %v6559_v58, %v6575_v2 }
 0x9fc   :  { %8165 = vst [vmem:[#allocation76_spill] sm:$0xff] %v6698_v47  ;;  %8166 = vst [vmem:[#allocation74_spill] sm:$0xff] %v6701_v49 }
 0x9fd   :  { %v2710_v16 = vpop.f32.mrf.mxu0  ;;  %v2823_v20 = vpop.f32.mrf.mxu1  ;;  %8171 = vst [vmem:[#allocation37_spill] sm:$0xff] %v6753_v7 }
 0x9fe   :  { %v2711_v17 = vadd.f32 %v2710_v16, %v6563_v32  ;;  %v6739_v24 = vadd.f32 %v2823_v20, %v6567_v10 }
 0x9ff   :  { %v2712_v51 = vpop.f32.mrf.mxu0  ;;  %v2825_v14 = vpop.f32.mrf.mxu1 }
 0xa00   :  { %8168 = vst [vmem:[#allocation75_spill] sm:$0xff] %v6739_v24  ;;  %v6756_v20 = vadd.f32 %v2712_v51, %v6571_v29  ;;  %v6759_v16 = vadd.f32 %v2825_v14, %v6575_v2  ;;  %v2868_v10 = vsel %vm128_vm1, %v2669_v21, %v2711_v17  ;;  %v6765_v9 = vsel %vm128_vm1, %v2711_v17, %v2669_v21 }
 0xa01   :  { %8174 = vst [vmem:[#allocation80_spill] sm:$0xff] %v6765_v9 }
 0xa02   :  { %8172 = vst [vmem:[#allocation13_spill] sm:$0xff] %v6756_v20  ;;  %8173 = vst [vmem:[#allocation45_spill] sm:$0xff] %v6759_v16  ;;  %v2869_v32 = vsel %vm5416_vm2, %v6749_v53, %v6756_v20  ;;  %v2871_v29 = vsel %vm5438_vm4, %v6753_v7, %v6759_v16  ;;  %v2870_v53 = vsel %vm5420_vm3, %v6745_v61, %v6739_v24  ;;  %v8192_v61 = vld [vmem:[#allocation17_spill] sm:$0xff]  ;;  %v8193_v24 = vld [vmem:[#allocation18_spill] sm:$0xff] }
 0xa03   :  { %v3002_v58 = vpop.f32.mrf.mxu0  ;;  %v3073_v51 = vpop.f32.mrf.mxu1 }
 0xa04   :  { %v3003_v43 = vadd.f32 %v3002_v58, %v2868_v10 }
 0xa05   :  { %v3004_v2 = vpop.f32.mrf.mxu0  ;;  %v3075_v14 = vpop.f32.mrf.mxu1 }
 0xa06   :  { %v4458_v21 = vmul.f32 -1.442695, %v3003_v43  ;;  %v3005_v17 = vadd.f32 %v3004_v2, %v2869_v32  ;;  %v3076_v25 = vadd.f32 %v3075_v14, %v2871_v29  ;;  %v3074_v43 = vadd.f32 %v3073_v51, %v2870_v53 }
 0xa08   :  { %4671 = vpow2.f32 %v4458_v21  ;;  %v4459_v13 = vmul.f32 -1.442695, %v3005_v17  ;;  %v4460_v10 = vmul.f32 -1.442695, %v3076_v25 }
 0xa0a   :  { %4673 = vpow2.f32 %v4459_v13 }
 0xa0b   :  { %4675 = vpow2.f32 %v4460_v10  ;;  %v8179_v10 = vld [vmem:[#allocation43_spill] sm:$0xff] }
 0xa15   :  { %v4672_v58 = vpop.eup %4671 }
 0xa16   :  { %v3081_v32 = vadd.f32 1.0, %v4672_v58  ;;  %v8180_v58 = vld [vmem:[#allocation44_spill] sm:$0xff] }
 0xa17   :  { %v4674_v2 = vpop.eup %4673 }
 0xa18   :  { %4677 = vrcp.f32 %v3081_v32  ;;  %v3087_v13 = vadd.f32 1.0, %v4674_v2  ;;  %v4676_v21 = vpop.eup %4675  ;;  %v8182_v32 = vld [vmem:[#allocation61_spill] sm:$0xff]  ;;  %v8183_v2 = vld [vmem:[#allocation59_spill] sm:$0xff] }
 0xa19   :  { %4679 = vtanh.f32 %v3074_v43  ;;  %v3094_v29 = vadd.f32 1.0, %v4676_v21  ;;  %v8181_v43 = vld [vmem:[#allocation16_spill] sm:$0xff] }
 0xa1a   :  { %4681 = vrcp.f32 %v3087_v13  ;;  %v8184_v13 = vld [vmem:[#allocation53_spill] sm:$0xff]  ;;  %v8185_v21 = vld [vmem:[#allocation56_spill] sm:$0xff] }
 0xa1b   :  { %4683 = vrcp.f32 %v3094_v29  ;;  %v8187_v29 = vld [vmem:[#allocation15_spill] sm:$0xff] }
 0xa25   :  { %v4678_v17 = vpop.eup %4677 }
 0xa26   :  { %v4680_v7 = vpop.eup %4679 }
 0xa27   :  { %v4682_v16 = vpop.eup %4681  ;;  %v3098_v20 = vmul.f32 %v4680_v7, %v4678_v17  ;;  %v8176_v7 = vld [vmem:[#allocation40_spill] sm:$0xff]  ;;  %v8186_v17 = vld [vmem:[#allocation14_spill] sm:$0xff] }
 0xa28   :  { %v3097_v14 = vmul.f32 0.0, %v4682_v16  ;;  %v4684_v53 = vpop.eup %4683  ;;  %v8178_v16 = vld [vmem:[#allocation42_spill] sm:$0xff] }
 0xa2a   :  { %v6791_v9 = vadd.f32 %v3098_v20, %v3097_v14  ;;  %v8177_v20 = vld [vmem:[#allocation41_spill] sm:$0xff]  ;;  %v8188_v14 = vld [vmem:[#allocation63_spill] sm:$0xff] }
 0xa2c   :  { %4685 = vtanh.f32 %v6791_v9 }
 0xa39   :  { %v4686_v25 = vpop.eup %4685 }
 0xa3a   :  { %v6794_v51 = vmul.f32 %v4686_v25, %v4684_v53  ;;  %v8189_v53 = vld [vmem:[#allocation54_spill] sm:$0xff]  ;;  %v8190_v25 = vld [vmem:[#allocation60_spill] sm:$0xff] }
 0xa3c   :  { %8175 = vst [vmem:[#allocation81_spill] sm:$0xff] %v6794_v51  ;;  %3179 = vmatmul.mubr.f32.vlgmr.msra.gmra.mxu0 %v6794_v51  ;;  %3250 = vmatmul.mubr.f32.vlgmr.msra.gmra.mxu1 %v6794_v51  ;;  %v8191_v51 = vld [vmem:[#allocation55_spill] sm:$0xff] }
 0xa3d   :  { %3293 = vmatpush1.msra.mxu0 %v6270_v30  ;;  %3364 = vmatpush1.msra.mxu1 %v6272_v8 }
 0xa3e   :  { %3294 = vmatprep.subr.mxu0 %v6275_v3  ;;  %3365 = vmatprep.subr.mxu1 %v6277_v26 }
 0xa3f   :  { %3295 = vmatpush1.msra.mxu0 %v6281_v62  ;;  %3366 = vmatpush1.msra.mxu1 %v6283_v50 }
 0xa40   :  { %3296 = vmatprep.subr.mxu0 %v6290_v56  ;;  %3367 = vmatprep.subr.mxu1 %v6292_v48 }
 0xa41   :  { %3297 = vmatpush1.msra.mxu0 %v6296_v28  ;;  %3368 = vmatpush1.msra.mxu1 %v6298_v52 }
 0xa42   :  { %3298 = vmatprep.subr.mxu0 %v6300_v19  ;;  %3369 = vmatprep.subr.mxu1 %v6302_v12 }
 0xa43   :  { %3299 = vmatpush1.msra.mxu0 %v6308_v1  ;;  %3370 = vmatpush1.msra.mxu1 %v6310_v31 }
 0xa44   :  { %3300 = vmatprep.subr.mxu0 %v6316_v33  ;;  %3371 = vmatprep.subr.mxu1 %v6318_v34 }
 0xa45   :  { %3301 = vmatpush1.msra.mxu0 %v6323_v36  ;;  %3372 = vmatpush1.msra.mxu1 %v6325_v54 }
 0xa46   :  { %3302 = vmatprep.subr.mxu0 %v6327_v38  ;;  %3373 = vmatprep.subr.mxu1 %v6329_v39 }
 0xa47   :  { %3303 = vmatpush1.msra.mxu0 %v6335_v41  ;;  %3374 = vmatpush1.msra.mxu1 %v6337_v42 }
 0xa48   :  { %3304 = vmatprep.subr.mxu0 %v6343_v44  ;;  %3375 = vmatprep.subr.mxu1 %v6345_v45 }
 0xa49   :  { %3305 = vmatpush1.msra.mxu0 %v6350_v6  ;;  %3376 = vmatpush1.msra.mxu1 %v6352_v60 }
 0xa4a   :  { %3306 = vmatprep.subr.mxu0 %v6354_v55  ;;  %3377 = vmatprep.subr.mxu1 %v6356_v11 }
 0xa4b   :  { %3307 = vmatpush1.msra.mxu0 %v6362_v46  ;;  %3378 = vmatpush1.msra.mxu1 %v6364_v57 }
 0xa4c   :  { %3308 = vmatprep.subr.mxu0 %v8176_v7  ;;  %3379 = vmatprep.subr.mxu1 %v8177_v20 }
 0xa4d   :  { %3309 = vmatpush1.msra.mxu0 %v8178_v16  ;;  %3380 = vmatpush1.msra.mxu1 %v8179_v10 }
 0xa4e   :  { %3310 = vmatprep.subr.mxu0 %v8180_v58  ;;  %3381 = vmatprep.subr.mxu1 %v8181_v43 }
 0xa4f   :  { %3311 = vmatpush1.msra.mxu0 %v8182_v32  ;;  %3382 = vmatpush1.msra.mxu1 %v8183_v2 }
 0xa50   :  { %3312 = vmatprep.subr.mxu0 %v8184_v13  ;;  %3383 = vmatprep.subr.mxu1 %v8185_v21 }
 0xa51   :  { %3313 = vmatpush1.msra.mxu0 %v8186_v17  ;;  %3384 = vmatpush1.msra.mxu1 %v8187_v29 }
 0xa52   :  { %3314 = vmatprep.subr.mxu0 %v8188_v14  ;;  %3385 = vmatprep.subr.mxu1 %v8189_v53  ;;  %v8199_v14 = vld [vmem:[#allocation24_spill] sm:$0xff]  ;;  %v8200_v53 = vld [vmem:[#allocation25_spill] sm:$0xff] }
 0xa53   :  { %3315 = vmatpush1.msra.mxu0 %v8190_v25  ;;  %3386 = vmatpush1.msra.mxu1 %v8191_v51  ;;  %v8201_v25 = vld [vmem:[#allocation26_spill] sm:$0xff]  ;;  %v8202_v51 = vld [vmem:[#allocation27_spill] sm:$0xff] }
 0xa54   :  { %3316 = vmatprep.subr.mxu0 %v8192_v61  ;;  %3387 = vmatprep.subr.mxu1 %v8193_v24  ;;  %v8203_v61 = vld [vmem:[#allocation28_spill] sm:$0xff]  ;;  %v8204_v24 = vld [vmem:[#allocation29_spill] sm:$0xff] }
 0xa55   :  { %3317 = vmatpush1.msra.mxu0 %v8194_v5  ;;  %3388 = vmatpush1.msra.mxu1 %v8195_v63  ;;  %v8205_v5 = vld [vmem:[#allocation30_spill] sm:$0xff]  ;;  %v8206_v63 = vld [vmem:[#allocation31_spill] sm:$0xff] }
 0xa56   :  { %3318 = vmatprep.subr.mxu0 %v8196_v4  ;;  %3389 = vmatprep.subr.mxu1 %v8197_v27  ;;  %v8207_v4 = vmov 0.0   ;;  %v8208_v27 = vld [vmem:[#allocation32_spill] sm:$0xff] }
 0xa57   :  { %3319 = vmatpush1.msra.mxu0 %v8198_v35  ;;  %3390 = vmatpush1.msra.mxu1 %v8199_v14  ;;  %v8209_v14 = vld [vmem:[#allocation38_spill] sm:$0xff] }
 0xa58   :  { %3320 = vmatprep.subr.mxu0 %v8200_v53  ;;  %3391 = vmatprep.subr.mxu1 %v8201_v25  ;;  %v8210_v53 = vld [vmem:[#allocation39_spill] sm:$0xff] }
 0xa59   :  { %3321 = vmatpush1.msra.mxu0 %v8202_v51  ;;  %3392 = vmatpush1.msra.mxu1 %v8203_v61 }
 0xa5a   :  { %3322 = vmatprep.subr.mxu0 %v8204_v24  ;;  %3393 = vmatprep.subr.mxu1 %v8205_v5 }
 0xa5b   :  { %3323 = vmatpush1.msra.mxu0 %v8206_v63  ;;  %3356 = vmatprep.mubr.f32.mxu0 %v8207_v4  ;;  %v8211_v63 = vsel %vm5416_vm2, %v6584_v37, %v6698_v47 }
 0xa5c   :  { %3394 = vmatpush1.msra.mxu1 %v8208_v27  ;;  %3427 = vmatprep.mubr.f32.mxu1 %v8207_v4 }
 0xa5d   :  { %3470 = vmatprep.subr.mxu0 %v8209_v14  ;;  %3541 = vmatprep.subr.mxu1 %v8210_v53  ;;  %v8212_v14 = vsel %vm5438_vm4, %v6587_v59, %v6701_v49 }
 0xafc   :  { %v3180_v25 = vpop.f32.mrf.mxu0  ;;  %v3251_v24 = vpop.f32.mrf.mxu1 }
 0xafd   :  { %v3181_v51 = vadd.f32 %v3180_v25, %v6706_v23  ;;  %v8213_v23 = vsel %vm5420_vm3, %v6581_v18, %v6695_v0  ;;  %v7067_v18 = vld [vmem:[#allocation10 + $0xf8] sm:$0xff]  ;;  %v7070_v0 = vld [vmem:[#allocation10 + $0xe0] sm:$0xff] }
 0xafe   :  { %v3182_v61 = vpop.f32.mrf.mxu0  ;;  %v3253_v4 = vpop.f32.mrf.mxu1 }
 0xaff   :  { %v4461_v35 = vmul.f32 -1.442695, %v3181_v51  ;;  %v3183_v5 = vadd.f32 %v3182_v61, %v8211_v63  ;;  %v3254_v53 = vadd.f32 %v3253_v4, %v8212_v14  ;;  %v3252_v51 = vadd.f32 %v3251_v24, %v8213_v23 }
 0xb01   :  { %4687 = vpow2.f32 %v4461_v35  ;;  %v4462_v27 = vmul.f32 -1.442695, %v3183_v5  ;;  %v4463_v25 = vmul.f32 -1.442695, %v3254_v53 }
 0xb03   :  { %4689 = vpow2.f32 %v4462_v27 }
 0xb04   :  { %4691 = vtanh.f32 %v3252_v51 }
 0xb05   :  { %4693 = vpow2.f32 %v4463_v25 }
 0xb0e   :  { %v4688_v37 = vpop.eup %4687 }
 0xb0f   :  { %v3259_v63 = vadd.f32 1.0, %v4688_v37 }
 0xb10   :  { %v4690_v61 = vpop.eup %4689 }
 0xb11   :  { %4695 = vrcp.f32 %v3259_v63  ;;  %v3265_v5 = vadd.f32 1.0, %v4690_v61  ;;  %v4692_v27 = vpop.eup %4691 }
 0xb12   :  { %v4694_v35 = vpop.eup %4693 }
 0xb13   :  { %4697 = vrcp.f32 %v3265_v5  ;;  %v3272_v14 = vadd.f32 1.0, %v4694_v35 }
 0xb15   :  { %4699 = vrcp.f32 %v3272_v14 }
 0xb1e   :  { %v4696_v47 = vpop.eup %4695 }
 0xb1f   :  { %v3276_v59 = vmul.f32 %v4696_v47, %v4692_v27 }
 0xb20   :  { %v4698_v4 = vpop.eup %4697 }
 0xb21   :  { %v3275_v49 = vmul.f32 %v4698_v4, %v6791_v9 }
 0xb22   :  { %v4700_v37 = vpop.eup %4699 }
 0xb23   :  { %v6881_v22 = vadd.f32 %v3276_v59, %v3275_v49 }
 0xb25   :  { %4701 = vtanh.f32 %v6881_v22 }
 0xb32   :  { %v4702_v24 = vpop.eup %4701 }
 0xb33   :  { %v3279_v53 = vmul.f32 %v4702_v24, %v4700_v37 }
 0xb35   :  { %3357 = vmatmul.mubr.f32.vlgmr.msra.gmra.mxu0 %v3279_v53  ;;  %3428 = vmatmul.mubr.f32.vlgmr.msra.gmra.mxu1 %v3279_v53 }
 0xb36   :  { %3471 = vmatpush1.msra.mxu0 %v6270_v30  ;;  %3542 = vmatpush1.msra.mxu1 %v6272_v8  ;;  %v8214_v30 = vld [vmem:[#allocation63_spill] sm:$0xff]  ;;  %v8215_v8 = vld [vmem:[#allocation54_spill] sm:$0xff] }
 0xb37   :  { %3472 = vmatprep.subr.mxu0 %v6275_v3  ;;  %3543 = vmatprep.subr.mxu1 %v6277_v26  ;;  %v8216_v3 = vld [vmem:[#allocation60_spill] sm:$0xff]  ;;  %v8217_v26 = vld [vmem:[#allocation55_spill] sm:$0xff] }
 0xb38   :  { %3473 = vmatpush1.msra.mxu0 %v6281_v62  ;;  %3544 = vmatpush1.msra.mxu1 %v6283_v50  ;;  %v8218_v62 = vld [vmem:[#allocation17_spill] sm:$0xff]  ;;  %v8219_v50 = vld [vmem:[#allocation18_spill] sm:$0xff] }
 0xb39   :  { %3474 = vmatprep.subr.mxu0 %v6290_v56  ;;  %3545 = vmatprep.subr.mxu1 %v6292_v48  ;;  %v8220_v56 = vld [vmem:[#allocation19_spill] sm:$0xff]  ;;  %v8221_v48 = vld [vmem:[#allocation20_spill] sm:$0xff] }
 0xb3a   :  { %3475 = vmatpush1.msra.mxu0 %v6296_v28  ;;  %3546 = vmatpush1.msra.mxu1 %v6298_v52  ;;  %v8222_v28 = vld [vmem:[#allocation21_spill] sm:$0xff]  ;;  %v8223_v52 = vld [vmem:[#allocation22_spill] sm:$0xff] }
 0xb3b   :  { %3476 = vmatprep.subr.mxu0 %v6300_v19  ;;  %3547 = vmatprep.subr.mxu1 %v6302_v12  ;;  %v8224_v19 = vld [vmem:[#allocation23_spill] sm:$0xff]  ;;  %v8225_v12 = vld [vmem:[#allocation24_spill] sm:$0xff] }
 0xb3c   :  { %3477 = vmatpush1.msra.mxu0 %v6308_v1  ;;  %3548 = vmatpush1.msra.mxu1 %v6310_v31  ;;  %v8226_v1 = vld [vmem:[#allocation25_spill] sm:$0xff]  ;;  %v8227_v31 = vld [vmem:[#allocation26_spill] sm:$0xff] }
 0xb3d   :  { %3478 = vmatprep.subr.mxu0 %v6316_v33  ;;  %3549 = vmatprep.subr.mxu1 %v6318_v34  ;;  %v8228_v33 = vld [vmem:[#allocation27_spill] sm:$0xff]  ;;  %v8229_v34 = vld [vmem:[#allocation28_spill] sm:$0xff] }
 0xb3e   :  { %3479 = vmatpush1.msra.mxu0 %v6323_v36  ;;  %3550 = vmatpush1.msra.mxu1 %v6325_v54  ;;  %v8230_v36 = vld [vmem:[#allocation29_spill] sm:$0xff]  ;;  %v8231_v54 = vld [vmem:[#allocation30_spill] sm:$0xff] }
 0xb3f   :  { %3480 = vmatprep.subr.mxu0 %v6327_v38  ;;  %3551 = vmatprep.subr.mxu1 %v6329_v39  ;;  %v8232_v38 = vld [vmem:[#allocation31_spill] sm:$0xff]  ;;  %v8233_v39 = vmov 0.0  }
 0xb40   :  { %3481 = vmatpush1.msra.mxu0 %v6335_v41  ;;  %3552 = vmatpush1.msra.mxu1 %v6337_v42  ;;  %v8234_v41 = vld [vmem:[#allocation32_spill] sm:$0xff]  ;;  %v6948_v42 = vld [vmem:[#allocation10 + $0x1e8] sm:$0xff] }
 0xb41   :  { %3482 = vmatprep.subr.mxu0 %v6343_v44  ;;  %3553 = vmatprep.subr.mxu1 %v6345_v45  ;;  %8235 = vst [vmem:[#allocation40_spill] sm:$0xff] %v6948_v42  ;;  %v6951_v44 = vld [vmem:[#allocation10 + $0x1f8] sm:$0xff] }
 0xb42   :  { %3483 = vmatpush1.msra.mxu0 %v6350_v6  ;;  %3554 = vmatpush1.msra.mxu1 %v6352_v60  ;;  %8236 = vst [vmem:[#allocation41_spill] sm:$0xff] %v6951_v44  ;;  %v8237_v6 = vld [vmem:[#allocation68_spill] sm:$0xff] }
 0xb43   :  { %3484 = vmatprep.subr.mxu0 %v6354_v55  ;;  %3555 = vmatprep.subr.mxu1 %v6356_v11 }
 0xb44   :  { %3485 = vmatpush1.msra.mxu0 %v6362_v46  ;;  %3556 = vmatpush1.msra.mxu1 %v6364_v57  ;;  %v8238_v46 = vld [vmem:[#allocation65_spill] sm:$0xff]  ;;  %v8239_v57 = vld [vmem:[#allocation70_spill] sm:$0xff] }
 0xb45   :  { %3486 = vmatprep.subr.mxu0 %v8176_v7  ;;  %3557 = vmatprep.subr.mxu1 %v8177_v20  ;;  %v8240_v59 = vsel %vm5416_vm2, %v8238_v46, %v8239_v57  ;;  %v8241_v20 = vld [vmem:[#allocation51_spill] sm:$0xff]  ;;  %v7088_v57 = vld [vmem:[#allocation10 + $0xa8] sm:$0xff] }
 0xb46   :  { %3487 = vmatpush1.msra.mxu0 %v8178_v16  ;;  %3558 = vmatpush1.msra.mxu1 %v8179_v10  ;;  %v8242_v16 = vld [vmem:[#allocation48_spill] sm:$0xff]  ;;  %v7085_v46 = vld [vmem:[#allocation10 + $0xd0] sm:$0xff] }
 0xb47   :  { %3488 = vmatprep.subr.mxu0 %v8180_v58  ;;  %3559 = vmatprep.subr.mxu1 %v8181_v43  ;;  %v8243_v10 = vsel %vm5438_vm4, %v8241_v20, %v8242_v16  ;;  %v7079_v20 = vld [vmem:[#allocation10 + $0xd8] sm:$0xff]  ;;  %v7082_v16 = vld [vmem:[#allocation10 + $0xc0] sm:$0xff]  ;;  %8252 = vst [vmem:[#allocation61_spill] sm:$0xff] %v7085_v46 }
 0xb48   :  { %3489 = vmatpush1.msra.mxu0 %v8182_v32  ;;  %3560 = vmatpush1.msra.mxu1 %v8183_v2  ;;  %v8245_v32 = vld [vmem:[#allocation67_spill] sm:$0xff]  ;;  %8250 = vst [vmem:[#allocation44_spill] sm:$0xff] %v7079_v20  ;;  %8251 = vst [vmem:[#allocation16_spill] sm:$0xff] %v7082_v16 }
 0xb49   :  { %3490 = vmatprep.subr.mxu0 %v8184_v13  ;;  %3561 = vmatprep.subr.mxu1 %v8185_v21  ;;  %v8246_v2 = vld [vmem:[#allocation47_spill] sm:$0xff] }
 0xb4a   :  { %3491 = vmatpush1.msra.mxu0 %v8186_v17  ;;  %3562 = vmatpush1.msra.mxu1 %v8187_v29  ;;  %v8247_v13 = vsel %vm5420_vm3, %v8245_v32, %v8246_v2  ;;  %v7073_v32 = vld [vmem:[#allocation10 + $0xf0] sm:$0xff]  ;;  %v7076_v2 = vld [vmem:[#allocation10 + $0xc8] sm:$0xff] }
 0xb4b   :  { %3492 = vmatprep.subr.mxu0 %v8214_v30  ;;  %3563 = vmatprep.subr.mxu1 %v8215_v8  ;;  %v6974_v8 = vld [vmem:[#allocation10 + $0x1e0] sm:$0xff]  ;;  %8248 = vst [vmem:[#allocation42_spill] sm:$0xff] %v7073_v32  ;;  %8249 = vst [vmem:[#allocation43_spill] sm:$0xff] %v7076_v2 }
 0xb4c   :  { %3493 = vmatpush1.msra.mxu0 %v8216_v3  ;;  %3564 = vmatpush1.msra.mxu1 %v8217_v26 }
 0xb4d   :  { %3494 = vmatprep.subr.mxu0 %v8218_v62  ;;  %3565 = vmatprep.subr.mxu1 %v8219_v50 }
 0xb4e   :  { %3495 = vmatpush1.msra.mxu0 %v8220_v56  ;;  %3566 = vmatpush1.msra.mxu1 %v8221_v48 }
 0xb4f   :  { %3496 = vmatprep.subr.mxu0 %v8222_v28  ;;  %3567 = vmatprep.subr.mxu1 %v8223_v52 }
 0xb50   :  { %3497 = vmatpush1.msra.mxu0 %v8224_v19  ;;  %3568 = vmatpush1.msra.mxu1 %v8225_v12 }
 0xb51   :  { %3498 = vmatprep.subr.mxu0 %v8226_v1  ;;  %3569 = vmatprep.subr.mxu1 %v8227_v31 }
 0xb52   :  { %3499 = vmatpush1.msra.mxu0 %v8228_v33  ;;  %3570 = vmatpush1.msra.mxu1 %v8229_v34 }
 0xb53   :  { %3500 = vmatprep.subr.mxu0 %v8230_v36  ;;  %3571 = vmatprep.subr.mxu1 %v8231_v54 }
 0xb54   :  { %3501 = vmatpush1.msra.mxu0 %v8232_v38  ;;  %3534 = vmatprep.mubr.f32.mxu0 %v8233_v39 }
 0xb55   :  { %3572 = vmatpush1.msra.mxu1 %v8234_v41  ;;  %3605 = vmatprep.mubr.f32.mxu1 %v8233_v39 }
 0xb56   :  { %3640 = vmatprep.subr.mxu0 %v6948_v42  ;;  %3711 = vmatprep.subr.mxu1 %v6951_v44 }
 0xbf5   :  { %v3358_v45 = vpop.f32.mrf.mxu0  ;;  %v3429_v47 = vpop.f32.mrf.mxu1 }
 0xbf6   :  { %v3359_v60 = vadd.f32 %v3358_v45, %v8237_v6  ;;  %v3430_v21 = vadd.f32 %v3429_v47, %v8247_v13  ;;  %v6977_v45 = vld [vmem:[#allocation10 + $0x1f0] sm:$0xff]  ;;  %v6980_v6 = vld [vmem:[#allocation10 + $0x1c8] sm:$0xff] }
 0xbf7   :  { %v3360_v55 = vpop.f32.mrf.mxu0  ;;  %v3431_v7 = vpop.f32.mrf.mxu1  ;;  %v7001_v47 = vld [vmem:[#allocation10 + $0x1b0] sm:$0xff]  ;;  %v7016_v13 = vld [vmem:[#allocation10 + $0x168] sm:$0xff] }
 0xbf8   :  { %v4464_v11 = vmul.f32 -1.442695, %v3359_v60  ;;  %v3361_v49 = vadd.f32 %v3360_v55, %v8240_v59  ;;  %v3432_v58 = vadd.f32 %v3431_v7, %v8243_v10  ;;  %v6986_v60 = vld [vmem:[#allocation10 + $0x1c0] sm:$0xff]  ;;  %v6989_v55 = vld [vmem:[#allocation10 + $0x1d0] sm:$0xff]  ;;  %v6995_v59 = vld [vmem:[#allocation10 + $0x1b8] sm:$0xff] }
 0xbf9   :  { %v7007_v7 = vld [vmem:[#allocation10 + $0x198] sm:$0xff]  ;;  %v7010_v10 = vld [vmem:[#allocation10 + $0x180] sm:$0xff] }
 0xbfa   :  { %4703 = vpow2.f32 %v4464_v11  ;;  %v4465_v9 = vmul.f32 -1.442695, %v3361_v49  ;;  %v4466_v17 = vmul.f32 -1.442695, %v3432_v58  ;;  %v6992_v11 = vld [vmem:[#allocation10 + $0x1a8] sm:$0xff]  ;;  %v6998_v49 = vld [vmem:[#allocation10 + $0x1a0] sm:$0xff] }
 0xbfb   :  { %v7013_v58 = vld [vmem:[#allocation10 + $0x190] sm:$0xff] }
 0xbfc   :  { %4705 = vpow2.f32 %v4465_v9  ;;  %v7004_v9 = vld [vmem:[#allocation10 + $0x188] sm:$0xff] }
 0xbfd   :  { %4707 = vtanh.f32 %v3430_v21  ;;  %v7019_v21 = vld [vmem:[#allocation10 + $0x178] sm:$0xff] }
 0xbfe   :  { %4709 = vpow2.f32 %v4466_v17  ;;  %v7022_v17 = vld [vmem:[#allocation10 + $0x160] sm:$0xff] }
 0xc07   :  { %v4704_v29 = vpop.eup %4703 }
 0xc08   :  { %v3437_v23 = vadd.f32 1.0, %v4704_v29  ;;  %v7025_v29 = vld [vmem:[#allocation10 + $0x170] sm:$0xff] }
 0xc09   :  { %v4706_v51 = vpop.eup %4705 }
 0xc0a   :  { %4711 = vrcp.f32 %v3437_v23  ;;  %v3443_v25 = vadd.f32 1.0, %v4706_v51  ;;  %v4708_v63 = vpop.eup %4707  ;;  %v7028_v23 = vld [vmem:[#allocation10 + $0x148] sm:$0xff]  ;;  %v7031_v51 = vld [vmem:[#allocation10 + $0x158] sm:$0xff] }
 0xc0b   :  { %v4710_v61 = vpop.eup %4709 }
 0xc0c   :  { %4713 = vrcp.f32 %v3443_v25  ;;  %v3450_v4 = vadd.f32 1.0, %v4710_v61  ;;  %v7034_v25 = vld [vmem:[#allocation10 + $0x140] sm:$0xff]  ;;  %v7040_v61 = vld [vmem:[#allocation10 + $0x128] sm:$0xff] }
 0xc0e   :  { %4715 = vrcp.f32 %v3450_v4  ;;  %v7052_v4 = vld [vmem:[#allocation10 + $0x108] sm:$0xff] }
 0xc17   :  { %v4712_v5 = vpop.eup %4711 }
 0xc18   :  { %v3454_v27 = vmul.f32 %v4712_v5, %v4708_v63  ;;  %v7037_v63 = vld [vmem:[#allocation10 + $0x150] sm:$0xff]  ;;  %v7043_v5 = vld [vmem:[#allocation10 + $0x138] sm:$0xff] }
 0xc19   :  { %v4714_v35 = vpop.eup %4713 }
 0xc1a   :  { %v3453_v14 = vmul.f32 %v4714_v35, %v6881_v22  ;;  %v6983_v22 = vld [vmem:[#allocation10 + $0x1d8] sm:$0xff]  ;;  %v7049_v35 = vld [vmem:[#allocation10 + $0x130] sm:$0xff] }
 0xc1b   :  { %v4716_v24 = vpop.eup %4715 }
 0xc1c   :  { %v6971_v37 = vadd.f32 %v3454_v27, %v3453_v14  ;;  %v7046_v27 = vld [vmem:[#allocation10 + $0x120] sm:$0xff]  ;;  %v7055_v14 = vld [vmem:[#allocation10 + $0x118] sm:$0xff] }
 0xc1e   :  { %4717 = vtanh.f32 %v6971_v37 }
 0xc2b   :  { %v4718_v53 = vpop.eup %4717 }
 0xc2c   :  { %v3457_v30 = vmul.f32 %v4718_v53, %v4716_v24  ;;  %v7058_v24 = vld [vmem:[#allocation10 + $0x100] sm:$0xff]  ;;  %v7061_v53 = vld [vmem:[#allocation10 + $0x110] sm:$0xff] }
 0xc2e   :  { %3535 = vmatmul.mubr.f32.vlgmr.msra.gmra.mxu0 %v3457_v30  ;;  %3606 = vmatmul.mubr.f32.vlgmr.msra.gmra.mxu1 %v3457_v30  ;;  %v7064_v30 = vld [vmem:[#allocation10 + $0xe8] sm:$0xff] }
 0xc2f   :  { %3641 = vmatpush1.msra.mxu0 %v6974_v8  ;;  %3712 = vmatpush1.msra.mxu1 %v6977_v45 }
 0xc30   :  { %3642 = vmatprep.subr.mxu0 %v6980_v6  ;;  %3713 = vmatprep.subr.mxu1 %v6983_v22 }
 0xc31   :  { %3643 = vmatpush1.msra.mxu0 %v6986_v60  ;;  %3714 = vmatpush1.msra.mxu1 %v6989_v55 }
 0xc32   :  { %3644 = vmatprep.subr.mxu0 %v6992_v11  ;;  %3715 = vmatprep.subr.mxu1 %v6995_v59 }
 0xc33   :  { %3645 = vmatpush1.msra.mxu0 %v6998_v49  ;;  %3716 = vmatpush1.msra.mxu1 %v7001_v47 }
 0xc34   :  { %3646 = vmatprep.subr.mxu0 %v7004_v9  ;;  %3717 = vmatprep.subr.mxu1 %v7007_v7 }
 0xc35   :  { %3647 = vmatpush1.msra.mxu0 %v7010_v10  ;;  %3718 = vmatpush1.msra.mxu1 %v7013_v58 }
 0xc36   :  { %3648 = vmatprep.subr.mxu0 %v7016_v13  ;;  %3719 = vmatprep.subr.mxu1 %v7019_v21 }
 0xc37   :  { %3649 = vmatpush1.msra.mxu0 %v7022_v17  ;;  %3720 = vmatpush1.msra.mxu1 %v7025_v29 }
 0xc38   :  { %3650 = vmatprep.subr.mxu0 %v7028_v23  ;;  %3721 = vmatprep.subr.mxu1 %v7031_v51 }
 0xc39   :  { %3651 = vmatpush1.msra.mxu0 %v7034_v25  ;;  %3722 = vmatpush1.msra.mxu1 %v7037_v63 }
 0xc3a   :  { %3652 = vmatprep.subr.mxu0 %v7040_v61  ;;  %3723 = vmatprep.subr.mxu1 %v7043_v5 }
 0xc3b   :  { %3653 = vmatpush1.msra.mxu0 %v7046_v27  ;;  %3724 = vmatpush1.msra.mxu1 %v7049_v35 }
 0xc3c   :  { %3654 = vmatprep.subr.mxu0 %v7052_v4  ;;  %3725 = vmatprep.subr.mxu1 %v7055_v14 }
 0xc3d   :  { %3655 = vmatpush1.msra.mxu0 %v7058_v24  ;;  %3726 = vmatpush1.msra.mxu1 %v7061_v53 }
 0xc3e   :  { %3656 = vmatprep.subr.mxu0 %v7064_v30  ;;  %3727 = vmatprep.subr.mxu1 %v7067_v18 }
 0xc3f   :  { %3657 = vmatpush1.msra.mxu0 %v7070_v0  ;;  %3728 = vmatpush1.msra.mxu1 %v7073_v32  ;;  %v7091_v32 = vld [vmem:[#allocation10 + $0xb8] sm:$0xff] }
 0xc40   :  { %3658 = vmatprep.subr.mxu0 %v7076_v2  ;;  %3729 = vmatprep.subr.mxu1 %v7079_v20  ;;  %v7094_v2 = vld [vmem:[#allocation10 + $0xa0] sm:$0xff]  ;;  %v7097_v20 = vld [vmem:[#allocation10 + $0xb0] sm:$0xff] }
 0xc41   :  { %3659 = vmatpush1.msra.mxu0 %v7082_v16  ;;  %3730 = vmatpush1.msra.mxu1 %v7085_v46  ;;  %v7100_v16 = vld [vmem:[#allocation10 + $0x88] sm:$0xff]  ;;  %v7103_v46 = vld [vmem:[#allocation10 + $0x98] sm:$0xff] }
 0xc42   :  { %3660 = vmatprep.subr.mxu0 %v7088_v57  ;;  %3731 = vmatprep.subr.mxu1 %v7091_v32  ;;  %8253 = vst [vmem:[#allocation59_spill] sm:$0xff] %v7103_v46 }
 0xc43   :  { %3661 = vmatpush1.msra.mxu0 %v7094_v2  ;;  %3732 = vmatpush1.msra.mxu1 %v7097_v20 }
 0xc44   :  { %3662 = vmatprep.subr.mxu0 %v7100_v16  ;;  %3733 = vmatprep.subr.mxu1 %v7103_v46 }
 0xc45   :  { %3663 = vmatpush1.msra.mxu0 %v8216_v3  ;;  %3734 = vmatpush1.msra.mxu1 %v8217_v26  ;;  %v8254_v26 = vld [vmem:[#allocation71_spill] sm:$0xff] }
 0xc46   :  { %3664 = vmatprep.subr.mxu0 %v8218_v62  ;;  %3735 = vmatprep.subr.mxu1 %v8219_v50 }
 0xc47   :  { %3665 = vmatpush1.msra.mxu0 %v8220_v56  ;;  %3736 = vmatpush1.msra.mxu1 %v8221_v48  ;;  %v8255_v48 = vld [vmem:[#allocation52_spill] sm:$0xff] }
 0xc48   :  { %3666 = vmatprep.subr.mxu0 %v8222_v28  ;;  %3737 = vmatprep.subr.mxu1 %v8223_v52  ;;  %v8256_v28 = vld [vmem:[#allocation36_spill] sm:$0xff] }
 0xc49   :  { %3667 = vmatpush1.msra.mxu0 %v8224_v19  ;;  %3738 = vmatpush1.msra.mxu1 %v8225_v12  ;;  %v8257_v52 = vsel %vm5416_vm2, %v8255_v48, %v8256_v28 }
 0xc4a   :  { %3668 = vmatprep.subr.mxu0 %v8226_v1  ;;  %3739 = vmatprep.subr.mxu1 %v8227_v31 }
 0xc4b   :  { %3669 = vmatpush1.msra.mxu0 %v8228_v33  ;;  %3740 = vmatpush1.msra.mxu1 %v8229_v34  ;;  %v8258_v33 = vld [vmem:[#allocation64_spill] sm:$0xff]  ;;  %v8259_v34 = vld [vmem:[#allocation79_spill] sm:$0xff] }
 0xc4c   :  { %3670 = vmatprep.subr.mxu0 %v8230_v36  ;;  %3741 = vmatprep.subr.mxu1 %v8231_v54  ;;  %v8260_v36 = vsel %vm5438_vm4, %v8258_v33, %v8259_v34 }
 0xc4d   :  { %3671 = vmatpush1.msra.mxu0 %v8232_v38  ;;  %3704 = vmatprep.mubr.f32.mxu0 %v8233_v39  ;;  %v8261_v38 = vld [vmem:[#allocation66_spill] sm:$0xff] }
 0xc4e   :  { %3742 = vmatpush1.msra.mxu1 %v8234_v41  ;;  %3775 = vmatprep.mubr.f32.mxu1 %v8233_v39  ;;  %v8262_v41 = vld [vmem:[#allocation49_spill] sm:$0xff] }
 0xc4f   :  { %3810 = vmatprep.subr.mxu0 %v6948_v42  ;;  %3881 = vmatprep.subr.mxu1 %v6951_v44 }
 0xcee   :  { %v3536_v3 = vpop.f32.mrf.mxu0  ;;  %v3607_v12 = vpop.f32.mrf.mxu1 }
 0xcef   :  { %v3537_v62 = vadd.f32 %v3536_v3, %v8254_v26  ;;  %v8263_v3 = vsel %vm5420_vm3, %v8261_v38, %v8262_v41 }
 0xcf0   :  { %v3538_v50 = vpop.f32.mrf.mxu0  ;;  %v3609_v31 = vpop.f32.mrf.mxu1  ;;  %v3608_v26 = vadd.f32 %v3607_v12, %v8263_v3  ;;  %v8268_v3 = vld [vmem:[#allocation61_spill] sm:$0xff] }
 0xcf1   :  { %v4467_v56 = vmul.f32 -1.442695, %v3537_v62  ;;  %v3539_v19 = vadd.f32 %v3538_v50, %v8257_v52  ;;  %v3610_v54 = vadd.f32 %v3609_v31, %v8260_v36 }
 0xcf3   :  { %4719 = vpow2.f32 %v4467_v56  ;;  %v4468_v1 = vmul.f32 -1.442695, %v3539_v19  ;;  %v4469_v62 = vmul.f32 -1.442695, %v3610_v54 }
 0xcf5   :  { %4721 = vpow2.f32 %v4468_v1 }
 0xcf6   :  { %4723 = vtanh.f32 %v3608_v26  ;;  %v7192_v26 = vld [vmem:[#allocation10 + $0x80] sm:$0xff] }
 0xcf7   :  { %4725 = vpow2.f32 %v4469_v62  ;;  %8269 = vst [vmem:[#allocation53_spill] sm:$0xff] %v7192_v26  ;;  %v7195_v62 = vld [vmem:[#allocation10 + $0x90] sm:$0xff] }
 0xcf8   :  { %8270 = vst [vmem:[#allocation56_spill] sm:$0xff] %v7195_v62 }
 0xd00   :  { %v4720_v48 = vpop.eup %4719 }
 0xd01   :  { %v3615_v50 = vadd.f32 1.0, %v4720_v48 }
 0xd02   :  { %v4722_v56 = vpop.eup %4721 }
 0xd03   :  { %4727 = vrcp.f32 %v3615_v50  ;;  %v3621_v52 = vadd.f32 1.0, %v4722_v56  ;;  %v4724_v19 = vpop.eup %4723  ;;  %v7198_v50 = vld [vmem:[#allocation10 + $0x68] sm:$0xff]  ;;  %v7201_v56 = vld [vmem:[#allocation10 + $0x78] sm:$0xff] }
 0xd04   :  { %v4726_v1 = vpop.eup %4725  ;;  %8271 = vst [vmem:[#allocation14_spill] sm:$0xff] %v7198_v50  ;;  %8272 = vst [vmem:[#allocation15_spill] sm:$0xff] %v7201_v56 }
 0xd05   :  { %4729 = vrcp.f32 %v3621_v52  ;;  %v3628_v36 = vadd.f32 1.0, %v4726_v1  ;;  %v7204_v52 = vld [vmem:[#allocation10 + $0x60] sm:$0xff]  ;;  %v7210_v1 = vld [vmem:[#allocation10 + $0x48] sm:$0xff] }
 0xd06   :  { %8273 = vst [vmem:[#allocation38_spill] sm:$0xff] %v7204_v52  ;;  %8275 = vst [vmem:[#allocation63_spill] sm:$0xff] %v7210_v1 }
 0xd07   :  { %4731 = vrcp.f32 %v3628_v36  ;;  %v7216_v36 = vld [vmem:[#allocation10 + $0x40] sm:$0xff] }
 0xd08   :  { %8277 = vst [vmem:[#allocation60_spill] sm:$0xff] %v7216_v36 }
 0xd10   :  { %v4728_v15 = vpop.eup %4727 }
 0xd11   :  { %v3632_v33 = vmul.f32 %v4728_v15, %v4724_v19  ;;  %v8264_v15 = vld [vmem:[#allocation42_spill] sm:$0xff]  ;;  %v7207_v19 = vld [vmem:[#allocation10 + $0x70] sm:$0xff] }
 0xd12   :  { %v4730_v31 = vpop.eup %4729  ;;  %8274 = vst [vmem:[#allocation39_spill] sm:$0xff] %v7207_v19 }
 0xd13   :  { %v3631_v43 = vmul.f32 %v4730_v31, %v6971_v37  ;;  %v8266_v37 = vld [vmem:[#allocation44_spill] sm:$0xff] }
 0xd14   :  { %v4732_v48 = vpop.eup %4731  ;;  %v7213_v31 = vld [vmem:[#allocation10 + $0x58] sm:$0xff] }
 0xd15   :  { %v7145_v34 = vadd.f32 %v3632_v33, %v3631_v43  ;;  %v8265_v43 = vld [vmem:[#allocation43_spill] sm:$0xff]  ;;  %v8267_v33 = vld [vmem:[#allocation16_spill] sm:$0xff]  ;;  %8276 = vst [vmem:[#allocation54_spill] sm:$0xff] %v7213_v31 }
 0xd17   :  { %4733 = vtanh.f32 %v7145_v34 }
 0xd24   :  { %v4734_v12 = vpop.eup %4733 }
 0xd25   :  { %v3635_v54 = vmul.f32 %v4734_v12, %v4732_v48  ;;  %v7219_v48 = vld [vmem:[#allocation10 + $0x50] sm:$0xff]  ;;  %v7222_v12 = vld [vmem:[#allocation10 + $0x28] sm:$0xff] }
 0xd26   :  { %8278 = vst [vmem:[#allocation55_spill] sm:$0xff] %v7219_v48  ;;  %8279 = vst [vmem:[#allocation17_spill] sm:$0xff] %v7222_v12 }
 0xd27   :  { %3705 = vmatmul.mubr.f32.vlgmr.msra.gmra.mxu0 %v3635_v54  ;;  %3776 = vmatmul.mubr.f32.vlgmr.msra.gmra.mxu1 %v3635_v54  ;;  %v7225_v54 = vld [vmem:[#allocation10 + $0x38] sm:$0xff] }
 0xd28   :  { %3811 = vmatpush1.msra.mxu0 %v6974_v8  ;;  %3882 = vmatpush1.msra.mxu1 %v6977_v45  ;;  %8280 = vst [vmem:[#allocation18_spill] sm:$0xff] %v7225_v54 }
 0xd29   :  { %3812 = vmatprep.subr.mxu0 %v6980_v6  ;;  %3883 = vmatprep.subr.mxu1 %v6983_v22 }
 0xd2a   :  { %3813 = vmatpush1.msra.mxu0 %v6986_v60  ;;  %3884 = vmatpush1.msra.mxu1 %v6989_v55 }
 0xd2b   :  { %3814 = vmatprep.subr.mxu0 %v6992_v11  ;;  %3885 = vmatprep.subr.mxu1 %v6995_v59 }
 0xd2c   :  { %3815 = vmatpush1.msra.mxu0 %v6998_v49  ;;  %3886 = vmatpush1.msra.mxu1 %v7001_v47 }
 0xd2d   :  { %3816 = vmatprep.subr.mxu0 %v7004_v9  ;;  %3887 = vmatprep.subr.mxu1 %v7007_v7 }
 0xd2e   :  { %3817 = vmatpush1.msra.mxu0 %v7010_v10  ;;  %3888 = vmatpush1.msra.mxu1 %v7013_v58 }
 0xd2f   :  { %3818 = vmatprep.subr.mxu0 %v7016_v13  ;;  %3889 = vmatprep.subr.mxu1 %v7019_v21 }
 0xd30   :  { %3819 = vmatpush1.msra.mxu0 %v7022_v17  ;;  %3890 = vmatpush1.msra.mxu1 %v7025_v29 }
 0xd31   :  { %3820 = vmatprep.subr.mxu0 %v7028_v23  ;;  %3891 = vmatprep.subr.mxu1 %v7031_v51 }
 0xd32   :  { %3821 = vmatpush1.msra.mxu0 %v7034_v25  ;;  %3892 = vmatpush1.msra.mxu1 %v7037_v63 }
 0xd33   :  { %3822 = vmatprep.subr.mxu0 %v7040_v61  ;;  %3893 = vmatprep.subr.mxu1 %v7043_v5 }
 0xd34   :  { %3823 = vmatpush1.msra.mxu0 %v7046_v27  ;;  %3894 = vmatpush1.msra.mxu1 %v7049_v35 }
 0xd35   :  { %3824 = vmatprep.subr.mxu0 %v7052_v4  ;;  %3895 = vmatprep.subr.mxu1 %v7055_v14 }
 0xd36   :  { %3825 = vmatpush1.msra.mxu0 %v7058_v24  ;;  %3896 = vmatpush1.msra.mxu1 %v7061_v53 }
 0xd37   :  { %3826 = vmatprep.subr.mxu0 %v7064_v30  ;;  %3897 = vmatprep.subr.mxu1 %v7067_v18 }
 0xd38   :  { %3827 = vmatpush1.msra.mxu0 %v7070_v0  ;;  %3898 = vmatpush1.msra.mxu1 %v8264_v15 }
 0xd39   :  { %3828 = vmatprep.subr.mxu0 %v8265_v43  ;;  %3899 = vmatprep.subr.mxu1 %v8266_v37 }
 0xd3a   :  { %3829 = vmatpush1.msra.mxu0 %v8267_v33  ;;  %3900 = vmatpush1.msra.mxu1 %v8268_v3 }
 0xd3b   :  { %3830 = vmatprep.subr.mxu0 %v7088_v57  ;;  %3901 = vmatprep.subr.mxu1 %v7091_v32 }
 0xd3c   :  { %3831 = vmatpush1.msra.mxu0 %v7094_v2  ;;  %3902 = vmatpush1.msra.mxu1 %v7097_v20 }
 0xd3d   :  { %3832 = vmatprep.subr.mxu0 %v7100_v16  ;;  %3903 = vmatprep.subr.mxu1 %v7103_v46 }
 0xd3e   :  { %3833 = vmatpush1.msra.mxu0 %v7192_v26  ;;  %3904 = vmatpush1.msra.mxu1 %v7195_v62 }
 0xd3f   :  { %3834 = vmatprep.subr.mxu0 %v7198_v50  ;;  %3905 = vmatprep.subr.mxu1 %v7201_v56 }
 0xd40   :  { %3835 = vmatpush1.msra.mxu0 %v7204_v52  ;;  %3906 = vmatpush1.msra.mxu1 %v7207_v19 }
 0xd41   :  { %3836 = vmatprep.subr.mxu0 %v7210_v1  ;;  %3907 = vmatprep.subr.mxu1 %v7213_v31  ;;  %v7228_v1 = vld [vmem:[#allocation10 + $0x20] sm:$0xff]  ;;  %v7231_v31 = vld [vmem:[#allocation10 + $0x30] sm:$0xff] }
 0xd42   :  { %3837 = vmatpush1.msra.mxu0 %v7216_v36  ;;  %3908 = vmatpush1.msra.mxu1 %v7219_v48  ;;  %8281 = vst [vmem:[#allocation19_spill] sm:$0xff] %v7228_v1  ;;  %8282 = vst [vmem:[#allocation20_spill] sm:$0xff] %v7231_v31  ;;  %v7234_v36 = vld [vmem:[#allocation10 + $0x8] sm:$0xff]  ;;  %v7237_v48 = vld [vmem:[#allocation10 + $0x18] sm:$0xff] }
 0xd43   :  { %3838 = vmatprep.subr.mxu0 %v7222_v12  ;;  %3909 = vmatprep.subr.mxu1 %v7225_v54  ;;  %8283 = vst [vmem:[#allocation21_spill] sm:$0xff] %v7234_v36  ;;  %8284 = vst [vmem:[#allocation22_spill] sm:$0xff] %v7237_v48  ;;  %v7240_v12 = vld [vmem:[#allocation10] sm:$0xff]  ;;  %v7244_v54 = vld [vmem:[#allocation10 + $0x10] sm:$0xff] }
 0xd44   :  { %3839 = vmatpush1.msra.mxu0 %v7228_v1  ;;  %3910 = vmatpush1.msra.mxu1 %v7231_v31  ;;  %8285 = vst [vmem:[#allocation23_spill] sm:$0xff] %v7240_v12  ;;  %8286 = vst [vmem:[#allocation24_spill] sm:$0xff] %v7244_v54  ;;  %v8287_v31 = vld [vmem:[#allocation69_spill] sm:$0xff] }
 0xd45   :  { %3840 = vmatprep.subr.mxu0 %v7234_v36  ;;  %3911 = vmatprep.subr.mxu1 %v7237_v48 }
 0xd46   :  { %3841 = vmatpush1.msra.mxu0 %v7240_v12  ;;  %3874 = vmatprep.mubr.f32.mxu0 %v8233_v39  ;;  %v8288_v12 = vld [vmem:[#allocation52_spill] sm:$0xff] }
 0xd47   :  { %3912 = vmatpush1.msra.mxu1 %v7244_v54  ;;  %3945 = vmatprep.mubr.f32.mxu1 %v8233_v39  ;;  %v8289_v52 = vsel %vm5416_vm2, %v8256_v28, %v8288_v12 }
 0xd48   :  { %3980 = vmatprep.subr.mxu0 %v6948_v42  ;;  %4051 = vmatprep.subr.mxu1 %v6951_v44  ;;  %v8291_v42 = vld [vmem:[#allocation79_spill] sm:$0xff]  ;;  %v8292_v44 = vld [vmem:[#allocation64_spill] sm:$0xff] }
 0xd49   :  { %v8293_v26 = vsel %vm5438_vm4, %v8291_v42, %v8292_v44 }
 0xde7   :  { %v3706_v36 = vpop.f32.mrf.mxu0  ;;  %v3777_v50 = vpop.f32.mrf.mxu1 }
 0xde8   :  { %v3707_v1 = vadd.f32 %v3706_v36, %v8287_v31 }
 0xde9   :  { %v3708_v48 = vpop.f32.mrf.mxu0  ;;  %v3779_v39 = vpop.f32.mrf.mxu1 }
 0xdea   :  { %v4470_v19 = vmul.f32 -1.442695, %v3707_v1  ;;  %v3709_v56 = vadd.f32 %v3708_v48, %v8289_v52  ;;  %v3780_v46 = vadd.f32 %v3779_v39, %v8293_v26  ;;  %v8295_v1 = vsel %vm5420_vm3, %v8262_v41, %v8261_v38 }
 0xdeb   :  { %v3778_v36 = vadd.f32 %v3777_v50, %v8295_v1  ;;  %v8298_v50 = vld [vmem:[#allocation56_spill] sm:$0xff]  ;;  %v8299_v1 = vld [vmem:[#allocation14_spill] sm:$0xff] }
 0xdec   :  { %4735 = vpow2.f32 %v4470_v19  ;;  %v4471_v54 = vmul.f32 -1.442695, %v3709_v56  ;;  %v4472_v40 = vmul.f32 -1.442695, %v3780_v46 }
 0xdee   :  { %4737 = vpow2.f32 %v4471_v54 }
 0xdef   :  { %4739 = vtanh.f32 %v3778_v36  ;;  %v8300_v36 = vld [vmem:[#allocation15_spill] sm:$0xff] }
 0xdf0   :  { %4741 = vpow2.f32 %v4472_v40  ;;  %v8296_v40 = vld [vmem:[#allocation59_spill] sm:$0xff] }
 0xdf9   :  { %v4736_v28 = vpop.eup %4735 }
 0xdfa   :  { %v3785_v52 = vadd.f32 1.0, %v4736_v28  ;;  %v8301_v28 = vld [vmem:[#allocation38_spill] sm:$0xff] }
 0xdfb   :  { %v4738_v19 = vpop.eup %4737 }
 0xdfc   :  { %4743 = vrcp.f32 %v3785_v52  ;;  %v3791_v56 = vadd.f32 1.0, %v4738_v19  ;;  %v4740_v48 = vpop.eup %4739  ;;  %v8302_v52 = vld [vmem:[#allocation39_spill] sm:$0xff] }
 0xdfd   :  { %v4742_v12 = vpop.eup %4741  ;;  %v8303_v19 = vld [vmem:[#allocation63_spill] sm:$0xff] }
 0xdfe   :  { %4745 = vrcp.f32 %v3791_v56  ;;  %v3798_v44 = vadd.f32 1.0, %v4742_v12  ;;  %v8304_v56 = vld [vmem:[#allocation54_spill] sm:$0xff]  ;;  %v8306_v12 = vld [vmem:[#allocation55_spill] sm:$0xff] }
 0xe00   :  { %4747 = vrcp.f32 %v3798_v44  ;;  %v8310_v44 = vld [vmem:[#allocation20_spill] sm:$0xff] }
 0xe09   :  { %v4744_v54 = vpop.eup %4743 }
 0xe0a   :  { %v3802_v42 = vmul.f32 %v4744_v54, %v4740_v48  ;;  %v8305_v48 = vld [vmem:[#allocation60_spill] sm:$0xff]  ;;  %v8307_v54 = vld [vmem:[#allocation17_spill] sm:$0xff] }
 0xe0b   :  { %v4746_v39 = vpop.eup %4745 }
 0xe0c   :  { %v3801_v26 = vmul.f32 %v4746_v39, %v7145_v34  ;;  %v8297_v34 = vld [vmem:[#allocation53_spill] sm:$0xff]  ;;  %v8309_v39 = vld [vmem:[#allocation19_spill] sm:$0xff] }
 0xe0d   :  { %v4748_v46 = vpop.eup %4747 }
 0xe0e   :  { %v7267_v31 = vadd.f32 %v3802_v42, %v3801_v26  ;;  %v8308_v42 = vld [vmem:[#allocation18_spill] sm:$0xff]  ;;  %v8311_v26 = vld [vmem:[#allocation21_spill] sm:$0xff] }
 0xe10   :  { %4749 = vtanh.f32 %v7267_v31 }
 0xe1d   :  { %v4750_v38 = vpop.eup %4749 }
 0xe1e   :  { %v3805_v41 = vmul.f32 %v4750_v38, %v4748_v46  ;;  %v8312_v46 = vld [vmem:[#allocation22_spill] sm:$0xff]  ;;  %v8313_v38 = vld [vmem:[#allocation23_spill] sm:$0xff] }
 0xe20   :  { %3875 = vmatmul.mubr.f32.vlgmr.msra.gmra.mxu0 %v3805_v41  ;;  %3946 = vmatmul.mubr.f32.vlgmr.msra.gmra.mxu1 %v3805_v41  ;;  %v8314_v41 = vmov 0.0  }
 0xe21   :  { %3981 = vmatpush1.msra.mxu0 %v6974_v8  ;;  %4052 = vmatpush1.msra.mxu1 %v6977_v45 }
 0xe22   :  { %3982 = vmatprep.subr.mxu0 %v6980_v6  ;;  %4053 = vmatprep.subr.mxu1 %v6983_v22 }
 0xe23   :  { %3983 = vmatpush1.msra.mxu0 %v6986_v60  ;;  %4054 = vmatpush1.msra.mxu1 %v6989_v55 }
 0xe24   :  { %3984 = vmatprep.subr.mxu0 %v6992_v11  ;;  %4055 = vmatprep.subr.mxu1 %v6995_v59 }
 0xe25   :  { %3985 = vmatpush1.msra.mxu0 %v6998_v49  ;;  %4056 = vmatpush1.msra.mxu1 %v7001_v47 }
 0xe26   :  { %3986 = vmatprep.subr.mxu0 %v7004_v9  ;;  %4057 = vmatprep.subr.mxu1 %v7007_v7 }
 0xe27   :  { %3987 = vmatpush1.msra.mxu0 %v7010_v10  ;;  %4058 = vmatpush1.msra.mxu1 %v7013_v58 }
 0xe28   :  { %3988 = vmatprep.subr.mxu0 %v7016_v13  ;;  %4059 = vmatprep.subr.mxu1 %v7019_v21 }
 0xe29   :  { %3989 = vmatpush1.msra.mxu0 %v7022_v17  ;;  %4060 = vmatpush1.msra.mxu1 %v7025_v29 }
 0xe2a   :  { %3990 = vmatprep.subr.mxu0 %v7028_v23  ;;  %4061 = vmatprep.subr.mxu1 %v7031_v51 }
 0xe2b   :  { %3991 = vmatpush1.msra.mxu0 %v7034_v25  ;;  %4062 = vmatpush1.msra.mxu1 %v7037_v63 }
 0xe2c   :  { %3992 = vmatprep.subr.mxu0 %v7040_v61  ;;  %4063 = vmatprep.subr.mxu1 %v7043_v5 }
 0xe2d   :  { %3993 = vmatpush1.msra.mxu0 %v7046_v27  ;;  %4064 = vmatpush1.msra.mxu1 %v7049_v35 }
 0xe2e   :  { %3994 = vmatprep.subr.mxu0 %v7052_v4  ;;  %4065 = vmatprep.subr.mxu1 %v7055_v14 }
 0xe2f   :  { %3995 = vmatpush1.msra.mxu0 %v7058_v24  ;;  %4066 = vmatpush1.msra.mxu1 %v7061_v53 }
 0xe30   :  { %3996 = vmatprep.subr.mxu0 %v7064_v30  ;;  %4067 = vmatprep.subr.mxu1 %v7067_v18 }
 0xe31   :  { %3997 = vmatpush1.msra.mxu0 %v7070_v0  ;;  %4068 = vmatpush1.msra.mxu1 %v8264_v15 }
 0xe32   :  { %3998 = vmatprep.subr.mxu0 %v8265_v43  ;;  %4069 = vmatprep.subr.mxu1 %v8266_v37 }
 0xe33   :  { %3999 = vmatpush1.msra.mxu0 %v8267_v33  ;;  %4070 = vmatpush1.msra.mxu1 %v8268_v3 }
 0xe34   :  { %4000 = vmatprep.subr.mxu0 %v7088_v57  ;;  %4071 = vmatprep.subr.mxu1 %v7091_v32 }
 0xe35   :  { %4001 = vmatpush1.msra.mxu0 %v7094_v2  ;;  %4072 = vmatpush1.msra.mxu1 %v7097_v20 }
 0xe36   :  { %4002 = vmatprep.subr.mxu0 %v7100_v16  ;;  %4073 = vmatprep.subr.mxu1 %v8296_v40 }
 0xe37   :  { %4003 = vmatpush1.msra.mxu0 %v8297_v34  ;;  %4074 = vmatpush1.msra.mxu1 %v8298_v50 }
 0xe38   :  { %4004 = vmatprep.subr.mxu0 %v8299_v1  ;;  %4075 = vmatprep.subr.mxu1 %v8300_v36 }
 0xe39   :  { %4005 = vmatpush1.msra.mxu0 %v8301_v28  ;;  %4076 = vmatpush1.msra.mxu1 %v8302_v52  ;;  %v8321_v52 = vld [vmem:[#allocation65_spill] sm:$0xff] }
 0xe3a   :  { %4006 = vmatprep.subr.mxu0 %v8303_v19  ;;  %4077 = vmatprep.subr.mxu1 %v8304_v56  ;;  %v8315_v56 = vld [vmem:[#allocation24_spill] sm:$0xff] }
 0xe3b   :  { %4007 = vmatpush1.msra.mxu0 %v8305_v48  ;;  %4078 = vmatpush1.msra.mxu1 %v8306_v12  ;;  %v8316_v12 = vld [vmem:[#allocation40_spill] sm:$0xff] }
 0xe3c   :  { %4008 = vmatprep.subr.mxu0 %v8307_v54  ;;  %4079 = vmatprep.subr.mxu1 %v8308_v42  ;;  %v8317_v54 = vld [vmem:[#allocation41_spill] sm:$0xff] }
 0xe3d   :  { %4009 = vmatpush1.msra.mxu0 %v8309_v39  ;;  %4080 = vmatpush1.msra.mxu1 %v8310_v44  ;;  %v8318_v39 = vld [vmem:[#allocation46_spill] sm:$0xff] }
 0xe3e   :  { %4010 = vmatprep.subr.mxu0 %v8311_v26  ;;  %4081 = vmatprep.subr.mxu1 %v8312_v46  ;;  %v8320_v46 = vld [vmem:[#allocation70_spill] sm:$0xff] }
 0xe3f   :  { %4011 = vmatpush1.msra.mxu0 %v8313_v38  ;;  %4044 = vmatprep.mubr.f32.mxu0 %v8314_v41  ;;  %v8322_v38 = vsel %vm5416_vm2, %v8320_v46, %v8321_v52 }
 0xe40   :  { %4082 = vmatpush1.msra.mxu1 %v8315_v56  ;;  %4115 = vmatprep.mubr.f32.mxu1 %v8314_v41 }
 0xe41   :  { %4150 = vmatprep.subr.mxu0 %v8316_v12  ;;  %4221 = vmatprep.subr.mxu1 %v8317_v54  ;;  %v8323_v12 = vld [vmem:[#allocation48_spill] sm:$0xff]  ;;  %v8324_v54 = vld [vmem:[#allocation51_spill] sm:$0xff] }
 0xe42   :  { %v8325_v1 = vsel %vm5438_vm4, %v8323_v12, %v8324_v54 }
 0xee0   :  { %v3876_v42 = vpop.f32.mrf.mxu0  ;;  %v3947_v36 = vpop.f32.mrf.mxu1 }
 0xee1   :  { %v3877_v48 = vadd.f32 %v3876_v42, %v8318_v39  ;;  %v8328_v39 = vld [vmem:[#allocation67_spill] sm:$0xff] }
 0xee2   :  { %v3878_v44 = vpop.f32.mrf.mxu0  ;;  %v3949_v41 = vpop.f32.mrf.mxu1 }
 0xee3   :  { %v4473_v19 = vmul.f32 -1.442695, %v3877_v48  ;;  %v3879_v28 = vadd.f32 %v3878_v44, %v8322_v38  ;;  %v3950_v50 = vadd.f32 %v3949_v41, %v8325_v1  ;;  %v8327_v48 = vld [vmem:[#allocation47_spill] sm:$0xff] }
 0xee4   :  { %v8329_v26 = vsel %vm5420_vm3, %v8327_v48, %v8328_v39 }
 0xee5   :  { %4751 = vpow2.f32 %v4473_v19  ;;  %v4474_v56 = vmul.f32 -1.442695, %v3879_v28  ;;  %v3948_v34 = vadd.f32 %v3947_v36, %v8329_v26  ;;  %v4475_v40 = vmul.f32 -1.442695, %v3950_v50 }
 0xee7   :  { %4753 = vpow2.f32 %v4474_v56 }
 0xee8   :  { %4755 = vtanh.f32 %v3948_v34 }
 0xee9   :  { %4757 = vpow2.f32 %v4475_v40 }
 0xef2   :  { %v4752_v52 = vpop.eup %4751 }
 0xef3   :  { %v3955_v44 = vadd.f32 1.0, %v4752_v52 }
 0xef4   :  { %v4754_v19 = vpop.eup %4753 }
 0xef5   :  { %4759 = vrcp.f32 %v3955_v44  ;;  %v3961_v28 = vadd.f32 1.0, %v4754_v19  ;;  %v4756_v56 = vpop.eup %4755 }
 0xef6   :  { %v4758_v46 = vpop.eup %4757 }
 0xef7   :  { %4761 = vrcp.f32 %v3961_v28  ;;  %v3968_v41 = vadd.f32 1.0, %v4758_v46 }
 0xef9   :  { %4763 = vrcp.f32 %v3968_v41 }
 0xf02   :  { %v4760_v38 = vpop.eup %4759 }
 0xf03   :  { %v3972_v12 = vmul.f32 %v4760_v38, %v4756_v56 }
 0xf04   :  { %v4762_v1 = vpop.eup %4761 }
 0xf05   :  { %v3971_v54 = vmul.f32 %v4762_v1, %v7267_v31 }
 0xf06   :  { %v4764_v50 = vpop.eup %4763 }
 0xf07   :  { %v7353_v42 = vadd.f32 %v3972_v12, %v3971_v54  ;;  %v4332_v54 = vld [vmem:[%s7535_s7 + $0x78] sm:$0xff] }
 0xf09   :  { %4765 = vtanh.f32 %v7353_v42 }
 0xf16   :  { %v4766_v34 = vpop.eup %4765 }
 0xf17   :  { %v3975_v36 = vmul.f32 %v4766_v34, %v4764_v50  ;;  %v4330_v50 = vld [vmem:[%s7535_s7 + $0x68] sm:$0xff]  ;;  %v4329_v34 = vld [vmem:[%s7535_s7 + $0x60] sm:$0xff] }
 0xf19   :  { %4045 = vmatmul.mubr.f32.vlgmr.msra.gmra.mxu0 %v3975_v36  ;;  %4116 = vmatmul.mubr.f32.vlgmr.msra.gmra.mxu1 %v3975_v36  ;;  %v4328_v36 = vld [vmem:[%s7535_s7 + $0x58] sm:$0xff] }
 0xf1a   :  { %4151 = vmatpush1.msra.mxu0 %v6974_v8  ;;  %4222 = vmatpush1.msra.mxu1 %v6977_v45  ;;  %v8332_v8 = vld [vmem:[#allocation56_spill] sm:$0xff]  ;;  %v8333_v45 = vld [vmem:[#allocation14_spill] sm:$0xff] }
 0xf1b   :  { %4152 = vmatprep.subr.mxu0 %v6980_v6  ;;  %4223 = vmatprep.subr.mxu1 %v6983_v22  ;;  %v8334_v6 = vld [vmem:[#allocation15_spill] sm:$0xff]  ;;  %v8335_v22 = vld [vmem:[#allocation38_spill] sm:$0xff] }
 0xf1c   :  { %4153 = vmatpush1.msra.mxu0 %v6986_v60  ;;  %4224 = vmatpush1.msra.mxu1 %v6989_v55  ;;  %v8341_v60 = vld [vmem:[#allocation17_spill] sm:$0xff]  ;;  %v8342_v55 = vld [vmem:[#allocation18_spill] sm:$0xff] }
 0xf1d   :  { %4154 = vmatprep.subr.mxu0 %v6992_v11  ;;  %4225 = vmatprep.subr.mxu1 %v6995_v59  ;;  %v8343_v11 = vld [vmem:[#allocation19_spill] sm:$0xff]  ;;  %v8344_v59 = vld [vmem:[#allocation20_spill] sm:$0xff] }
 0xf1e   :  { %4155 = vmatpush1.msra.mxu0 %v6998_v49  ;;  %4226 = vmatpush1.msra.mxu1 %v7001_v47  ;;  %v8345_v49 = vld [vmem:[#allocation21_spill] sm:$0xff]  ;;  %v8346_v47 = vld [vmem:[#allocation22_spill] sm:$0xff] }
 0xf1f   :  { %4156 = vmatprep.subr.mxu0 %v7004_v9  ;;  %4227 = vmatprep.subr.mxu1 %v7007_v7  ;;  %v8347_v9 = vld [vmem:[#allocation23_spill] sm:$0xff]  ;;  %v8348_v7 = vmov 0.0  }
 0xf20   :  { %4157 = vmatpush1.msra.mxu0 %v7010_v10  ;;  %4228 = vmatpush1.msra.mxu1 %v7013_v58  ;;  %v8349_v10 = vld [vmem:[#allocation24_spill] sm:$0xff] }
 0xf21   :  { %4158 = vmatprep.subr.mxu0 %v7016_v13  ;;  %4229 = vmatprep.subr.mxu1 %v7019_v21  ;;  %v8350_v13 = vld [vmem:[#allocation77_spill] sm:$0xff] }
 0xf22   :  { %4159 = vmatpush1.msra.mxu0 %v7022_v17  ;;  %4230 = vmatpush1.msra.mxu1 %v7025_v29 }
 0xf23   :  { %4160 = vmatprep.subr.mxu0 %v7028_v23  ;;  %4231 = vmatprep.subr.mxu1 %v7031_v51  ;;  %v8352_v51 = vld [vmem:[#allocation76_spill] sm:$0xff] }
 0xf24   :  { %4161 = vmatpush1.msra.mxu0 %v7034_v25  ;;  %4232 = vmatpush1.msra.mxu1 %v7037_v63  ;;  %v8353_v25 = vld [vmem:[#allocation34_spill] sm:$0xff] }
 0xf25   :  { %4162 = vmatprep.subr.mxu0 %v7040_v61  ;;  %4233 = vmatprep.subr.mxu1 %v7043_v5  ;;  %v8354_v63 = vsel %vm5416_vm2, %v8352_v51, %v8353_v25 }
 0xf26   :  { %4163 = vmatpush1.msra.mxu0 %v7046_v27  ;;  %4234 = vmatpush1.msra.mxu1 %v7049_v35 }
 0xf27   :  { %4164 = vmatprep.subr.mxu0 %v7052_v4  ;;  %4235 = vmatprep.subr.mxu1 %v7055_v14  ;;  %v8355_v4 = vld [vmem:[#allocation74_spill] sm:$0xff]  ;;  %v8356_v14 = vld [vmem:[#allocation35_spill] sm:$0xff] }
 0xf28   :  { %4165 = vmatpush1.msra.mxu0 %v7058_v24  ;;  %4236 = vmatpush1.msra.mxu1 %v7061_v53  ;;  %v8357_v24 = vsel %vm5438_vm4, %v8355_v4, %v8356_v14 }
 0xf29   :  { %4166 = vmatprep.subr.mxu0 %v7064_v30  ;;  %4237 = vmatprep.subr.mxu1 %v7067_v18  ;;  %v8330_v18 = vld [vmem:[#allocation59_spill] sm:$0xff] }
 0xf2a   :  { %4167 = vmatpush1.msra.mxu0 %v7070_v0  ;;  %4238 = vmatpush1.msra.mxu1 %v8264_v15  ;;  %v8331_v0 = vld [vmem:[#allocation53_spill] sm:$0xff]  ;;  %v8359_v15 = vld [vmem:[#allocation78_spill] sm:$0xff] }
 0xf2b   :  { %4168 = vmatprep.subr.mxu0 %v8265_v43  ;;  %4239 = vmatprep.subr.mxu1 %v8266_v37  ;;  %v8360_v43 = vld [vmem:[#allocation33_spill] sm:$0xff] }
 0xf2c   :  { %4169 = vmatpush1.msra.mxu0 %v8267_v33  ;;  %4240 = vmatpush1.msra.mxu1 %v8268_v3  ;;  %v8361_v37 = vsel %vm5420_vm3, %v8359_v15, %v8360_v43 }
 0xf2d   :  { %4170 = vmatprep.subr.mxu0 %v7088_v57  ;;  %4241 = vmatprep.subr.mxu1 %v7091_v32  ;;  %v8336_v57 = vld [vmem:[#allocation39_spill] sm:$0xff] }
 0xf2e   :  { %4171 = vmatpush1.msra.mxu0 %v7094_v2  ;;  %4242 = vmatpush1.msra.mxu1 %v7097_v20  ;;  %v8337_v32 = vld [vmem:[#allocation63_spill] sm:$0xff]  ;;  %v8338_v2 = vld [vmem:[#allocation54_spill] sm:$0xff]  ;;  %v8339_v20 = vld [vmem:[#allocation60_spill] sm:$0xff] }
 0xf2f   :  { %4172 = vmatprep.subr.mxu0 %v7100_v16  ;;  %4243 = vmatprep.subr.mxu1 %v8330_v18  ;;  %v8340_v16 = vld [vmem:[#allocation55_spill] sm:$0xff] }
 0xf30   :  { %4173 = vmatpush1.msra.mxu0 %v8331_v0  ;;  %4244 = vmatpush1.msra.mxu1 %v8332_v8  ;;  %v4327_v18 = vld [vmem:[%s7535_s7 + $0x50] sm:$0xff]  ;;  %v4326_v0 = vld [vmem:[%s7535_s7 + $0x48] sm:$0xff]  ;;  %v4325_v8 = vld [vmem:[%s7535_s7 + $0x40] sm:$0xff] }
 0xf31   :  { %4174 = vmatprep.subr.mxu0 %v8333_v45  ;;  %4245 = vmatprep.subr.mxu1 %v8334_v6  ;;  %v4324_v45 = vld [vmem:[%s7535_s7 + $0x38] sm:$0xff]  ;;  %v4323_v6 = vld [vmem:[%s7535_s7 + $0x30] sm:$0xff] }
 0xf32   :  { %4175 = vmatpush1.msra.mxu0 %v8335_v22  ;;  %4246 = vmatpush1.msra.mxu1 %v8336_v57  ;;  %v4322_v22 = vld [vmem:[%s7535_s7 + $0x28] sm:$0xff]  ;;  %v4321_v57 = vld [vmem:[%s7535_s7 + $0x20] sm:$0xff] }
 0xf33   :  { %4176 = vmatprep.subr.mxu0 %v8337_v32  ;;  %4247 = vmatprep.subr.mxu1 %v8338_v2  ;;  %v4320_v32 = vld [vmem:[%s7535_s7 + $0x18] sm:$0xff]  ;;  %v4319_v2 = vld [vmem:[%s7535_s7 + $0x10] sm:$0xff] }
 0xf34   :  { %4177 = vmatpush1.msra.mxu0 %v8339_v20  ;;  %4248 = vmatpush1.msra.mxu1 %v8340_v16  ;;  %v4318_v20 = vld [vmem:[%s7535_s7 + $0x8] sm:$0xff]  ;;  %v4317_v16 = vld [vmem:[%s7535_s7] sm:$0xff] }
 0xf35   :  { %4178 = vmatprep.subr.mxu0 %v8341_v60  ;;  %4249 = vmatprep.subr.mxu1 %v8342_v55  ;;  %v8362_v55 = vld [vmem:[#allocation80_spill] sm:$0xff] }
 0xf36   :  { %4179 = vmatpush1.msra.mxu0 %v8343_v11  ;;  %4250 = vmatpush1.msra.mxu1 %v8344_v59 }
 0xf37   :  { %4180 = vmatprep.subr.mxu0 %v8345_v49  ;;  %4251 = vmatprep.subr.mxu1 %v8346_v47  ;;  %v8363_v47 = vld [vmem:[#allocation13_spill] sm:$0xff] }
 0xf38   :  { %4181 = vmatpush1.msra.mxu0 %v8347_v9  ;;  %4214 = vmatprep.mubr.f32.mxu0 %v8348_v7  ;;  %v8364_v9 = vld [vmem:[#allocation73_spill] sm:$0xff] }
 0xf39   :  { %4252 = vmatpush1.msra.mxu1 %v8349_v10  ;;  %4285 = vmatprep.mubr.f32.mxu1 %v8348_v7  ;;  %v8365_v10 = vsel %vm5416_vm2, %v8363_v47, %v8364_v9 }
 0xf3a   :  { %4500 = vmatprep.subr.mxu0 %v8348_v7 }
 0xfd9   :  { %v4046_v58 = vpop.f32.mrf.mxu0  ;;  %v4117_v5 = vpop.f32.mrf.mxu1 }
 0xfda   :  { %v4047_v21 = vadd.f32 %v4046_v58, %v8350_v13  ;;  %v4118_v33 = vadd.f32 %v4117_v5, %v8361_v37 }
 0xfdb   :  { %v4048_v17 = vpop.f32.mrf.mxu0  ;;  %v4119_v35 = vpop.f32.mrf.mxu1 }
 0xfdc   :  { %v4476_v29 = vmul.f32 -1.442695, %v4047_v21  ;;  %v4049_v61 = vadd.f32 %v4048_v17, %v8354_v63  ;;  %v4120_v53 = vadd.f32 %v4119_v35, %v8357_v24  ;;  %v8369_v63 = vld [vmem:[#allocation75_spill] sm:$0xff] }
 0xfde   :  { %4767 = vpow2.f32 %v4476_v29  ;;  %v4477_v27 = vmul.f32 -1.442695, %v4049_v61  ;;  %v4478_v3 = vmul.f32 -1.442695, %v4120_v53  ;;  %v8367_v29 = vld [vmem:[#allocation37_spill] sm:$0xff]  ;;  %v8370_v61 = vld [vmem:[#allocation72_spill] sm:$0xff] }
 0xfdf   :  { %v8371_v23 = vsel %vm5420_vm3, %v8369_v63, %v8370_v61 }
 0xfe0   :  { %4769 = vpow2.f32 %v4477_v27 }
 0xfe1   :  { %4771 = vtanh.f32 %v4118_v33 }
 0xfe2   :  { %4773 = vpow2.f32 %v4478_v3 }
 0xfeb   :  { %v4768_v31 = vpop.eup %4767 }
 0xfec   :  { %v4125_v40 = vadd.f32 1.0, %v4768_v31 }
 0xfed   :  { %v4770_v26 = vpop.eup %4769 }
 0xfee   :  { %4775 = vrcp.f32 %v4125_v40  ;;  %v4131_v48 = vadd.f32 1.0, %v4770_v26  ;;  %v4772_v39 = vpop.eup %4771 }
 0xfef   :  { %v4774_v52 = vpop.eup %4773 }
 0xff0   :  { %4777 = vrcp.f32 %v4131_v48  ;;  %v4138_v56 = vadd.f32 1.0, %v4774_v52  ;;  %v8372_v48 = vld [vmem:[#allocation81_spill] sm:$0xff] }
 0xff2   :  { %4779 = vrcp.f32 %v4138_v56 }
 0xffb   :  { %v4776_v44 = vpop.eup %4775 }
 0xffc   :  { %v4142_v19 = vmul.f32 %v4776_v44, %v4772_v39  ;;  %v4482_v44 = vld [vmem:[#allocation5] ss:$0 sm:$0xff] }
 0xffd   :  { %v4778_v28 = vpop.eup %4777 }
 0xffe   :  { %v4141_v46 = vmul.f32 %v4778_v28, %v7353_v42  ;;  %v4331_v42 = vld [vmem:[%s7535_s7 + $0x70] sm:$0xff] }
 0xfff   :  { %v4780_v12 = vpop.eup %4779 }
0x1000   :  { %v7438_v38 = vadd.f32 %v4142_v19, %v4141_v46 }
0x1002   :  { %4781 = vtanh.f32 %v7438_v38 }
0x100f   :  { %v4782_v1 = vpop.eup %4781 }
0x1010   :  { %v4145_v41 = vmul.f32 %v4782_v1, %v4780_v12 }
0x1012   :  { %4215 = vmatmul.mubr.f32.vlgmr.msra.gmra.mxu0 %v4145_v41  ;;  %4286 = vmatmul.mubr.f32.vlgmr.msra.gmra.mxu1 %v4145_v41 }
0x1013   :  { %4501 = vmatpush3.msra.mxu0 %v4332_v54  ;;  %4532 = vmatprep.mubr.msk.f32.mxu0 %vm4934_vm6, %v8348_v7 }
0x1014   :  { %4502 = vmatprep.subr.mxu0 %v8348_v7 }
0x1015   :  { %4503 = vmatpush3.msra.mxu0 %v4331_v42 }
0x1016   :  { %4504 = vmatprep.subr.mxu0 %v8348_v7 }
0x1017   :  { %4505 = vmatpush3.msra.mxu0 %v4330_v50 }
0x1018   :  { %4506 = vmatprep.subr.mxu0 %v8348_v7 }
0x1019   :  { %4507 = vmatpush3.msra.mxu0 %v4329_v34 }
0x101a   :  { %4508 = vmatprep.subr.mxu0 %v8348_v7 }
0x101b   :  { %4509 = vmatpush3.msra.mxu0 %v4328_v36 }
0x101c   :  { %4510 = vmatprep.subr.mxu0 %v8348_v7 }
0x101d   :  { %4511 = vmatpush3.msra.mxu0 %v4327_v18 }
0x101e   :  { %4512 = vmatprep.subr.mxu0 %v8348_v7 }
0x101f   :  { %4513 = vmatpush3.msra.mxu0 %v4326_v0 }
0x1020   :  { %4514 = vmatprep.subr.mxu0 %v8348_v7 }
0x1021   :  { %4515 = vmatpush3.msra.mxu0 %v4325_v8 }
0x1022   :  { %4516 = vmatprep.subr.mxu0 %v8348_v7 }
0x1023   :  { %4517 = vmatpush3.msra.mxu0 %v4324_v45 }
0x1024   :  { %4518 = vmatprep.subr.mxu0 %v8348_v7 }
0x1025   :  { %4519 = vmatpush3.msra.mxu0 %v4323_v6 }
0x1026   :  { %4520 = vmatprep.subr.mxu0 %v8348_v7 }
0x1027   :  { %4521 = vmatpush3.msra.mxu0 %v4322_v22 }
0x1028   :  { %4522 = vmatprep.subr.mxu0 %v8348_v7 }
0x1029   :  { %4523 = vmatpush3.msra.mxu0 %v4321_v57 }
0x102a   :  { %4524 = vmatprep.subr.mxu0 %v8348_v7 }
0x102b   :  { %4525 = vmatpush3.msra.mxu0 %v4320_v32 }
0x102c   :  { %4526 = vmatprep.subr.mxu0 %v8348_v7 }
0x102d   :  { %4527 = vmatpush3.msra.mxu0 %v4319_v2 }
0x102e   :  { %4528 = vmatprep.subr.mxu0 %v8348_v7 }
0x102f   :  { %4529 = vmatpush3.msra.mxu0 %v4318_v20 }
0x1030   :  { %4530 = vmatprep.subr.mxu0 %v8348_v7  ;;  %v8366_v7 = vld [vmem:[#allocation45_spill] sm:$0xff] }
0x1031   :  { %4531 = vmatpush3.msra.mxu0 %v4317_v16  ;;  %v8368_v51 = vsel %vm5438_vm4, %v8366_v7, %v8367_v29 }
0x10d2   :  { %v4216_v60 = vpop.f32.mrf.mxu0  ;;  %v4287_v13 = vpop.f32.mrf.mxu1 }
0x10d3   :  { %v4217_v11 = vadd.f32 %v4216_v60, %v8362_v55  ;;  %v4288_v5 = vadd.f32 %v4287_v13, %v8371_v23 }
0x10d4   :  { %v4218_v59 = vpop.f32.mrf.mxu0  ;;  %v4289_v17 = vpop.f32.mrf.mxu1 }
0x10d5   :  { %v4479_v49 = vmul.f32 -1.442695, %v4217_v11  ;;  %v4219_v58 = vadd.f32 %v4218_v59, %v8365_v10  ;;  %v4290_v25 = vadd.f32 %v4289_v17, %v8368_v51 }
0x10d7   :  { %4783 = vpow2.f32 %v4479_v49  ;;  %v4480_v21 = vmul.f32 -1.442695, %v4219_v58  ;;  %v4481_v27 = vmul.f32 -1.442695, %v4290_v25 }
0x10d9   :  { %4785 = vpow2.f32 %v4480_v21 }
0x10da   :  { %4787 = vtanh.f32 %v4288_v5 }
0x10db   :  { %4789 = vpow2.f32 %v4481_v27 }
0x10e4   :  { %v4784_v35 = vpop.eup %4783 }
0x10e5   :  { %v4295_v4 = vadd.f32 1.0, %v4784_v35 }
0x10e6   :  { %v4786_v14 = vpop.eup %4785 }
0x10e7   :  { %4791 = vrcp.f32 %v4295_v4  ;;  %v4301_v24 = vadd.f32 1.0, %v4786_v14  ;;  %v4788_v62 = vpop.eup %4787 }
0x10e8   :  { %v4790_v53 = vpop.eup %4789 }
0x10e9   :  { %4793 = vrcp.f32 %v4301_v24  ;;  %v4308_v33 = vadd.f32 1.0, %v4790_v53 }
0x10eb   :  { %4795 = vrcp.f32 %v4308_v33 }
0x10f4   :  { %v4792_v15 = vpop.eup %4791 }
0x10f5   :  { %v4312_v43 = vmul.f32 %v4792_v15, %v4788_v62 }
0x10f6   :  { %v4794_v37 = vpop.eup %4793 }
0x10f7   :  { %v4311_v30 = vmul.f32 %v4794_v37, %v7438_v38 }
0x10f8   :  { %v4796_v31 = vpop.eup %4795 }
0x10f9   :  { %v4313_v3 = vadd.f32 %v4312_v43, %v4311_v30 }
0x10fb   :  { %4797 = vtanh.f32 %v4313_v3 }
0x1108   :  { %v4798_v40 = vpop.eup %4797 }
0x1109   :  { %v4315_v26 = vmul.f32 %v4798_v40, %v4796_v31 }
0x110b   :  { %v4316_v52 = vsel %vm128_vm1, %v4315_v26, %v8372_v48 }
0x110c   :  { %4533 = vmatmul.mubr.f32.vlgmr.msra.gmra.mxu0 %v4316_v52 }
0x11cc   :  { %v4406_v19 = vpop.f32.mrf.mxu0 }
0x11cd   :  { %v4407_v28 = vadd.f32 %v4482_v44, %v4406_v19 }
0x11ce   :  { %v4534_v56 = vpop.f32.mrf.mxu0 }
0x11cf   :  { %4411 = vst.msk [vmem:[%s7537_s9] sm:$0xff] %vm4410_vm7, %v4407_v28 }
0x11d0   :  { %4416 = vsyncpa [#allocation7], 1 }
0x11d1   :  { %4417 = vsyncpa [#allocation9], 1 }

</bundles_post_ra>
